<compile_context>
chip_gen: v7x
topology: tpu7x:2x2x1
jax: 0.10.0
libtpu: 0.0.40
codegen_flags: <defaults>
</compile_context>

<pallas_src>
import functools

import jax
import jax.numpy as jnp
from jax.experimental import pallas as pl
from jax.experimental.pallas import tpu as pltpu

# ----------------------------- config (cfg dict of mmTrans) -----------------------------
LANE_CHANNELS = 7            # cfg['lane_channels']  (2 + 2 + 3 from the lane_v concat)
SUBGRAPH_WIDTH = 32          # cfg['subgraph_width'] -> polyline_vec_shape = 64
NUM_SUBGRAPH_LAYERS = 3      # cfg['num_subgraph_layres']
HIST_IN_CHANNELS = 4         # cfg['in_channels']
HISTORY_NUM_FRAMES = 20      # -> OBS_LEN = 19
FUTURE_NUM_FRAMES = 30
LANE_LENGTH = 10             # cfg['lane_length']
NUM_TRAJ_MASK = 5
LN_EPS = 1e-5


def _round_up(x, m):
    return ((x + m - 1) // m) * m


# ----------------------------- Pallas kernel: LaneNet subgraph -----------------------------
def lanenet_kernel(x_ref, *refs):
    """LaneNet subgraph for one tile of lanes.

    x_ref : (P=9, TN, C_in)   point-major vectorized lane points for TN lanes
    refs  : w0 (C,W), b0/g0/be0 (1,W),
            then for each layer l>=1: w_top (W,W), w_bot (W,W), b/g/be (1,W),
            then out_ref (TN, OUT_PAD) with OUT_PAD a multiple of 128.
    The final LaneNet output per lane is concat([max_p h_last, max_p h_last]) — computed
    analytically, never materializing the (TN, P, 2W) concat.
    """
    out_ref = refs[-1]
    prefs = refs[:-1]
    P = x_ref.shape[0]

    def ln_relu(y, g, beta):
        # nn.LayerNorm over the feature dim: biased variance, eps=1e-5
        mu = jnp.mean(y, axis=-1, keepdims=True)
        var = jnp.mean(jnp.square(y - mu), axis=-1, keepdims=True)
        y = (y - mu) * jax.lax.rsqrt(var + LN_EPS)
        return jnp.maximum(y * g + beta, 0.0)

    # --- layer 0: shared (C, W) weight, one (TN, C) x (C, W) matmul per point slab ---
    w0, b0, g0, be0 = (prefs[0][...], prefs[1][...], prefs[2][...], prefs[3][...])
    hs = []
    for p in range(P):
        y = jnp.dot(x_ref[p], w0, preferred_element_type=jnp.float32) + b0
        hs.append(ln_relu(y, g0, be0))
    hmax = functools.reduce(jnp.maximum, hs)          # (TN, W)  max over points

    # --- layers 1..L-1: split-weight form of concat([h, bcast(hmax)]) @ W ---
    idx = 4
    for _ in range(NUM_SUBGRAPH_LAYERS - 1):
        wt = prefs[idx][...]      # (W, W)  acts on the per-point features
        wb = prefs[idx + 1][...]  # (W, W)  acts on the per-lane max feature
        b = prefs[idx + 2][...]
        g = prefs[idx + 3][...]
        be = prefs[idx + 4][...]
        idx += 5
        # hmax contribution + bias: computed once per lane, not per point
        yb = jnp.dot(hmax, wb, preferred_element_type=jnp.float32) + b   # (TN, W)
        new_hs = []
        for p in range(P):
            y = jnp.dot(hs[p], wt, preferred_element_type=jnp.float32) + yb
            new_hs.append(ln_relu(y, g, be))
        hs = new_hs
        hmax = functools.reduce(jnp.maximum, hs)

    # final output per lane = concat([hmax, hmax]); replicate to fill the 128-lane-dense block
    reps = out_ref.shape[-1] // hmax.shape[-1]
    out_ref[...] = jnp.concatenate([hmax] * reps, axis=-1)


def lanenet_pallas(lane_v, params, tile_lanes=256):
    """lane_v: [B, max_lane, 9, 7] -> [B, max_lane, 2*SUBGRAPH_WIDTH]"""
    B, L, P, C = lane_v.shape
    W = SUBGRAPH_WIDTH
    N = B * L

    # tile / padding: no divisibility requirement on B * max_lane
    tile = min(tile_lanes, _round_up(N, 8))
    tile = max(tile, 8)
    n_pad = _round_up(N, tile)

    x = lane_v.reshape(N, P, C).astype(jnp.float32)
    if n_pad != N:
        x = jnp.pad(x, ((0, n_pad - N), (0, 0), (0, 0)))
    # point-major layout: (P, n_pad, C) — each point slab is a sublane-dense 2-D matmul operand
    x = jnp.transpose(x, (1, 0, 2))

    # flatten / split parameters in the wrapper (exact algebra, reference keeps the full weights)
    flat = [params['w0'],
            params['b0'].reshape(1, W), params['g0'].reshape(1, W), params['beta0'].reshape(1, W)]
    for l in range(1, NUM_SUBGRAPH_LAYERS):
        w = params[f'w{l}']                      # (2W, W)
        flat += [w[:W, :], w[W:, :],             # w_top, w_bot
                 params[f'b{l}'].reshape(1, W),
                 params[f'g{l}'].reshape(1, W),
                 params[f'beta{l}'].reshape(1, W)]

    out_width = max(128, _round_up(2 * W, 128))   # lane-dense (unmasked) stores
    assert out_width % W == 0

    in_specs = [pl.BlockSpec((P, tile, C), lambda i: (0, i, 0))]
    for arr in flat:
        in_specs.append(pl.BlockSpec(arr.shape, lambda i, nd=arr.ndim: (0,) * nd))

    # advisory cost estimate (helps XLA schedule surrounding ops)
    flops_per_lane = (2 * P * C * W
                      + (NUM_SUBGRAPH_LAYERS - 1) * (2 * P * W * W + 2 * W * W))
    cost = pl.CostEstimate(
        flops=int(n_pad * flops_per_lane),
        transcendentals=int(n_pad * P * NUM_SUBGRAPH_LAYERS),
        bytes_accessed=int(n_pad * P * C * 4 + n_pad * out_width * 4
                           + sum(int(a.size) * 4 for a in flat)),
    )

    out = pl.pallas_call(
        lanenet_kernel,
        out_shape=jax.ShapeDtypeStruct((n_pad, out_width), jnp.float32),
        grid_spec=pltpu.PrefetchScalarGridSpec(
            num_scalar_prefetch=0,
            grid=(n_pad // tile,),
            in_specs=in_specs,
            out_specs=pl.BlockSpec((tile, out_width), lambda i: (i, 0)),
        ),
        compiler_params=pltpu.CompilerParams(
            dimension_semantics=("parallel",)),
        cost_estimate=cost,
    )(x, *flat)

    return out[:N, :2 * W].reshape(B, L, 2 * W)


# ----------------------------- pure-JAX reference (for verification) -----------------------------
def lanenet_ref(lane_v, params):
    x = lane_v.astype(jnp.float32)
    for l in range(NUM_SUBGRAPH_LAYERS):
        w = params[f'w{l}']
        b = params[f'b{l}'].reshape(-1)
        g = params[f'g{l}'].reshape(-1)
        be = params[f'beta{l}'].reshape(-1)
        h = jnp.einsum('blpc,cw->blpw', x, w) + b
        mu = jnp.mean(h, axis=-1, keepdims=True)
        var = jnp.mean(jnp.square(h - mu), axis=-1, keepdims=True)
        h = (h - mu) / jnp.sqrt(var + LN_EPS) * g + be
        h = jnp.maximum(h, 0.0)
        hmax = jnp.max(h, axis=-2, keepdims=True)
        x = jnp.concatenate([h, jnp.broadcast_to(hmax, h.shape)], axis=-1)
    return jnp.max(x, axis=-2)


# ----------------------------- parameter init (deterministic, synthetic) -----------------------------
def init_params(key):
    params = {}
    in_c = LANE_CHANNELS
    for l in range(NUM_SUBGRAPH_LAYERS):
        key, k1, k2 = jax.random.split(key, 3)
        params[f'w{l}'] = (jax.random.normal(k1, (in_c, SUBGRAPH_WIDTH), jnp.float32)
                           * (float(in_c) ** -0.5))
        params[f'b{l}'] = jax.random.normal(k2, (1, 1, SUBGRAPH_WIDTH), jnp.float32) * 0.01
        params[f'g{l}'] = jnp.ones((1, 1, SUBGRAPH_WIDTH), jnp.float32)      # LayerNorm weight
        params[f'beta{l}'] = jnp.zeros((1, 1, SUBGRAPH_WIDTH), jnp.float32)  # LayerNorm bias
        in_c = 2 * SUBGRAPH_WIDTH
    return params


# ----------------------------- mmTrans.forward -----------------------------
def mm_trans_forward(params, data, key):
    hist = data['HISTORY']        # [B, max_agent, 19, 4]
    pos = data['POS']             # [B, max_agent, 2]
    lane = data['LANE']           # [B, max_lane, 10, 5]
    valid_len = data['VALID_LEN']  # [B, 2] int32

    B, max_agent_num = hist.shape[0], hist.shape[1]
    max_lane_num = lane.shape[1]
    traj_valid_len = valid_len[:, 0]
    lane_valid_len = valid_len[:, 1]
    # NOTE: inputs are constructed so that the padded dims equal max(valid_len), as in the torch code.

    # preprocess_traj: social mask [B, 1, max_agent_num]
    social_mask = (jnp.arange(max_agent_num)[None, :]
                   < traj_valid_len[:, None]).astype(jnp.float32)[:, None, :]

    # preprocess_lane: vectorize lane segments and run LaneNet (Pallas kernel)
    lane_v = jnp.concatenate(
        [lane[:, :, :-1, :2], lane[:, :, 1:, :2], lane[:, :, 1:, 2:]], axis=-1)  # [B, L, 9, 7]
    lane_mask = (jnp.arange(max_lane_num)[None, :]
                 < lane_valid_len[:, None]).astype(jnp.float32)[:, None, :]
    lane_enc = lanenet_pallas(lane_v, params)                                    # [B, L, 64]

    # traj_mask: zero NUM_TRAJ_MASK random distinct timesteps of agent 0, all 4 features
    # (torch.multinomial replaced by deterministic jax.random per-batch permutation)
    T = hist.shape[2]
    keys = jax.random.split(key, B)
    mask_idx = jax.vmap(lambda k: jax.random.permutation(k, T)[:NUM_TRAJ_MASK])(keys)  # [B, 5]
    tmask = jnp.zeros((B, T), bool).at[jnp.arange(B)[:, None], mask_idx].set(True)     # [B, T]
    agent0_masked = jnp.where(tmask[:, :, None], 0.0, hist[:, 0, :, :])
    masked_trajs = hist.at[:, 0, :, :].set(agent0_masked)

    # TODO(synk): stacked_transformer is an externally injected module (constructor argument) whose
    # semantics are undefined in this file; return the tensors that would be passed to it instead.
    return {
        'masked_trajs': masked_trajs,
        'pos': pos,
        'max_agent_num': jnp.max(traj_valid_len),
        'social_mask': social_mask,
        'lane_enc': lane_enc,
        'lane_mask': lane_mask,
    }


# ----------------------------- main -----------------------------
if __name__ == "__main__":
    import numpy as np

    key = jax.random.PRNGKey(0)
    kp, kh, kpos, klane, kmask, kbig = jax.random.split(key, 6)

    B, A, T, L, PTS = 2, 6, HISTORY_NUM_FRAMES - 1, 8, LANE_LENGTH
    hist = jax.random.normal(kh, (B, A, T, HIST_IN_CHANNELS), jnp.float32)
    pos = jax.random.normal(kpos, (B, A, 2), jnp.float32)
    lane = jax.random.normal(klane, (B, L, PTS, 5), jnp.float32)
    # valid lengths: max over batch equals the padded dims (A, L)
    valid_len = jnp.array([[A, L], [4, 5]], dtype=jnp.int32)

    data = {'HISTORY': hist, 'POS': pos, 'LANE': lane, 'VALID_LEN': valid_len}
    params = init_params(kp)

    out = mm_trans_forward(params, data, kmask)
    out = jax.tree_util.tree_map(jax.block_until_ready, out)

    # verify the Pallas LaneNet against the pure-JAX reference (small case, grid = 1)
    lane_v = jnp.concatenate(
        [lane[:, :, :-1, :2], lane[:, :, 1:, :2], lane[:, :, 1:, 2:]], axis=-1)
    ref = jax.block_until_ready(lanenet_ref(lane_v, params))
    np.testing.assert_allclose(np.asarray(out['lane_enc']), np.asarray(ref),
                               rtol=2e-3, atol=2e-3)

    # second check: a non-tile-multiple lane count with a small tile (exercises padding + grid > 1)
    lane_v_big = jax.random.normal(kbig, (2, 37, PTS - 1, LANE_CHANNELS), jnp.float32)
    got_big = jax.block_until_ready(lanenet_pallas(lane_v_big, params, tile_lanes=16))
    ref_big = jax.block_until_ready(lanenet_ref(lane_v_big, params))
    np.testing.assert_allclose(np.asarray(got_big), np.asarray(ref_big),
                               rtol=2e-3, atol=2e-3)

    assert out['lane_enc'].shape == (B, L, 2 * SUBGRAPH_WIDTH)
    assert out['social_mask'].shape == (B, 1, A)
    assert out['lane_mask'].shape == (B, 1, L)
    assert out['masked_trajs'].shape == hist.shape

    print("KERNEL_OK")
</pallas_src>

<mosaic_0001>
module attributes {stable_mosaic.version = 11 : i64} {
  func.func @lanenet_kernel(%arg0: i32, %arg1: memref<9x16x7xf32, #tpu.memory_space<vmem>>, %arg2: memref<7x32xf32, #tpu.memory_space<vmem>>, %arg3: memref<1x32xf32, #tpu.memory_space<vmem>>, %arg4: memref<1x32xf32, #tpu.memory_space<vmem>>, %arg5: memref<1x32xf32, #tpu.memory_space<vmem>>, %arg6: memref<32x32xf32, #tpu.memory_space<vmem>>, %arg7: memref<32x32xf32, #tpu.memory_space<vmem>>, %arg8: memref<1x32xf32, #tpu.memory_space<vmem>>, %arg9: memref<1x32xf32, #tpu.memory_space<vmem>>, %arg10: memref<1x32xf32, #tpu.memory_space<vmem>>, %arg11: memref<32x32xf32, #tpu.memory_space<vmem>>, %arg12: memref<32x32xf32, #tpu.memory_space<vmem>>, %arg13: memref<1x32xf32, #tpu.memory_space<vmem>>, %arg14: memref<1x32xf32, #tpu.memory_space<vmem>>, %arg15: memref<1x32xf32, #tpu.memory_space<vmem>>, %arg16: memref<16x128xf32, #tpu.memory_space<vmem>>) attributes {dimension_semantics = [#tpu.dimension_semantics<parallel>], iteration_bounds = array<i64: 1>, scalar_prefetch = 0 : i64, scratch_operands = 0 : i64, tpu.core_type = #tpu.core_type<tc>, window_params = [{transform_indices = @transform_0, window_bounds = array<i64: 9, 16, 7>}, {pipeline_mode = #tpu.pipeline_mode<synchronous>, transform_indices = @transform_1, window_bounds = array<i64: 7, 32>}, {pipeline_mode = #tpu.pipeline_mode<synchronous>, transform_indices = @transform_2, window_bounds = array<i64: 1, 32>}, {pipeline_mode = #tpu.pipeline_mode<synchronous>, transform_indices = @transform_3, window_bounds = array<i64: 1, 32>}, {pipeline_mode = #tpu.pipeline_mode<synchronous>, transform_indices = @transform_4, window_bounds = array<i64: 1, 32>}, {pipeline_mode = #tpu.pipeline_mode<synchronous>, transform_indices = @transform_5, window_bounds = array<i64: 32, 32>}, {pipeline_mode = #tpu.pipeline_mode<synchronous>, transform_indices = @transform_6, window_bounds = array<i64: 32, 32>}, {pipeline_mode = #tpu.pipeline_mode<synchronous>, transform_indices = @transform_7, window_bounds = array<i64: 1, 32>}, {pipeline_mode = #tpu.pipeline_mode<synchronous>, transform_indices = @transform_8, window_bounds = array<i64: 1, 32>}, {pipeline_mode = #tpu.pipeline_mode<synchronous>, transform_indices = @transform_9, window_bounds = array<i64: 1, 32>}, {pipeline_mode = #tpu.pipeline_mode<synchronous>, transform_indices = @transform_10, window_bounds = array<i64: 32, 32>}, {pipeline_mode = #tpu.pipeline_mode<synchronous>, transform_indices = @transform_11, window_bounds = array<i64: 32, 32>}, {pipeline_mode = #tpu.pipeline_mode<synchronous>, transform_indices = @transform_12, window_bounds = array<i64: 1, 32>}, {pipeline_mode = #tpu.pipeline_mode<synchronous>, transform_indices = @transform_13, window_bounds = array<i64: 1, 32>}, {pipeline_mode = #tpu.pipeline_mode<synchronous>, transform_indices = @transform_14, window_bounds = array<i64: 1, 32>}, {transform_indices = @transform_15, window_bounds = array<i64: 16, 128>}]} {
    %c0 = arith.constant 0 : index
    %c0_0 = arith.constant 0 : index
    %0 = vector.load %arg2[%c0, %c0_0] : memref<7x32xf32, #tpu.memory_space<vmem>>, vector<7x32xf32>
    %c0_1 = arith.constant 0 : index
    %c0_2 = arith.constant 0 : index
    %1 = vector.load %arg3[%c0_1, %c0_2] : memref<1x32xf32, #tpu.memory_space<vmem>>, vector<1x32xf32>
    %c0_3 = arith.constant 0 : index
    %c0_4 = arith.constant 0 : index
    %2 = vector.load %arg4[%c0_3, %c0_4] : memref<1x32xf32, #tpu.memory_space<vmem>>, vector<1x32xf32>
    %c0_5 = arith.constant 0 : index
    %c0_6 = arith.constant 0 : index
    %3 = vector.load %arg5[%c0_5, %c0_6] : memref<1x32xf32, #tpu.memory_space<vmem>>, vector<1x32xf32>
    %c0_7 = arith.constant 0 : index
    %c0_8 = arith.constant 0 : index
    %c0_9 = arith.constant 0 : index
    %4 = vector.load %arg1[%c0_7, %c0_8, %c0_9] : memref<9x16x7xf32, #tpu.memory_space<vmem>>, vector<1x16x7xf32>
    %5 = vector.shape_cast %4 : vector<1x16x7xf32> to vector<16x7xf32>
    %cst = arith.constant dense<0.000000e+00> : vector<16x32xf32>
    %6 = tpu.matmul %5, %0, %cst {dimension_numbers = #tpu.dot_dimension_numbers<[1], [0], [0], [1], [0, 0, 1, 1], [], []>} : vector<16x7xf32>, vector<7x32xf32>, vector<16x32xf32> -> vector<16x32xf32>
    %7 = vector.broadcast %1 : vector<1x32xf32> to vector<16x32xf32>
    %8 = arith.addf %6, %7 : vector<16x32xf32>
    %cst_10 = arith.constant dense<0.000000e+00> : vector<16xf32>
    %9 = vector.multi_reduction <add>, %8, %cst_10 [1] : vector<16x32xf32> to vector<16xf32>
    %10 = vector.shape_cast %9 : vector<16xf32> to vector<16x1xf32>
    %cst_11 = arith.constant 3.200000e+01 : f32
    %11 = vector.broadcast %cst_11 : f32 to vector<16x1xf32>
    %12 = arith.divf %10, %11 : vector<16x1xf32>
    %13 = vector.broadcast %12 : vector<16x1xf32> to vector<16x32xf32>
    %14 = arith.subf %8, %13 : vector<16x32xf32>
    %15 = arith.mulf %14, %14 : vector<16x32xf32>
    %cst_12 = arith.constant dense<0.000000e+00> : vector<16xf32>
    %16 = vector.multi_reduction <add>, %15, %cst_12 [1] : vector<16x32xf32> to vector<16xf32>
    %17 = vector.shape_cast %16 : vector<16xf32> to vector<16x1xf32>
    %cst_13 = arith.constant 3.200000e+01 : f32
    %18 = vector.broadcast %cst_13 : f32 to vector<16x1xf32>
    %19 = arith.divf %17, %18 : vector<16x1xf32>
    %20 = vector.broadcast %12 : vector<16x1xf32> to vector<16x32xf32>
    %21 = arith.subf %8, %20 : vector<16x32xf32>
    %cst_14 = arith.constant 9.99999974E-6 : f32
    %22 = vector.broadcast %cst_14 : f32 to vector<16x1xf32>
    %23 = arith.addf %19, %22 : vector<16x1xf32>
    %24 = math.rsqrt %23 : vector<16x1xf32>
    %25 = vector.broadcast %24 : vector<16x1xf32> to vector<16x32xf32>
    %26 = arith.mulf %21, %25 : vector<16x32xf32>
    %27 = vector.broadcast %2 : vector<1x32xf32> to vector<16x32xf32>
    %28 = arith.mulf %26, %27 : vector<16x32xf32>
    %29 = vector.broadcast %3 : vector<1x32xf32> to vector<16x32xf32>
    %30 = arith.addf %28, %29 : vector<16x32xf32>
    %cst_15 = arith.constant 0.000000e+00 : f32
    %31 = vector.broadcast %cst_15 : f32 to vector<16x32xf32>
    %32 = arith.maximumf %30, %31 : vector<16x32xf32>
    %c1 = arith.constant 1 : index
    %c0_16 = arith.constant 0 : index
    %c0_17 = arith.constant 0 : index
    %33 = vector.load %arg1[%c1, %c0_16, %c0_17] : memref<9x16x7xf32, #tpu.memory_space<vmem>>, vector<1x16x7xf32>
    %34 = vector.shape_cast %33 : vector<1x16x7xf32> to vector<16x7xf32>
    %cst_18 = arith.constant dense<0.000000e+00> : vector<16x32xf32>
    %35 = tpu.matmul %34, %0, %cst_18 {dimension_numbers = #tpu.dot_dimension_numbers<[1], [0], [0], [1], [0, 0, 1, 1], [], []>} : vector<16x7xf32>, vector<7x32xf32>, vector<16x32xf32> -> vector<16x32xf32>
    %36 = vector.broadcast %1 : vector<1x32xf32> to vector<16x32xf32>
    %37 = arith.addf %35, %36 : vector<16x32xf32>
    %cst_19 = arith.constant dense<0.000000e+00> : vector<16xf32>
    %38 = vector.multi_reduction <add>, %37, %cst_19 [1] : vector<16x32xf32> to vector<16xf32>
    %39 = vector.shape_cast %38 : vector<16xf32> to vector<16x1xf32>
    %cst_20 = arith.constant 3.200000e+01 : f32
    %40 = vector.broadcast %cst_20 : f32 to vector<16x1xf32>
    %41 = arith.divf %39, %40 : vector<16x1xf32>
    %42 = vector.broadcast %41 : vector<16x1xf32> to vector<16x32xf32>
    %43 = arith.subf %37, %42 : vector<16x32xf32>
    %44 = arith.mulf %43, %43 : vector<16x32xf32>
    %cst_21 = arith.constant dense<0.000000e+00> : vector<16xf32>
    %45 = vector.multi_reduction <add>, %44, %cst_21 [1] : vector<16x32xf32> to vector<16xf32>
    %46 = vector.shape_cast %45 : vector<16xf32> to vector<16x1xf32>
    %cst_22 = arith.constant 3.200000e+01 : f32
    %47 = vector.broadcast %cst_22 : f32 to vector<16x1xf32>
    %48 = arith.divf %46, %47 : vector<16x1xf32>
    %49 = vector.broadcast %41 : vector<16x1xf32> to vector<16x32xf32>
    %50 = arith.subf %37, %49 : vector<16x32xf32>
    %cst_23 = arith.constant 9.99999974E-6 : f32
    %51 = vector.broadcast %cst_23 : f32 to vector<16x1xf32>
    %52 = arith.addf %48, %51 : vector<16x1xf32>
    %53 = math.rsqrt %52 : vector<16x1xf32>
    %54 = vector.broadcast %53 : vector<16x1xf32> to vector<16x32xf32>
    %55 = arith.mulf %50, %54 : vector<16x32xf32>
    %56 = vector.broadcast %2 : vector<1x32xf32> to vector<16x32xf32>
    %57 = arith.mulf %55, %56 : vector<16x32xf32>
    %58 = vector.broadcast %3 : vector<1x32xf32> to vector<16x32xf32>
    %59 = arith.addf %57, %58 : vector<16x32xf32>
    %cst_24 = arith.constant 0.000000e+00 : f32
    %60 = vector.broadcast %cst_24 : f32 to vector<16x32xf32>
    %61 = arith.maximumf %59, %60 : vector<16x32xf32>
    %c2 = arith.constant 2 : index
    %c0_25 = arith.constant 0 : index
    %c0_26 = arith.constant 0 : index
    %62 = vector.load %arg1[%c2, %c0_25, %c0_26] : memref<9x16x7xf32, #tpu.memory_space<vmem>>, vector<1x16x7xf32>
    %63 = vector.shape_cast %62 : vector<1x16x7xf32> to vector<16x7xf32>
    %cst_27 = arith.constant dense<0.000000e+00> : vector<16x32xf32>
    %64 = tpu.matmul %63, %0, %cst_27 {dimension_numbers = #tpu.dot_dimension_numbers<[1], [0], [0], [1], [0, 0, 1, 1], [], []>} : vector<16x7xf32>, vector<7x32xf32>, vector<16x32xf32> -> vector<16x32xf32>
    %65 = vector.broadcast %1 : vector<1x32xf32> to vector<16x32xf32>
    %66 = arith.addf %64, %65 : vector<16x32xf32>
    %cst_28 = arith.constant dense<0.000000e+00> : vector<16xf32>
    %67 = vector.multi_reduction <add>, %66, %cst_28 [1] : vector<16x32xf32> to vector<16xf32>
    %68 = vector.shape_cast %67 : vector<16xf32> to vector<16x1xf32>
    %cst_29 = arith.constant 3.200000e+01 : f32
    %69 = vector.broadcast %cst_29 : f32 to vector<16x1xf32>
    %70 = arith.divf %68, %69 : vector<16x1xf32>
    %71 = vector.broadcast %70 : vector<16x1xf32> to vector<16x32xf32>
    %72 = arith.subf %66, %71 : vector<16x32xf32>
    %73 = arith.mulf %72, %72 : vector<16x32xf32>
    %cst_30 = arith.constant dense<0.000000e+00> : vector<16xf32>
    %74 = vector.multi_reduction <add>, %73, %cst_30 [1] : vector<16x32xf32> to vector<16xf32>
    %75 = vector.shape_cast %74 : vector<16xf32> to vector<16x1xf32>
    %cst_31 = arith.constant 3.200000e+01 : f32
    %76 = vector.broadcast %cst_31 : f32 to vector<16x1xf32>
    %77 = arith.divf %75, %76 : vector<16x1xf32>
    %78 = vector.broadcast %70 : vector<16x1xf32> to vector<16x32xf32>
    %79 = arith.subf %66, %78 : vector<16x32xf32>
    %cst_32 = arith.constant 9.99999974E-6 : f32
    %80 = vector.broadcast %cst_32 : f32 to vector<16x1xf32>
    %81 = arith.addf %77, %80 : vector<16x1xf32>
    %82 = math.rsqrt %81 : vector<16x1xf32>
    %83 = vector.broadcast %82 : vector<16x1xf32> to vector<16x32xf32>
    %84 = arith.mulf %79, %83 : vector<16x32xf32>
    %85 = vector.broadcast %2 : vector<1x32xf32> to vector<16x32xf32>
    %86 = arith.mulf %84, %85 : vector<16x32xf32>
    %87 = vector.broadcast %3 : vector<1x32xf32> to vector<16x32xf32>
    %88 = arith.addf %86, %87 : vector<16x32xf32>
    %cst_33 = arith.constant 0.000000e+00 : f32
    %89 = vector.broadcast %cst_33 : f32 to vector<16x32xf32>
    %90 = arith.maximumf %88, %89 : vector<16x32xf32>
    %c3 = arith.constant 3 : index
    %c0_34 = arith.constant 0 : index
    %c0_35 = arith.constant 0 : index
    %91 = vector.load %arg1[%c3, %c0_34, %c0_35] : memref<9x16x7xf32, #tpu.memory_space<vmem>>, vector<1x16x7xf32>
    %92 = vector.shape_cast %91 : vector<1x16x7xf32> to vector<16x7xf32>
    %cst_36 = arith.constant dense<0.000000e+00> : vector<16x32xf32>
    %93 = tpu.matmul %92, %0, %cst_36 {dimension_numbers = #tpu.dot_dimension_numbers<[1], [0], [0], [1], [0, 0, 1, 1], [], []>} : vector<16x7xf32>, vector<7x32xf32>, vector<16x32xf32> -> vector<16x32xf32>
    %94 = vector.broadcast %1 : vector<1x32xf32> to vector<16x32xf32>
    %95 = arith.addf %93, %94 : vector<16x32xf32>
    %cst_37 = arith.constant dense<0.000000e+00> : vector<16xf32>
    %96 = vector.multi_reduction <add>, %95, %cst_37 [1] : vector<16x32xf32> to vector<16xf32>
    %97 = vector.shape_cast %96 : vector<16xf32> to vector<16x1xf32>
    %cst_38 = arith.constant 3.200000e+01 : f32
    %98 = vector.broadcast %cst_38 : f32 to vector<16x1xf32>
    %99 = arith.divf %97, %98 : vector<16x1xf32>
    %100 = vector.broadcast %99 : vector<16x1xf32> to vector<16x32xf32>
    %101 = arith.subf %95, %100 : vector<16x32xf32>
    %102 = arith.mulf %101, %101 : vector<16x32xf32>
    %cst_39 = arith.constant dense<0.000000e+00> : vector<16xf32>
    %103 = vector.multi_reduction <add>, %102, %cst_39 [1] : vector<16x32xf32> to vector<16xf32>
    %104 = vector.shape_cast %103 : vector<16xf32> to vector<16x1xf32>
    %cst_40 = arith.constant 3.200000e+01 : f32
    %105 = vector.broadcast %cst_40 : f32 to vector<16x1xf32>
    %106 = arith.divf %104, %105 : vector<16x1xf32>
    %107 = vector.broadcast %99 : vector<16x1xf32> to vector<16x32xf32>
    %108 = arith.subf %95, %107 : vector<16x32xf32>
    %cst_41 = arith.constant 9.99999974E-6 : f32
    %109 = vector.broadcast %cst_41 : f32 to vector<16x1xf32>
    %110 = arith.addf %106, %109 : vector<16x1xf32>
    %111 = math.rsqrt %110 : vector<16x1xf32>
    %112 = vector.broadcast %111 : vector<16x1xf32> to vector<16x32xf32>
    %113 = arith.mulf %108, %112 : vector<16x32xf32>
    %114 = vector.broadcast %2 : vector<1x32xf32> to vector<16x32xf32>
    %115 = arith.mulf %113, %114 : vector<16x32xf32>
    %116 = vector.broadcast %3 : vector<1x32xf32> to vector<16x32xf32>
    %117 = arith.addf %115, %116 : vector<16x32xf32>
    %cst_42 = arith.constant 0.000000e+00 : f32
    %118 = vector.broadcast %cst_42 : f32 to vector<16x32xf32>
    %119 = arith.maximumf %117, %118 : vector<16x32xf32>
    %c4 = arith.constant 4 : index
    %c0_43 = arith.constant 0 : index
    %c0_44 = arith.constant 0 : index
    %120 = vector.load %arg1[%c4, %c0_43, %c0_44] : memref<9x16x7xf32, #tpu.memory_space<vmem>>, vector<1x16x7xf32>
    %121 = vector.shape_cast %120 : vector<1x16x7xf32> to vector<16x7xf32>
    %cst_45 = arith.constant dense<0.000000e+00> : vector<16x32xf32>
    %122 = tpu.matmul %121, %0, %cst_45 {dimension_numbers = #tpu.dot_dimension_numbers<[1], [0], [0], [1], [0, 0, 1, 1], [], []>} : vector<16x7xf32>, vector<7x32xf32>, vector<16x32xf32> -> vector<16x32xf32>
    %123 = vector.broadcast %1 : vector<1x32xf32> to vector<16x32xf32>
    %124 = arith.addf %122, %123 : vector<16x32xf32>
    %cst_46 = arith.constant dense<0.000000e+00> : vector<16xf32>
    %125 = vector.multi_reduction <add>, %124, %cst_46 [1] : vector<16x32xf32> to vector<16xf32>
    %126 = vector.shape_cast %125 : vector<16xf32> to vector<16x1xf32>
    %cst_47 = arith.constant 3.200000e+01 : f32
    %127 = vector.broadcast %cst_47 : f32 to vector<16x1xf32>
    %128 = arith.divf %126, %127 : vector<16x1xf32>
    %129 = vector.broadcast %128 : vector<16x1xf32> to vector<16x32xf32>
    %130 = arith.subf %124, %129 : vector<16x32xf32>
    %131 = arith.mulf %130, %130 : vector<16x32xf32>
    %cst_48 = arith.constant dense<0.000000e+00> : vector<16xf32>
    %132 = vector.multi_reduction <add>, %131, %cst_48 [1] : vector<16x32xf32> to vector<16xf32>
    %133 = vector.shape_cast %132 : vector<16xf32> to vector<16x1xf32>
    %cst_49 = arith.constant 3.200000e+01 : f32
    %134 = vector.broadcast %cst_49 : f32 to vector<16x1xf32>
    %135 = arith.divf %133, %134 : vector<16x1xf32>
    %136 = vector.broadcast %128 : vector<16x1xf32> to vector<16x32xf32>
    %137 = arith.subf %124, %136 : vector<16x32xf32>
    %cst_50 = arith.constant 9.99999974E-6 : f32
    %138 = vector.broadcast %cst_50 : f32 to vector<16x1xf32>
    %139 = arith.addf %135, %138 : vector<16x1xf32>
    %140 = math.rsqrt %139 : vector<16x1xf32>
    %141 = vector.broadcast %140 : vector<16x1xf32> to vector<16x32xf32>
    %142 = arith.mulf %137, %141 : vector<16x32xf32>
    %143 = vector.broadcast %2 : vector<1x32xf32> to vector<16x32xf32>
    %144 = arith.mulf %142, %143 : vector<16x32xf32>
    %145 = vector.broadcast %3 : vector<1x32xf32> to vector<16x32xf32>
    %146 = arith.addf %144, %145 : vector<16x32xf32>
    %cst_51 = arith.constant 0.000000e+00 : f32
    %147 = vector.broadcast %cst_51 : f32 to vector<16x32xf32>
    %148 = arith.maximumf %146, %147 : vector<16x32xf32>
    %c5 = arith.constant 5 : index
    %c0_52 = arith.constant 0 : index
    %c0_53 = arith.constant 0 : index
    %149 = vector.load %arg1[%c5, %c0_52, %c0_53] : memref<9x16x7xf32, #tpu.memory_space<vmem>>, vector<1x16x7xf32>
    %150 = vector.shape_cast %149 : vector<1x16x7xf32> to vector<16x7xf32>
    %cst_54 = arith.constant dense<0.000000e+00> : vector<16x32xf32>
    %151 = tpu.matmul %150, %0, %cst_54 {dimension_numbers = #tpu.dot_dimension_numbers<[1], [0], [0], [1], [0, 0, 1, 1], [], []>} : vector<16x7xf32>, vector<7x32xf32>, vector<16x32xf32> -> vector<16x32xf32>
    %152 = vector.broadcast %1 : vector<1x32xf32> to vector<16x32xf32>
    %153 = arith.addf %151, %152 : vector<16x32xf32>
    %cst_55 = arith.constant dense<0.000000e+00> : vector<16xf32>
    %154 = vector.multi_reduction <add>, %153, %cst_55 [1] : vector<16x32xf32> to vector<16xf32>
    %155 = vector.shape_cast %154 : vector<16xf32> to vector<16x1xf32>
    %cst_56 = arith.constant 3.200000e+01 : f32
    %156 = vector.broadcast %cst_56 : f32 to vector<16x1xf32>
    %157 = arith.divf %155, %156 : vector<16x1xf32>
    %158 = vector.broadcast %157 : vector<16x1xf32> to vector<16x32xf32>
    %159 = arith.subf %153, %158 : vector<16x32xf32>
    %160 = arith.mulf %159, %159 : vector<16x32xf32>
    %cst_57 = arith.constant dense<0.000000e+00> : vector<16xf32>
    %161 = vector.multi_reduction <add>, %160, %cst_57 [1] : vector<16x32xf32> to vector<16xf32>
    %162 = vector.shape_cast %161 : vector<16xf32> to vector<16x1xf32>
    %cst_58 = arith.constant 3.200000e+01 : f32
    %163 = vector.broadcast %cst_58 : f32 to vector<16x1xf32>
    %164 = arith.divf %162, %163 : vector<16x1xf32>
    %165 = vector.broadcast %157 : vector<16x1xf32> to vector<16x32xf32>
    %166 = arith.subf %153, %165 : vector<16x32xf32>
    %cst_59 = arith.constant 9.99999974E-6 : f32
    %167 = vector.broadcast %cst_59 : f32 to vector<16x1xf32>
    %168 = arith.addf %164, %167 : vector<16x1xf32>
    %169 = math.rsqrt %168 : vector<16x1xf32>
    %170 = vector.broadcast %169 : vector<16x1xf32> to vector<16x32xf32>
    %171 = arith.mulf %166, %170 : vector<16x32xf32>
    %172 = vector.broadcast %2 : vector<1x32xf32> to vector<16x32xf32>
    %173 = arith.mulf %171, %172 : vector<16x32xf32>
    %174 = vector.broadcast %3 : vector<1x32xf32> to vector<16x32xf32>
    %175 = arith.addf %173, %174 : vector<16x32xf32>
    %cst_60 = arith.constant 0.000000e+00 : f32
    %176 = vector.broadcast %cst_60 : f32 to vector<16x32xf32>
    %177 = arith.maximumf %175, %176 : vector<16x32xf32>
    %c6 = arith.constant 6 : index
    %c0_61 = arith.constant 0 : index
    %c0_62 = arith.constant 0 : index
    %178 = vector.load %arg1[%c6, %c0_61, %c0_62] : memref<9x16x7xf32, #tpu.memory_space<vmem>>, vector<1x16x7xf32>
    %179 = vector.shape_cast %178 : vector<1x16x7xf32> to vector<16x7xf32>
    %cst_63 = arith.constant dense<0.000000e+00> : vector<16x32xf32>
    %180 = tpu.matmul %179, %0, %cst_63 {dimension_numbers = #tpu.dot_dimension_numbers<[1], [0], [0], [1], [0, 0, 1, 1], [], []>} : vector<16x7xf32>, vector<7x32xf32>, vector<16x32xf32> -> vector<16x32xf32>
    %181 = vector.broadcast %1 : vector<1x32xf32> to vector<16x32xf32>
    %182 = arith.addf %180, %181 : vector<16x32xf32>
    %cst_64 = arith.constant dense<0.000000e+00> : vector<16xf32>
    %183 = vector.multi_reduction <add>, %182, %cst_64 [1] : vector<16x32xf32> to vector<16xf32>
    %184 = vector.shape_cast %183 : vector<16xf32> to vector<16x1xf32>
    %cst_65 = arith.constant 3.200000e+01 : f32
    %185 = vector.broadcast %cst_65 : f32 to vector<16x1xf32>
    %186 = arith.divf %184, %185 : vector<16x1xf32>
    %187 = vector.broadcast %186 : vector<16x1xf32> to vector<16x32xf32>
    %188 = arith.subf %182, %187 : vector<16x32xf32>
    %189 = arith.mulf %188, %188 : vector<16x32xf32>
    %cst_66 = arith.constant dense<0.000000e+00> : vector<16xf32>
    %190 = vector.multi_reduction <add>, %189, %cst_66 [1] : vector<16x32xf32> to vector<16xf32>
    %191 = vector.shape_cast %190 : vector<16xf32> to vector<16x1xf32>
    %cst_67 = arith.constant 3.200000e+01 : f32
    %192 = vector.broadcast %cst_67 : f32 to vector<16x1xf32>
    %193 = arith.divf %191, %192 : vector<16x1xf32>
    %194 = vector.broadcast %186 : vector<16x1xf32> to vector<16x32xf32>
    %195 = arith.subf %182, %194 : vector<16x32xf32>
    %cst_68 = arith.constant 9.99999974E-6 : f32
    %196 = vector.broadcast %cst_68 : f32 to vector<16x1xf32>
    %197 = arith.addf %193, %196 : vector<16x1xf32>
    %198 = math.rsqrt %197 : vector<16x1xf32>
    %199 = vector.broadcast %198 : vector<16x1xf32> to vector<16x32xf32>
    %200 = arith.mulf %195, %199 : vector<16x32xf32>
    %201 = vector.broadcast %2 : vector<1x32xf32> to vector<16x32xf32>
    %202 = arith.mulf %200, %201 : vector<16x32xf32>
    %203 = vector.broadcast %3 : vector<1x32xf32> to vector<16x32xf32>
    %204 = arith.addf %202, %203 : vector<16x32xf32>
    %cst_69 = arith.constant 0.000000e+00 : f32
    %205 = vector.broadcast %cst_69 : f32 to vector<16x32xf32>
    %206 = arith.maximumf %204, %205 : vector<16x32xf32>
    %c7 = arith.constant 7 : index
    %c0_70 = arith.constant 0 : index
    %c0_71 = arith.constant 0 : index
    %207 = vector.load %arg1[%c7, %c0_70, %c0_71] : memref<9x16x7xf32, #tpu.memory_space<vmem>>, vector<1x16x7xf32>
    %208 = vector.shape_cast %207 : vector<1x16x7xf32> to vector<16x7xf32>
    %cst_72 = arith.constant dense<0.000000e+00> : vector<16x32xf32>
    %209 = tpu.matmul %208, %0, %cst_72 {dimension_numbers = #tpu.dot_dimension_numbers<[1], [0], [0], [1], [0, 0, 1, 1], [], []>} : vector<16x7xf32>, vector<7x32xf32>, vector<16x32xf32> -> vector<16x32xf32>
    %210 = vector.broadcast %1 : vector<1x32xf32> to vector<16x32xf32>
    %211 = arith.addf %209, %210 : vector<16x32xf32>
    %cst_73 = arith.constant dense<0.000000e+00> : vector<16xf32>
    %212 = vector.multi_reduction <add>, %211, %cst_73 [1] : vector<16x32xf32> to vector<16xf32>
    %213 = vector.shape_cast %212 : vector<16xf32> to vector<16x1xf32>
    %cst_74 = arith.constant 3.200000e+01 : f32
    %214 = vector.broadcast %cst_74 : f32 to vector<16x1xf32>
    %215 = arith.divf %213, %214 : vector<16x1xf32>
    %216 = vector.broadcast %215 : vector<16x1xf32> to vector<16x32xf32>
    %217 = arith.subf %211, %216 : vector<16x32xf32>
    %218 = arith.mulf %217, %217 : vector<16x32xf32>
    %cst_75 = arith.constant dense<0.000000e+00> : vector<16xf32>
    %219 = vector.multi_reduction <add>, %218, %cst_75 [1] : vector<16x32xf32> to vector<16xf32>
    %220 = vector.shape_cast %219 : vector<16xf32> to vector<16x1xf32>
    %cst_76 = arith.constant 3.200000e+01 : f32
    %221 = vector.broadcast %cst_76 : f32 to vector<16x1xf32>
    %222 = arith.divf %220, %221 : vector<16x1xf32>
    %223 = vector.broadcast %215 : vector<16x1xf32> to vector<16x32xf32>
    %224 = arith.subf %211, %223 : vector<16x32xf32>
    %cst_77 = arith.constant 9.99999974E-6 : f32
    %225 = vector.broadcast %cst_77 : f32 to vector<16x1xf32>
    %226 = arith.addf %222, %225 : vector<16x1xf32>
    %227 = math.rsqrt %226 : vector<16x1xf32>
    %228 = vector.broadcast %227 : vector<16x1xf32> to vector<16x32xf32>
    %229 = arith.mulf %224, %228 : vector<16x32xf32>
    %230 = vector.broadcast %2 : vector<1x32xf32> to vector<16x32xf32>
    %231 = arith.mulf %229, %230 : vector<16x32xf32>
    %232 = vector.broadcast %3 : vector<1x32xf32> to vector<16x32xf32>
    %233 = arith.addf %231, %232 : vector<16x32xf32>
    %cst_78 = arith.constant 0.000000e+00 : f32
    %234 = vector.broadcast %cst_78 : f32 to vector<16x32xf32>
    %235 = arith.maximumf %233, %234 : vector<16x32xf32>
    %c8 = arith.constant 8 : index
    %c0_79 = arith.constant 0 : index
    %c0_80 = arith.constant 0 : index
    %236 = vector.load %arg1[%c8, %c0_79, %c0_80] : memref<9x16x7xf32, #tpu.memory_space<vmem>>, vector<1x16x7xf32>
    %237 = vector.shape_cast %236 : vector<1x16x7xf32> to vector<16x7xf32>
    %cst_81 = arith.constant dense<0.000000e+00> : vector<16x32xf32>
    %238 = tpu.matmul %237, %0, %cst_81 {dimension_numbers = #tpu.dot_dimension_numbers<[1], [0], [0], [1], [0, 0, 1, 1], [], []>} : vector<16x7xf32>, vector<7x32xf32>, vector<16x32xf32> -> vector<16x32xf32>
    %239 = vector.broadcast %1 : vector<1x32xf32> to vector<16x32xf32>
    %240 = arith.addf %238, %239 : vector<16x32xf32>
    %cst_82 = arith.constant dense<0.000000e+00> : vector<16xf32>
    %241 = vector.multi_reduction <add>, %240, %cst_82 [1] : vector<16x32xf32> to vector<16xf32>
    %242 = vector.shape_cast %241 : vector<16xf32> to vector<16x1xf32>
    %cst_83 = arith.constant 3.200000e+01 : f32
    %243 = vector.broadcast %cst_83 : f32 to vector<16x1xf32>
    %244 = arith.divf %242, %243 : vector<16x1xf32>
    %245 = vector.broadcast %244 : vector<16x1xf32> to vector<16x32xf32>
    %246 = arith.subf %240, %245 : vector<16x32xf32>
    %247 = arith.mulf %246, %246 : vector<16x32xf32>
    %cst_84 = arith.constant dense<0.000000e+00> : vector<16xf32>
    %248 = vector.multi_reduction <add>, %247, %cst_84 [1] : vector<16x32xf32> to vector<16xf32>
    %249 = vector.shape_cast %248 : vector<16xf32> to vector<16x1xf32>
    %cst_85 = arith.constant 3.200000e+01 : f32
    %250 = vector.broadcast %cst_85 : f32 to vector<16x1xf32>
    %251 = arith.divf %249, %250 : vector<16x1xf32>
    %252 = vector.broadcast %244 : vector<16x1xf32> to vector<16x32xf32>
    %253 = arith.subf %240, %252 : vector<16x32xf32>
    %cst_86 = arith.constant 9.99999974E-6 : f32
    %254 = vector.broadcast %cst_86 : f32 to vector<16x1xf32>
    %255 = arith.addf %251, %254 : vector<16x1xf32>
    %256 = math.rsqrt %255 : vector<16x1xf32>
    %257 = vector.broadcast %256 : vector<16x1xf32> to vector<16x32xf32>
    %258 = arith.mulf %253, %257 : vector<16x32xf32>
    %259 = vector.broadcast %2 : vector<1x32xf32> to vector<16x32xf32>
    %260 = arith.mulf %258, %259 : vector<16x32xf32>
    %261 = vector.broadcast %3 : vector<1x32xf32> to vector<16x32xf32>
    %262 = arith.addf %260, %261 : vector<16x32xf32>
    %cst_87 = arith.constant 0.000000e+00 : f32
    %263 = vector.broadcast %cst_87 : f32 to vector<16x32xf32>
    %264 = arith.maximumf %262, %263 : vector<16x32xf32>
    %265 = arith.maximumf %32, %61 : vector<16x32xf32>
    %266 = arith.maximumf %265, %90 : vector<16x32xf32>
    %267 = arith.maximumf %266, %119 : vector<16x32xf32>
    %268 = arith.maximumf %267, %148 : vector<16x32xf32>
    %269 = arith.maximumf %268, %177 : vector<16x32xf32>
    %270 = arith.maximumf %269, %206 : vector<16x32xf32>
    %271 = arith.maximumf %270, %235 : vector<16x32xf32>
    %272 = arith.maximumf %271, %264 : vector<16x32xf32>
    %c0_88 = arith.constant 0 : index
    %c0_89 = arith.constant 0 : index
    %273 = vector.load %arg6[%c0_88, %c0_89] : memref<32x32xf32, #tpu.memory_space<vmem>>, vector<32x32xf32>
    %c0_90 = arith.constant 0 : index
    %c0_91 = arith.constant 0 : index
    %274 = vector.load %arg7[%c0_90, %c0_91] : memref<32x32xf32, #tpu.memory_space<vmem>>, vector<32x32xf32>
    %c0_92 = arith.constant 0 : index
    %c0_93 = arith.constant 0 : index
    %275 = vector.load %arg8[%c0_92, %c0_93] : memref<1x32xf32, #tpu.memory_space<vmem>>, vector<1x32xf32>
    %c0_94 = arith.constant 0 : index
    %c0_95 = arith.constant 0 : index
    %276 = vector.load %arg9[%c0_94, %c0_95] : memref<1x32xf32, #tpu.memory_space<vmem>>, vector<1x32xf32>
    %c0_96 = arith.constant 0 : index
    %c0_97 = arith.constant 0 : index
    %277 = vector.load %arg10[%c0_96, %c0_97] : memref<1x32xf32, #tpu.memory_space<vmem>>, vector<1x32xf32>
    %cst_98 = arith.constant dense<0.000000e+00> : vector<16x32xf32>
    %278 = tpu.matmul %272, %274, %cst_98 {dimension_numbers = #tpu.dot_dimension_numbers<[1], [0], [0], [1], [0, 0, 1, 1], [], []>} : vector<16x32xf32>, vector<32x32xf32>, vector<16x32xf32> -> vector<16x32xf32>
    %279 = vector.broadcast %275 : vector<1x32xf32> to vector<16x32xf32>
    %280 = arith.addf %278, %279 : vector<16x32xf32>
    %cst_99 = arith.constant dense<0.000000e+00> : vector<16x32xf32>
    %281 = tpu.matmul %32, %273, %cst_99 {dimension_numbers = #tpu.dot_dimension_numbers<[1], [0], [0], [1], [0, 0, 1, 1], [], []>} : vector<16x32xf32>, vector<32x32xf32>, vector<16x32xf32> -> vector<16x32xf32>
    %282 = arith.addf %281, %280 : vector<16x32xf32>
    %cst_100 = arith.constant dense<0.000000e+00> : vector<16xf32>
    %283 = vector.multi_reduction <add>, %282, %cst_100 [1] : vector<16x32xf32> to vector<16xf32>
    %284 = vector.shape_cast %283 : vector<16xf32> to vector<16x1xf32>
    %cst_101 = arith.constant 3.200000e+01 : f32
    %285 = vector.broadcast %cst_101 : f32 to vector<16x1xf32>
    %286 = arith.divf %284, %285 : vector<16x1xf32>
    %287 = vector.broadcast %286 : vector<16x1xf32> to vector<16x32xf32>
    %288 = arith.subf %282, %287 : vector<16x32xf32>
    %289 = arith.mulf %288, %288 : vector<16x32xf32>
    %cst_102 = arith.constant dense<0.000000e+00> : vector<16xf32>
    %290 = vector.multi_reduction <add>, %289, %cst_102 [1] : vector<16x32xf32> to vector<16xf32>
    %291 = vector.shape_cast %290 : vector<16xf32> to vector<16x1xf32>
    %cst_103 = arith.constant 3.200000e+01 : f32
    %292 = vector.broadcast %cst_103 : f32 to vector<16x1xf32>
    %293 = arith.divf %291, %292 : vector<16x1xf32>
    %294 = vector.broadcast %286 : vector<16x1xf32> to vector<16x32xf32>
    %295 = arith.subf %282, %294 : vector<16x32xf32>
    %cst_104 = arith.constant 9.99999974E-6 : f32
    %296 = vector.broadcast %cst_104 : f32 to vector<16x1xf32>
    %297 = arith.addf %293, %296 : vector<16x1xf32>
    %298 = math.rsqrt %297 : vector<16x1xf32>
    %299 = vector.broadcast %298 : vector<16x1xf32> to vector<16x32xf32>
    %300 = arith.mulf %295, %299 : vector<16x32xf32>
    %301 = vector.broadcast %276 : vector<1x32xf32> to vector<16x32xf32>
    %302 = arith.mulf %300, %301 : vector<16x32xf32>
    %303 = vector.broadcast %277 : vector<1x32xf32> to vector<16x32xf32>
    %304 = arith.addf %302, %303 : vector<16x32xf32>
    %cst_105 = arith.constant 0.000000e+00 : f32
    %305 = vector.broadcast %cst_105 : f32 to vector<16x32xf32>
    %306 = arith.maximumf %304, %305 : vector<16x32xf32>
    %cst_106 = arith.constant dense<0.000000e+00> : vector<16x32xf32>
    %307 = tpu.matmul %61, %273, %cst_106 {dimension_numbers = #tpu.dot_dimension_numbers<[1], [0], [0], [1], [0, 0, 1, 1], [], []>} : vector<16x32xf32>, vector<32x32xf32>, vector<16x32xf32> -> vector<16x32xf32>
    %308 = arith.addf %307, %280 : vector<16x32xf32>
    %cst_107 = arith.constant dense<0.000000e+00> : vector<16xf32>
    %309 = vector.multi_reduction <add>, %308, %cst_107 [1] : vector<16x32xf32> to vector<16xf32>
    %310 = vector.shape_cast %309 : vector<16xf32> to vector<16x1xf32>
    %cst_108 = arith.constant 3.200000e+01 : f32
    %311 = vector.broadcast %cst_108 : f32 to vector<16x1xf32>
    %312 = arith.divf %310, %311 : vector<16x1xf32>
    %313 = vector.broadcast %312 : vector<16x1xf32> to vector<16x32xf32>
    %314 = arith.subf %308, %313 : vector<16x32xf32>
    %315 = arith.mulf %314, %314 : vector<16x32xf32>
    %cst_109 = arith.constant dense<0.000000e+00> : vector<16xf32>
    %316 = vector.multi_reduction <add>, %315, %cst_109 [1] : vector<16x32xf32> to vector<16xf32>
    %317 = vector.shape_cast %316 : vector<16xf32> to vector<16x1xf32>
    %cst_110 = arith.constant 3.200000e+01 : f32
    %318 = vector.broadcast %cst_110 : f32 to vector<16x1xf32>
    %319 = arith.divf %317, %318 : vector<16x1xf32>
    %320 = vector.broadcast %312 : vector<16x1xf32> to vector<16x32xf32>
    %321 = arith.subf %308, %320 : vector<16x32xf32>
    %cst_111 = arith.constant 9.99999974E-6 : f32
    %322 = vector.broadcast %cst_111 : f32 to vector<16x1xf32>
    %323 = arith.addf %319, %322 : vector<16x1xf32>
    %324 = math.rsqrt %323 : vector<16x1xf32>
    %325 = vector.broadcast %324 : vector<16x1xf32> to vector<16x32xf32>
    %326 = arith.mulf %321, %325 : vector<16x32xf32>
    %327 = vector.broadcast %276 : vector<1x32xf32> to vector<16x32xf32>
    %328 = arith.mulf %326, %327 : vector<16x32xf32>
    %329 = vector.broadcast %277 : vector<1x32xf32> to vector<16x32xf32>
    %330 = arith.addf %328, %329 : vector<16x32xf32>
    %cst_112 = arith.constant 0.000000e+00 : f32
    %331 = vector.broadcast %cst_112 : f32 to vector<16x32xf32>
    %332 = arith.maximumf %330, %331 : vector<16x32xf32>
    %cst_113 = arith.constant dense<0.000000e+00> : vector<16x32xf32>
    %333 = tpu.matmul %90, %273, %cst_113 {dimension_numbers = #tpu.dot_dimension_numbers<[1], [0], [0], [1], [0, 0, 1, 1], [], []>} : vector<16x32xf32>, vector<32x32xf32>, vector<16x32xf32> -> vector<16x32xf32>
    %334 = arith.addf %333, %280 : vector<16x32xf32>
    %cst_114 = arith.constant dense<0.000000e+00> : vector<16xf32>
    %335 = vector.multi_reduction <add>, %334, %cst_114 [1] : vector<16x32xf32> to vector<16xf32>
    %336 = vector.shape_cast %335 : vector<16xf32> to vector<16x1xf32>
    %cst_115 = arith.constant 3.200000e+01 : f32
    %337 = vector.broadcast %cst_115 : f32 to vector<16x1xf32>
    %338 = arith.divf %336, %337 : vector<16x1xf32>
    %339 = vector.broadcast %338 : vector<16x1xf32> to vector<16x32xf32>
    %340 = arith.subf %334, %339 : vector<16x32xf32>
    %341 = arith.mulf %340, %340 : vector<16x32xf32>
    %cst_116 = arith.constant dense<0.000000e+00> : vector<16xf32>
    %342 = vector.multi_reduction <add>, %341, %cst_116 [1] : vector<16x32xf32> to vector<16xf32>
    %343 = vector.shape_cast %342 : vector<16xf32> to vector<16x1xf32>
    %cst_117 = arith.constant 3.200000e+01 : f32
    %344 = vector.broadcast %cst_117 : f32 to vector<16x1xf32>
    %345 = arith.divf %343, %344 : vector<16x1xf32>
    %346 = vector.broadcast %338 : vector<16x1xf32> to vector<16x32xf32>
    %347 = arith.subf %334, %346 : vector<16x32xf32>
    %cst_118 = arith.constant 9.99999974E-6 : f32
    %348 = vector.broadcast %cst_118 : f32 to vector<16x1xf32>
    %349 = arith.addf %345, %348 : vector<16x1xf32>
    %350 = math.rsqrt %349 : vector<16x1xf32>
    %351 = vector.broadcast %350 : vector<16x1xf32> to vector<16x32xf32>
    %352 = arith.mulf %347, %351 : vector<16x32xf32>
    %353 = vector.broadcast %276 : vector<1x32xf32> to vector<16x32xf32>
    %354 = arith.mulf %352, %353 : vector<16x32xf32>
    %355 = vector.broadcast %277 : vector<1x32xf32> to vector<16x32xf32>
    %356 = arith.addf %354, %355 : vector<16x32xf32>
    %cst_119 = arith.constant 0.000000e+00 : f32
    %357 = vector.broadcast %cst_119 : f32 to vector<16x32xf32>
    %358 = arith.maximumf %356, %357 : vector<16x32xf32>
    %cst_120 = arith.constant dense<0.000000e+00> : vector<16x32xf32>
    %359 = tpu.matmul %119, %273, %cst_120 {dimension_numbers = #tpu.dot_dimension_numbers<[1], [0], [0], [1], [0, 0, 1, 1], [], []>} : vector<16x32xf32>, vector<32x32xf32>, vector<16x32xf32> -> vector<16x32xf32>
    %360 = arith.addf %359, %280 : vector<16x32xf32>
    %cst_121 = arith.constant dense<0.000000e+00> : vector<16xf32>
    %361 = vector.multi_reduction <add>, %360, %cst_121 [1] : vector<16x32xf32> to vector<16xf32>
    %362 = vector.shape_cast %361 : vector<16xf32> to vector<16x1xf32>
    %cst_122 = arith.constant 3.200000e+01 : f32
    %363 = vector.broadcast %cst_122 : f32 to vector<16x1xf32>
    %364 = arith.divf %362, %363 : vector<16x1xf32>
    %365 = vector.broadcast %364 : vector<16x1xf32> to vector<16x32xf32>
    %366 = arith.subf %360, %365 : vector<16x32xf32>
    %367 = arith.mulf %366, %366 : vector<16x32xf32>
    %cst_123 = arith.constant dense<0.000000e+00> : vector<16xf32>
    %368 = vector.multi_reduction <add>, %367, %cst_123 [1] : vector<16x32xf32> to vector<16xf32>
    %369 = vector.shape_cast %368 : vector<16xf32> to vector<16x1xf32>
    %cst_124 = arith.constant 3.200000e+01 : f32
    %370 = vector.broadcast %cst_124 : f32 to vector<16x1xf32>
    %371 = arith.divf %369, %370 : vector<16x1xf32>
    %372 = vector.broadcast %364 : vector<16x1xf32> to vector<16x32xf32>
    %373 = arith.subf %360, %372 : vector<16x32xf32>
    %cst_125 = arith.constant 9.99999974E-6 : f32
    %374 = vector.broadcast %cst_125 : f32 to vector<16x1xf32>
    %375 = arith.addf %371, %374 : vector<16x1xf32>
    %376 = math.rsqrt %375 : vector<16x1xf32>
    %377 = vector.broadcast %376 : vector<16x1xf32> to vector<16x32xf32>
    %378 = arith.mulf %373, %377 : vector<16x32xf32>
    %379 = vector.broadcast %276 : vector<1x32xf32> to vector<16x32xf32>
    %380 = arith.mulf %378, %379 : vector<16x32xf32>
    %381 = vector.broadcast %277 : vector<1x32xf32> to vector<16x32xf32>
    %382 = arith.addf %380, %381 : vector<16x32xf32>
    %cst_126 = arith.constant 0.000000e+00 : f32
    %383 = vector.broadcast %cst_126 : f32 to vector<16x32xf32>
    %384 = arith.maximumf %382, %383 : vector<16x32xf32>
    %cst_127 = arith.constant dense<0.000000e+00> : vector<16x32xf32>
    %385 = tpu.matmul %148, %273, %cst_127 {dimension_numbers = #tpu.dot_dimension_numbers<[1], [0], [0], [1], [0, 0, 1, 1], [], []>} : vector<16x32xf32>, vector<32x32xf32>, vector<16x32xf32> -> vector<16x32xf32>
    %386 = arith.addf %385, %280 : vector<16x32xf32>
    %cst_128 = arith.constant dense<0.000000e+00> : vector<16xf32>
    %387 = vector.multi_reduction <add>, %386, %cst_128 [1] : vector<16x32xf32> to vector<16xf32>
    %388 = vector.shape_cast %387 : vector<16xf32> to vector<16x1xf32>
    %cst_129 = arith.constant 3.200000e+01 : f32
    %389 = vector.broadcast %cst_129 : f32 to vector<16x1xf32>
    %390 = arith.divf %388, %389 : vector<16x1xf32>
    %391 = vector.broadcast %390 : vector<16x1xf32> to vector<16x32xf32>
    %392 = arith.subf %386, %391 : vector<16x32xf32>
    %393 = arith.mulf %392, %392 : vector<16x32xf32>
    %cst_130 = arith.constant dense<0.000000e+00> : vector<16xf32>
    %394 = vector.multi_reduction <add>, %393, %cst_130 [1] : vector<16x32xf32> to vector<16xf32>
    %395 = vector.shape_cast %394 : vector<16xf32> to vector<16x1xf32>
    %cst_131 = arith.constant 3.200000e+01 : f32
    %396 = vector.broadcast %cst_131 : f32 to vector<16x1xf32>
    %397 = arith.divf %395, %396 : vector<16x1xf32>
    %398 = vector.broadcast %390 : vector<16x1xf32> to vector<16x32xf32>
    %399 = arith.subf %386, %398 : vector<16x32xf32>
    %cst_132 = arith.constant 9.99999974E-6 : f32
    %400 = vector.broadcast %cst_132 : f32 to vector<16x1xf32>
    %401 = arith.addf %397, %400 : vector<16x1xf32>
    %402 = math.rsqrt %401 : vector<16x1xf32>
    %403 = vector.broadcast %402 : vector<16x1xf32> to vector<16x32xf32>
    %404 = arith.mulf %399, %403 : vector<16x32xf32>
    %405 = vector.broadcast %276 : vector<1x32xf32> to vector<16x32xf32>
    %406 = arith.mulf %404, %405 : vector<16x32xf32>
    %407 = vector.broadcast %277 : vector<1x32xf32> to vector<16x32xf32>
    %408 = arith.addf %406, %407 : vector<16x32xf32>
    %cst_133 = arith.constant 0.000000e+00 : f32
    %409 = vector.broadcast %cst_133 : f32 to vector<16x32xf32>
    %410 = arith.maximumf %408, %409 : vector<16x32xf32>
    %cst_134 = arith.constant dense<0.000000e+00> : vector<16x32xf32>
    %411 = tpu.matmul %177, %273, %cst_134 {dimension_numbers = #tpu.dot_dimension_numbers<[1], [0], [0], [1], [0, 0, 1, 1], [], []>} : vector<16x32xf32>, vector<32x32xf32>, vector<16x32xf32> -> vector<16x32xf32>
    %412 = arith.addf %411, %280 : vector<16x32xf32>
    %cst_135 = arith.constant dense<0.000000e+00> : vector<16xf32>
    %413 = vector.multi_reduction <add>, %412, %cst_135 [1] : vector<16x32xf32> to vector<16xf32>
    %414 = vector.shape_cast %413 : vector<16xf32> to vector<16x1xf32>
    %cst_136 = arith.constant 3.200000e+01 : f32
    %415 = vector.broadcast %cst_136 : f32 to vector<16x1xf32>
    %416 = arith.divf %414, %415 : vector<16x1xf32>
    %417 = vector.broadcast %416 : vector<16x1xf32> to vector<16x32xf32>
    %418 = arith.subf %412, %417 : vector<16x32xf32>
    %419 = arith.mulf %418, %418 : vector<16x32xf32>
    %cst_137 = arith.constant dense<0.000000e+00> : vector<16xf32>
    %420 = vector.multi_reduction <add>, %419, %cst_137 [1] : vector<16x32xf32> to vector<16xf32>
    %421 = vector.shape_cast %420 : vector<16xf32> to vector<16x1xf32>
    %cst_138 = arith.constant 3.200000e+01 : f32
    %422 = vector.broadcast %cst_138 : f32 to vector<16x1xf32>
    %423 = arith.divf %421, %422 : vector<16x1xf32>
    %424 = vector.broadcast %416 : vector<16x1xf32> to vector<16x32xf32>
    %425 = arith.subf %412, %424 : vector<16x32xf32>
    %cst_139 = arith.constant 9.99999974E-6 : f32
    %426 = vector.broadcast %cst_139 : f32 to vector<16x1xf32>
    %427 = arith.addf %423, %426 : vector<16x1xf32>
    %428 = math.rsqrt %427 : vector<16x1xf32>
    %429 = vector.broadcast %428 : vector<16x1xf32> to vector<16x32xf32>
    %430 = arith.mulf %425, %429 : vector<16x32xf32>
    %431 = vector.broadcast %276 : vector<1x32xf32> to vector<16x32xf32>
    %432 = arith.mulf %430, %431 : vector<16x32xf32>
    %433 = vector.broadcast %277 : vector<1x32xf32> to vector<16x32xf32>
    %434 = arith.addf %432, %433 : vector<16x32xf32>
    %cst_140 = arith.constant 0.000000e+00 : f32
    %435 = vector.broadcast %cst_140 : f32 to vector<16x32xf32>
    %436 = arith.maximumf %434, %435 : vector<16x32xf32>
    %cst_141 = arith.constant dense<0.000000e+00> : vector<16x32xf32>
    %437 = tpu.matmul %206, %273, %cst_141 {dimension_numbers = #tpu.dot_dimension_numbers<[1], [0], [0], [1], [0, 0, 1, 1], [], []>} : vector<16x32xf32>, vector<32x32xf32>, vector<16x32xf32> -> vector<16x32xf32>
    %438 = arith.addf %437, %280 : vector<16x32xf32>
    %cst_142 = arith.constant dense<0.000000e+00> : vector<16xf32>
    %439 = vector.multi_reduction <add>, %438, %cst_142 [1] : vector<16x32xf32> to vector<16xf32>
    %440 = vector.shape_cast %439 : vector<16xf32> to vector<16x1xf32>
    %cst_143 = arith.constant 3.200000e+01 : f32
    %441 = vector.broadcast %cst_143 : f32 to vector<16x1xf32>
    %442 = arith.divf %440, %441 : vector<16x1xf32>
    %443 = vector.broadcast %442 : vector<16x1xf32> to vector<16x32xf32>
    %444 = arith.subf %438, %443 : vector<16x32xf32>
    %445 = arith.mulf %444, %444 : vector<16x32xf32>
    %cst_144 = arith.constant dense<0.000000e+00> : vector<16xf32>
    %446 = vector.multi_reduction <add>, %445, %cst_144 [1] : vector<16x32xf32> to vector<16xf32>
    %447 = vector.shape_cast %446 : vector<16xf32> to vector<16x1xf32>
    %cst_145 = arith.constant 3.200000e+01 : f32
    %448 = vector.broadcast %cst_145 : f32 to vector<16x1xf32>
    %449 = arith.divf %447, %448 : vector<16x1xf32>
    %450 = vector.broadcast %442 : vector<16x1xf32> to vector<16x32xf32>
    %451 = arith.subf %438, %450 : vector<16x32xf32>
    %cst_146 = arith.constant 9.99999974E-6 : f32
    %452 = vector.broadcast %cst_146 : f32 to vector<16x1xf32>
    %453 = arith.addf %449, %452 : vector<16x1xf32>
    %454 = math.rsqrt %453 : vector<16x1xf32>
    %455 = vector.broadcast %454 : vector<16x1xf32> to vector<16x32xf32>
    %456 = arith.mulf %451, %455 : vector<16x32xf32>
    %457 = vector.broadcast %276 : vector<1x32xf32> to vector<16x32xf32>
    %458 = arith.mulf %456, %457 : vector<16x32xf32>
    %459 = vector.broadcast %277 : vector<1x32xf32> to vector<16x32xf32>
    %460 = arith.addf %458, %459 : vector<16x32xf32>
    %cst_147 = arith.constant 0.000000e+00 : f32
    %461 = vector.broadcast %cst_147 : f32 to vector<16x32xf32>
    %462 = arith.maximumf %460, %461 : vector<16x32xf32>
    %cst_148 = arith.constant dense<0.000000e+00> : vector<16x32xf32>
    %463 = tpu.matmul %235, %273, %cst_148 {dimension_numbers = #tpu.dot_dimension_numbers<[1], [0], [0], [1], [0, 0, 1, 1], [], []>} : vector<16x32xf32>, vector<32x32xf32>, vector<16x32xf32> -> vector<16x32xf32>
    %464 = arith.addf %463, %280 : vector<16x32xf32>
    %cst_149 = arith.constant dense<0.000000e+00> : vector<16xf32>
    %465 = vector.multi_reduction <add>, %464, %cst_149 [1] : vector<16x32xf32> to vector<16xf32>
    %466 = vector.shape_cast %465 : vector<16xf32> to vector<16x1xf32>
    %cst_150 = arith.constant 3.200000e+01 : f32
    %467 = vector.broadcast %cst_150 : f32 to vector<16x1xf32>
    %468 = arith.divf %466, %467 : vector<16x1xf32>
    %469 = vector.broadcast %468 : vector<16x1xf32> to vector<16x32xf32>
    %470 = arith.subf %464, %469 : vector<16x32xf32>
    %471 = arith.mulf %470, %470 : vector<16x32xf32>
    %cst_151 = arith.constant dense<0.000000e+00> : vector<16xf32>
    %472 = vector.multi_reduction <add>, %471, %cst_151 [1] : vector<16x32xf32> to vector<16xf32>
    %473 = vector.shape_cast %472 : vector<16xf32> to vector<16x1xf32>
    %cst_152 = arith.constant 3.200000e+01 : f32
    %474 = vector.broadcast %cst_152 : f32 to vector<16x1xf32>
    %475 = arith.divf %473, %474 : vector<16x1xf32>
    %476 = vector.broadcast %468 : vector<16x1xf32> to vector<16x32xf32>
    %477 = arith.subf %464, %476 : vector<16x32xf32>
    %cst_153 = arith.constant 9.99999974E-6 : f32
    %478 = vector.broadcast %cst_153 : f32 to vector<16x1xf32>
    %479 = arith.addf %475, %478 : vector<16x1xf32>
    %480 = math.rsqrt %479 : vector<16x1xf32>
    %481 = vector.broadcast %480 : vector<16x1xf32> to vector<16x32xf32>
    %482 = arith.mulf %477, %481 : vector<16x32xf32>
    %483 = vector.broadcast %276 : vector<1x32xf32> to vector<16x32xf32>
    %484 = arith.mulf %482, %483 : vector<16x32xf32>
    %485 = vector.broadcast %277 : vector<1x32xf32> to vector<16x32xf32>
    %486 = arith.addf %484, %485 : vector<16x32xf32>
    %cst_154 = arith.constant 0.000000e+00 : f32
    %487 = vector.broadcast %cst_154 : f32 to vector<16x32xf32>
    %488 = arith.maximumf %486, %487 : vector<16x32xf32>
    %cst_155 = arith.constant dense<0.000000e+00> : vector<16x32xf32>
    %489 = tpu.matmul %264, %273, %cst_155 {dimension_numbers = #tpu.dot_dimension_numbers<[1], [0], [0], [1], [0, 0, 1, 1], [], []>} : vector<16x32xf32>, vector<32x32xf32>, vector<16x32xf32> -> vector<16x32xf32>
    %490 = arith.addf %489, %280 : vector<16x32xf32>
    %cst_156 = arith.constant dense<0.000000e+00> : vector<16xf32>
    %491 = vector.multi_reduction <add>, %490, %cst_156 [1] : vector<16x32xf32> to vector<16xf32>
    %492 = vector.shape_cast %491 : vector<16xf32> to vector<16x1xf32>
    %cst_157 = arith.constant 3.200000e+01 : f32
    %493 = vector.broadcast %cst_157 : f32 to vector<16x1xf32>
    %494 = arith.divf %492, %493 : vector<16x1xf32>
    %495 = vector.broadcast %494 : vector<16x1xf32> to vector<16x32xf32>
    %496 = arith.subf %490, %495 : vector<16x32xf32>
    %497 = arith.mulf %496, %496 : vector<16x32xf32>
    %cst_158 = arith.constant dense<0.000000e+00> : vector<16xf32>
    %498 = vector.multi_reduction <add>, %497, %cst_158 [1] : vector<16x32xf32> to vector<16xf32>
    %499 = vector.shape_cast %498 : vector<16xf32> to vector<16x1xf32>
    %cst_159 = arith.constant 3.200000e+01 : f32
    %500 = vector.broadcast %cst_159 : f32 to vector<16x1xf32>
    %501 = arith.divf %499, %500 : vector<16x1xf32>
    %502 = vector.broadcast %494 : vector<16x1xf32> to vector<16x32xf32>
    %503 = arith.subf %490, %502 : vector<16x32xf32>
    %cst_160 = arith.constant 9.99999974E-6 : f32
    %504 = vector.broadcast %cst_160 : f32 to vector<16x1xf32>
    %505 = arith.addf %501, %504 : vector<16x1xf32>
    %506 = math.rsqrt %505 : vector<16x1xf32>
    %507 = vector.broadcast %506 : vector<16x1xf32> to vector<16x32xf32>
    %508 = arith.mulf %503, %507 : vector<16x32xf32>
    %509 = vector.broadcast %276 : vector<1x32xf32> to vector<16x32xf32>
    %510 = arith.mulf %508, %509 : vector<16x32xf32>
    %511 = vector.broadcast %277 : vector<1x32xf32> to vector<16x32xf32>
    %512 = arith.addf %510, %511 : vector<16x32xf32>
    %cst_161 = arith.constant 0.000000e+00 : f32
    %513 = vector.broadcast %cst_161 : f32 to vector<16x32xf32>
    %514 = arith.maximumf %512, %513 : vector<16x32xf32>
    %515 = arith.maximumf %306, %332 : vector<16x32xf32>
    %516 = arith.maximumf %515, %358 : vector<16x32xf32>
    %517 = arith.maximumf %516, %384 : vector<16x32xf32>
    %518 = arith.maximumf %517, %410 : vector<16x32xf32>
    %519 = arith.maximumf %518, %436 : vector<16x32xf32>
    %520 = arith.maximumf %519, %462 : vector<16x32xf32>
    %521 = arith.maximumf %520, %488 : vector<16x32xf32>
    %522 = arith.maximumf %521, %514 : vector<16x32xf32>
    %c0_162 = arith.constant 0 : index
    %c0_163 = arith.constant 0 : index
    %523 = vector.load %arg11[%c0_162, %c0_163] : memref<32x32xf32, #tpu.memory_space<vmem>>, vector<32x32xf32>
    %c0_164 = arith.constant 0 : index
    %c0_165 = arith.constant 0 : index
    %524 = vector.load %arg12[%c0_164, %c0_165] : memref<32x32xf32, #tpu.memory_space<vmem>>, vector<32x32xf32>
    %c0_166 = arith.constant 0 : index
    %c0_167 = arith.constant 0 : index
    %525 = vector.load %arg13[%c0_166, %c0_167] : memref<1x32xf32, #tpu.memory_space<vmem>>, vector<1x32xf32>
    %c0_168 = arith.constant 0 : index
    %c0_169 = arith.constant 0 : index
    %526 = vector.load %arg14[%c0_168, %c0_169] : memref<1x32xf32, #tpu.memory_space<vmem>>, vector<1x32xf32>
    %c0_170 = arith.constant 0 : index
    %c0_171 = arith.constant 0 : index
    %527 = vector.load %arg15[%c0_170, %c0_171] : memref<1x32xf32, #tpu.memory_space<vmem>>, vector<1x32xf32>
    %cst_172 = arith.constant dense<0.000000e+00> : vector<16x32xf32>
    %528 = tpu.matmul %522, %524, %cst_172 {dimension_numbers = #tpu.dot_dimension_numbers<[1], [0], [0], [1], [0, 0, 1, 1], [], []>} : vector<16x32xf32>, vector<32x32xf32>, vector<16x32xf32> -> vector<16x32xf32>
    %529 = vector.broadcast %525 : vector<1x32xf32> to vector<16x32xf32>
    %530 = arith.addf %528, %529 : vector<16x32xf32>
    %cst_173 = arith.constant dense<0.000000e+00> : vector<16x32xf32>
    %531 = tpu.matmul %306, %523, %cst_173 {dimension_numbers = #tpu.dot_dimension_numbers<[1], [0], [0], [1], [0, 0, 1, 1], [], []>} : vector<16x32xf32>, vector<32x32xf32>, vector<16x32xf32> -> vector<16x32xf32>
    %532 = arith.addf %531, %530 : vector<16x32xf32>
    %cst_174 = arith.constant dense<0.000000e+00> : vector<16xf32>
    %533 = vector.multi_reduction <add>, %532, %cst_174 [1] : vector<16x32xf32> to vector<16xf32>
    %534 = vector.shape_cast %533 : vector<16xf32> to vector<16x1xf32>
    %cst_175 = arith.constant 3.200000e+01 : f32
    %535 = vector.broadcast %cst_175 : f32 to vector<16x1xf32>
    %536 = arith.divf %534, %535 : vector<16x1xf32>
    %537 = vector.broadcast %536 : vector<16x1xf32> to vector<16x32xf32>
    %538 = arith.subf %532, %537 : vector<16x32xf32>
    %539 = arith.mulf %538, %538 : vector<16x32xf32>
    %cst_176 = arith.constant dense<0.000000e+00> : vector<16xf32>
    %540 = vector.multi_reduction <add>, %539, %cst_176 [1] : vector<16x32xf32> to vector<16xf32>
    %541 = vector.shape_cast %540 : vector<16xf32> to vector<16x1xf32>
    %cst_177 = arith.constant 3.200000e+01 : f32
    %542 = vector.broadcast %cst_177 : f32 to vector<16x1xf32>
    %543 = arith.divf %541, %542 : vector<16x1xf32>
    %544 = vector.broadcast %536 : vector<16x1xf32> to vector<16x32xf32>
    %545 = arith.subf %532, %544 : vector<16x32xf32>
    %cst_178 = arith.constant 9.99999974E-6 : f32
    %546 = vector.broadcast %cst_178 : f32 to vector<16x1xf32>
    %547 = arith.addf %543, %546 : vector<16x1xf32>
    %548 = math.rsqrt %547 : vector<16x1xf32>
    %549 = vector.broadcast %548 : vector<16x1xf32> to vector<16x32xf32>
    %550 = arith.mulf %545, %549 : vector<16x32xf32>
    %551 = vector.broadcast %526 : vector<1x32xf32> to vector<16x32xf32>
    %552 = arith.mulf %550, %551 : vector<16x32xf32>
    %553 = vector.broadcast %527 : vector<1x32xf32> to vector<16x32xf32>
    %554 = arith.addf %552, %553 : vector<16x32xf32>
    %cst_179 = arith.constant 0.000000e+00 : f32
    %555 = vector.broadcast %cst_179 : f32 to vector<16x32xf32>
    %556 = arith.maximumf %554, %555 : vector<16x32xf32>
    %cst_180 = arith.constant dense<0.000000e+00> : vector<16x32xf32>
    %557 = tpu.matmul %332, %523, %cst_180 {dimension_numbers = #tpu.dot_dimension_numbers<[1], [0], [0], [1], [0, 0, 1, 1], [], []>} : vector<16x32xf32>, vector<32x32xf32>, vector<16x32xf32> -> vector<16x32xf32>
    %558 = arith.addf %557, %530 : vector<16x32xf32>
    %cst_181 = arith.constant dense<0.000000e+00> : vector<16xf32>
    %559 = vector.multi_reduction <add>, %558, %cst_181 [1] : vector<16x32xf32> to vector<16xf32>
    %560 = vector.shape_cast %559 : vector<16xf32> to vector<16x1xf32>
    %cst_182 = arith.constant 3.200000e+01 : f32
    %561 = vector.broadcast %cst_182 : f32 to vector<16x1xf32>
    %562 = arith.divf %560, %561 : vector<16x1xf32>
    %563 = vector.broadcast %562 : vector<16x1xf32> to vector<16x32xf32>
    %564 = arith.subf %558, %563 : vector<16x32xf32>
    %565 = arith.mulf %564, %564 : vector<16x32xf32>
    %cst_183 = arith.constant dense<0.000000e+00> : vector<16xf32>
    %566 = vector.multi_reduction <add>, %565, %cst_183 [1] : vector<16x32xf32> to vector<16xf32>
    %567 = vector.shape_cast %566 : vector<16xf32> to vector<16x1xf32>
    %cst_184 = arith.constant 3.200000e+01 : f32
    %568 = vector.broadcast %cst_184 : f32 to vector<16x1xf32>
    %569 = arith.divf %567, %568 : vector<16x1xf32>
    %570 = vector.broadcast %562 : vector<16x1xf32> to vector<16x32xf32>
    %571 = arith.subf %558, %570 : vector<16x32xf32>
    %cst_185 = arith.constant 9.99999974E-6 : f32
    %572 = vector.broadcast %cst_185 : f32 to vector<16x1xf32>
    %573 = arith.addf %569, %572 : vector<16x1xf32>
    %574 = math.rsqrt %573 : vector<16x1xf32>
    %575 = vector.broadcast %574 : vector<16x1xf32> to vector<16x32xf32>
    %576 = arith.mulf %571, %575 : vector<16x32xf32>
    %577 = vector.broadcast %526 : vector<1x32xf32> to vector<16x32xf32>
    %578 = arith.mulf %576, %577 : vector<16x32xf32>
    %579 = vector.broadcast %527 : vector<1x32xf32> to vector<16x32xf32>
    %580 = arith.addf %578, %579 : vector<16x32xf32>
    %cst_186 = arith.constant 0.000000e+00 : f32
    %581 = vector.broadcast %cst_186 : f32 to vector<16x32xf32>
    %582 = arith.maximumf %580, %581 : vector<16x32xf32>
    %cst_187 = arith.constant dense<0.000000e+00> : vector<16x32xf32>
    %583 = tpu.matmul %358, %523, %cst_187 {dimension_numbers = #tpu.dot_dimension_numbers<[1], [0], [0], [1], [0, 0, 1, 1], [], []>} : vector<16x32xf32>, vector<32x32xf32>, vector<16x32xf32> -> vector<16x32xf32>
    %584 = arith.addf %583, %530 : vector<16x32xf32>
    %cst_188 = arith.constant dense<0.000000e+00> : vector<16xf32>
    %585 = vector.multi_reduction <add>, %584, %cst_188 [1] : vector<16x32xf32> to vector<16xf32>
    %586 = vector.shape_cast %585 : vector<16xf32> to vector<16x1xf32>
    %cst_189 = arith.constant 3.200000e+01 : f32
    %587 = vector.broadcast %cst_189 : f32 to vector<16x1xf32>
    %588 = arith.divf %586, %587 : vector<16x1xf32>
    %589 = vector.broadcast %588 : vector<16x1xf32> to vector<16x32xf32>
    %590 = arith.subf %584, %589 : vector<16x32xf32>
    %591 = arith.mulf %590, %590 : vector<16x32xf32>
    %cst_190 = arith.constant dense<0.000000e+00> : vector<16xf32>
    %592 = vector.multi_reduction <add>, %591, %cst_190 [1] : vector<16x32xf32> to vector<16xf32>
    %593 = vector.shape_cast %592 : vector<16xf32> to vector<16x1xf32>
    %cst_191 = arith.constant 3.200000e+01 : f32
    %594 = vector.broadcast %cst_191 : f32 to vector<16x1xf32>
    %595 = arith.divf %593, %594 : vector<16x1xf32>
    %596 = vector.broadcast %588 : vector<16x1xf32> to vector<16x32xf32>
    %597 = arith.subf %584, %596 : vector<16x32xf32>
    %cst_192 = arith.constant 9.99999974E-6 : f32
    %598 = vector.broadcast %cst_192 : f32 to vector<16x1xf32>
    %599 = arith.addf %595, %598 : vector<16x1xf32>
    %600 = math.rsqrt %599 : vector<16x1xf32>
    %601 = vector.broadcast %600 : vector<16x1xf32> to vector<16x32xf32>
    %602 = arith.mulf %597, %601 : vector<16x32xf32>
    %603 = vector.broadcast %526 : vector<1x32xf32> to vector<16x32xf32>
    %604 = arith.mulf %602, %603 : vector<16x32xf32>
    %605 = vector.broadcast %527 : vector<1x32xf32> to vector<16x32xf32>
    %606 = arith.addf %604, %605 : vector<16x32xf32>
    %cst_193 = arith.constant 0.000000e+00 : f32
    %607 = vector.broadcast %cst_193 : f32 to vector<16x32xf32>
    %608 = arith.maximumf %606, %607 : vector<16x32xf32>
    %cst_194 = arith.constant dense<0.000000e+00> : vector<16x32xf32>
    %609 = tpu.matmul %384, %523, %cst_194 {dimension_numbers = #tpu.dot_dimension_numbers<[1], [0], [0], [1], [0, 0, 1, 1], [], []>} : vector<16x32xf32>, vector<32x32xf32>, vector<16x32xf32> -> vector<16x32xf32>
    %610 = arith.addf %609, %530 : vector<16x32xf32>
    %cst_195 = arith.constant dense<0.000000e+00> : vector<16xf32>
    %611 = vector.multi_reduction <add>, %610, %cst_195 [1] : vector<16x32xf32> to vector<16xf32>
    %612 = vector.shape_cast %611 : vector<16xf32> to vector<16x1xf32>
    %cst_196 = arith.constant 3.200000e+01 : f32
    %613 = vector.broadcast %cst_196 : f32 to vector<16x1xf32>
    %614 = arith.divf %612, %613 : vector<16x1xf32>
    %615 = vector.broadcast %614 : vector<16x1xf32> to vector<16x32xf32>
    %616 = arith.subf %610, %615 : vector<16x32xf32>
    %617 = arith.mulf %616, %616 : vector<16x32xf32>
    %cst_197 = arith.constant dense<0.000000e+00> : vector<16xf32>
    %618 = vector.multi_reduction <add>, %617, %cst_197 [1] : vector<16x32xf32> to vector<16xf32>
    %619 = vector.shape_cast %618 : vector<16xf32> to vector<16x1xf32>
    %cst_198 = arith.constant 3.200000e+01 : f32
    %620 = vector.broadcast %cst_198 : f32 to vector<16x1xf32>
    %621 = arith.divf %619, %620 : vector<16x1xf32>
    %622 = vector.broadcast %614 : vector<16x1xf32> to vector<16x32xf32>
    %623 = arith.subf %610, %622 : vector<16x32xf32>
    %cst_199 = arith.constant 9.99999974E-6 : f32
    %624 = vector.broadcast %cst_199 : f32 to vector<16x1xf32>
    %625 = arith.addf %621, %624 : vector<16x1xf32>
    %626 = math.rsqrt %625 : vector<16x1xf32>
    %627 = vector.broadcast %626 : vector<16x1xf32> to vector<16x32xf32>
    %628 = arith.mulf %623, %627 : vector<16x32xf32>
    %629 = vector.broadcast %526 : vector<1x32xf32> to vector<16x32xf32>
    %630 = arith.mulf %628, %629 : vector<16x32xf32>
    %631 = vector.broadcast %527 : vector<1x32xf32> to vector<16x32xf32>
    %632 = arith.addf %630, %631 : vector<16x32xf32>
    %cst_200 = arith.constant 0.000000e+00 : f32
    %633 = vector.broadcast %cst_200 : f32 to vector<16x32xf32>
    %634 = arith.maximumf %632, %633 : vector<16x32xf32>
    %cst_201 = arith.constant dense<0.000000e+00> : vector<16x32xf32>
    %635 = tpu.matmul %410, %523, %cst_201 {dimension_numbers = #tpu.dot_dimension_numbers<[1], [0], [0], [1], [0, 0, 1, 1], [], []>} : vector<16x32xf32>, vector<32x32xf32>, vector<16x32xf32> -> vector<16x32xf32>
    %636 = arith.addf %635, %530 : vector<16x32xf32>
    %cst_202 = arith.constant dense<0.000000e+00> : vector<16xf32>
    %637 = vector.multi_reduction <add>, %636, %cst_202 [1] : vector<16x32xf32> to vector<16xf32>
    %638 = vector.shape_cast %637 : vector<16xf32> to vector<16x1xf32>
    %cst_203 = arith.constant 3.200000e+01 : f32
    %639 = vector.broadcast %cst_203 : f32 to vector<16x1xf32>
    %640 = arith.divf %638, %639 : vector<16x1xf32>
    %641 = vector.broadcast %640 : vector<16x1xf32> to vector<16x32xf32>
    %642 = arith.subf %636, %641 : vector<16x32xf32>
    %643 = arith.mulf %642, %642 : vector<16x32xf32>
    %cst_204 = arith.constant dense<0.000000e+00> : vector<16xf32>
    %644 = vector.multi_reduction <add>, %643, %cst_204 [1] : vector<16x32xf32> to vector<16xf32>
    %645 = vector.shape_cast %644 : vector<16xf32> to vector<16x1xf32>
    %cst_205 = arith.constant 3.200000e+01 : f32
    %646 = vector.broadcast %cst_205 : f32 to vector<16x1xf32>
    %647 = arith.divf %645, %646 : vector<16x1xf32>
    %648 = vector.broadcast %640 : vector<16x1xf32> to vector<16x32xf32>
    %649 = arith.subf %636, %648 : vector<16x32xf32>
    %cst_206 = arith.constant 9.99999974E-6 : f32
    %650 = vector.broadcast %cst_206 : f32 to vector<16x1xf32>
    %651 = arith.addf %647, %650 : vector<16x1xf32>
    %652 = math.rsqrt %651 : vector<16x1xf32>
    %653 = vector.broadcast %652 : vector<16x1xf32> to vector<16x32xf32>
    %654 = arith.mulf %649, %653 : vector<16x32xf32>
    %655 = vector.broadcast %526 : vector<1x32xf32> to vector<16x32xf32>
    %656 = arith.mulf %654, %655 : vector<16x32xf32>
    %657 = vector.broadcast %527 : vector<1x32xf32> to vector<16x32xf32>
    %658 = arith.addf %656, %657 : vector<16x32xf32>
    %cst_207 = arith.constant 0.000000e+00 : f32
    %659 = vector.broadcast %cst_207 : f32 to vector<16x32xf32>
    %660 = arith.maximumf %658, %659 : vector<16x32xf32>
    %cst_208 = arith.constant dense<0.000000e+00> : vector<16x32xf32>
    %661 = tpu.matmul %436, %523, %cst_208 {dimension_numbers = #tpu.dot_dimension_numbers<[1], [0], [0], [1], [0, 0, 1, 1], [], []>} : vector<16x32xf32>, vector<32x32xf32>, vector<16x32xf32> -> vector<16x32xf32>
    %662 = arith.addf %661, %530 : vector<16x32xf32>
    %cst_209 = arith.constant dense<0.000000e+00> : vector<16xf32>
    %663 = vector.multi_reduction <add>, %662, %cst_209 [1] : vector<16x32xf32> to vector<16xf32>
    %664 = vector.shape_cast %663 : vector<16xf32> to vector<16x1xf32>
    %cst_210 = arith.constant 3.200000e+01 : f32
    %665 = vector.broadcast %cst_210 : f32 to vector<16x1xf32>
    %666 = arith.divf %664, %665 : vector<16x1xf32>
    %667 = vector.broadcast %666 : vector<16x1xf32> to vector<16x32xf32>
    %668 = arith.subf %662, %667 : vector<16x32xf32>
    %669 = arith.mulf %668, %668 : vector<16x32xf32>
    %cst_211 = arith.constant dense<0.000000e+00> : vector<16xf32>
    %670 = vector.multi_reduction <add>, %669, %cst_211 [1] : vector<16x32xf32> to vector<16xf32>
    %671 = vector.shape_cast %670 : vector<16xf32> to vector<16x1xf32>
    %cst_212 = arith.constant 3.200000e+01 : f32
    %672 = vector.broadcast %cst_212 : f32 to vector<16x1xf32>
    %673 = arith.divf %671, %672 : vector<16x1xf32>
    %674 = vector.broadcast %666 : vector<16x1xf32> to vector<16x32xf32>
    %675 = arith.subf %662, %674 : vector<16x32xf32>
    %cst_213 = arith.constant 9.99999974E-6 : f32
    %676 = vector.broadcast %cst_213 : f32 to vector<16x1xf32>
    %677 = arith.addf %673, %676 : vector<16x1xf32>
    %678 = math.rsqrt %677 : vector<16x1xf32>
    %679 = vector.broadcast %678 : vector<16x1xf32> to vector<16x32xf32>
    %680 = arith.mulf %675, %679 : vector<16x32xf32>
    %681 = vector.broadcast %526 : vector<1x32xf32> to vector<16x32xf32>
    %682 = arith.mulf %680, %681 : vector<16x32xf32>
    %683 = vector.broadcast %527 : vector<1x32xf32> to vector<16x32xf32>
    %684 = arith.addf %682, %683 : vector<16x32xf32>
    %cst_214 = arith.constant 0.000000e+00 : f32
    %685 = vector.broadcast %cst_214 : f32 to vector<16x32xf32>
    %686 = arith.maximumf %684, %685 : vector<16x32xf32>
    %cst_215 = arith.constant dense<0.000000e+00> : vector<16x32xf32>
    %687 = tpu.matmul %462, %523, %cst_215 {dimension_numbers = #tpu.dot_dimension_numbers<[1], [0], [0], [1], [0, 0, 1, 1], [], []>} : vector<16x32xf32>, vector<32x32xf32>, vector<16x32xf32> -> vector<16x32xf32>
    %688 = arith.addf %687, %530 : vector<16x32xf32>
    %cst_216 = arith.constant dense<0.000000e+00> : vector<16xf32>
    %689 = vector.multi_reduction <add>, %688, %cst_216 [1] : vector<16x32xf32> to vector<16xf32>
    %690 = vector.shape_cast %689 : vector<16xf32> to vector<16x1xf32>
    %cst_217 = arith.constant 3.200000e+01 : f32
    %691 = vector.broadcast %cst_217 : f32 to vector<16x1xf32>
    %692 = arith.divf %690, %691 : vector<16x1xf32>
    %693 = vector.broadcast %692 : vector<16x1xf32> to vector<16x32xf32>
    %694 = arith.subf %688, %693 : vector<16x32xf32>
    %695 = arith.mulf %694, %694 : vector<16x32xf32>
    %cst_218 = arith.constant dense<0.000000e+00> : vector<16xf32>
    %696 = vector.multi_reduction <add>, %695, %cst_218 [1] : vector<16x32xf32> to vector<16xf32>
    %697 = vector.shape_cast %696 : vector<16xf32> to vector<16x1xf32>
    %cst_219 = arith.constant 3.200000e+01 : f32
    %698 = vector.broadcast %cst_219 : f32 to vector<16x1xf32>
    %699 = arith.divf %697, %698 : vector<16x1xf32>
    %700 = vector.broadcast %692 : vector<16x1xf32> to vector<16x32xf32>
    %701 = arith.subf %688, %700 : vector<16x32xf32>
    %cst_220 = arith.constant 9.99999974E-6 : f32
    %702 = vector.broadcast %cst_220 : f32 to vector<16x1xf32>
    %703 = arith.addf %699, %702 : vector<16x1xf32>
    %704 = math.rsqrt %703 : vector<16x1xf32>
    %705 = vector.broadcast %704 : vector<16x1xf32> to vector<16x32xf32>
    %706 = arith.mulf %701, %705 : vector<16x32xf32>
    %707 = vector.broadcast %526 : vector<1x32xf32> to vector<16x32xf32>
    %708 = arith.mulf %706, %707 : vector<16x32xf32>
    %709 = vector.broadcast %527 : vector<1x32xf32> to vector<16x32xf32>
    %710 = arith.addf %708, %709 : vector<16x32xf32>
    %cst_221 = arith.constant 0.000000e+00 : f32
    %711 = vector.broadcast %cst_221 : f32 to vector<16x32xf32>
    %712 = arith.maximumf %710, %711 : vector<16x32xf32>
    %cst_222 = arith.constant dense<0.000000e+00> : vector<16x32xf32>
    %713 = tpu.matmul %488, %523, %cst_222 {dimension_numbers = #tpu.dot_dimension_numbers<[1], [0], [0], [1], [0, 0, 1, 1], [], []>} : vector<16x32xf32>, vector<32x32xf32>, vector<16x32xf32> -> vector<16x32xf32>
    %714 = arith.addf %713, %530 : vector<16x32xf32>
    %cst_223 = arith.constant dense<0.000000e+00> : vector<16xf32>
    %715 = vector.multi_reduction <add>, %714, %cst_223 [1] : vector<16x32xf32> to vector<16xf32>
    %716 = vector.shape_cast %715 : vector<16xf32> to vector<16x1xf32>
    %cst_224 = arith.constant 3.200000e+01 : f32
    %717 = vector.broadcast %cst_224 : f32 to vector<16x1xf32>
    %718 = arith.divf %716, %717 : vector<16x1xf32>
    %719 = vector.broadcast %718 : vector<16x1xf32> to vector<16x32xf32>
    %720 = arith.subf %714, %719 : vector<16x32xf32>
    %721 = arith.mulf %720, %720 : vector<16x32xf32>
    %cst_225 = arith.constant dense<0.000000e+00> : vector<16xf32>
    %722 = vector.multi_reduction <add>, %721, %cst_225 [1] : vector<16x32xf32> to vector<16xf32>
    %723 = vector.shape_cast %722 : vector<16xf32> to vector<16x1xf32>
    %cst_226 = arith.constant 3.200000e+01 : f32
    %724 = vector.broadcast %cst_226 : f32 to vector<16x1xf32>
    %725 = arith.divf %723, %724 : vector<16x1xf32>
    %726 = vector.broadcast %718 : vector<16x1xf32> to vector<16x32xf32>
    %727 = arith.subf %714, %726 : vector<16x32xf32>
    %cst_227 = arith.constant 9.99999974E-6 : f32
    %728 = vector.broadcast %cst_227 : f32 to vector<16x1xf32>
    %729 = arith.addf %725, %728 : vector<16x1xf32>
    %730 = math.rsqrt %729 : vector<16x1xf32>
    %731 = vector.broadcast %730 : vector<16x1xf32> to vector<16x32xf32>
    %732 = arith.mulf %727, %731 : vector<16x32xf32>
    %733 = vector.broadcast %526 : vector<1x32xf32> to vector<16x32xf32>
    %734 = arith.mulf %732, %733 : vector<16x32xf32>
    %735 = vector.broadcast %527 : vector<1x32xf32> to vector<16x32xf32>
    %736 = arith.addf %734, %735 : vector<16x32xf32>
    %cst_228 = arith.constant 0.000000e+00 : f32
    %737 = vector.broadcast %cst_228 : f32 to vector<16x32xf32>
    %738 = arith.maximumf %736, %737 : vector<16x32xf32>
    %cst_229 = arith.constant dense<0.000000e+00> : vector<16x32xf32>
    %739 = tpu.matmul %514, %523, %cst_229 {dimension_numbers = #tpu.dot_dimension_numbers<[1], [0], [0], [1], [0, 0, 1, 1], [], []>} : vector<16x32xf32>, vector<32x32xf32>, vector<16x32xf32> -> vector<16x32xf32>
    %740 = arith.addf %739, %530 : vector<16x32xf32>
    %cst_230 = arith.constant dense<0.000000e+00> : vector<16xf32>
    %741 = vector.multi_reduction <add>, %740, %cst_230 [1] : vector<16x32xf32> to vector<16xf32>
    %742 = vector.shape_cast %741 : vector<16xf32> to vector<16x1xf32>
    %cst_231 = arith.constant 3.200000e+01 : f32
    %743 = vector.broadcast %cst_231 : f32 to vector<16x1xf32>
    %744 = arith.divf %742, %743 : vector<16x1xf32>
    %745 = vector.broadcast %744 : vector<16x1xf32> to vector<16x32xf32>
    %746 = arith.subf %740, %745 : vector<16x32xf32>
    %747 = arith.mulf %746, %746 : vector<16x32xf32>
    %cst_232 = arith.constant dense<0.000000e+00> : vector<16xf32>
    %748 = vector.multi_reduction <add>, %747, %cst_232 [1] : vector<16x32xf32> to vector<16xf32>
    %749 = vector.shape_cast %748 : vector<16xf32> to vector<16x1xf32>
    %cst_233 = arith.constant 3.200000e+01 : f32
    %750 = vector.broadcast %cst_233 : f32 to vector<16x1xf32>
    %751 = arith.divf %749, %750 : vector<16x1xf32>
    %752 = vector.broadcast %744 : vector<16x1xf32> to vector<16x32xf32>
    %753 = arith.subf %740, %752 : vector<16x32xf32>
    %cst_234 = arith.constant 9.99999974E-6 : f32
    %754 = vector.broadcast %cst_234 : f32 to vector<16x1xf32>
    %755 = arith.addf %751, %754 : vector<16x1xf32>
    %756 = math.rsqrt %755 : vector<16x1xf32>
    %757 = vector.broadcast %756 : vector<16x1xf32> to vector<16x32xf32>
    %758 = arith.mulf %753, %757 : vector<16x32xf32>
    %759 = vector.broadcast %526 : vector<1x32xf32> to vector<16x32xf32>
    %760 = arith.mulf %758, %759 : vector<16x32xf32>
    %761 = vector.broadcast %527 : vector<1x32xf32> to vector<16x32xf32>
    %762 = arith.addf %760, %761 : vector<16x32xf32>
    %cst_235 = arith.constant 0.000000e+00 : f32
    %763 = vector.broadcast %cst_235 : f32 to vector<16x32xf32>
    %764 = arith.maximumf %762, %763 : vector<16x32xf32>
    %765 = arith.maximumf %556, %582 : vector<16x32xf32>
    %766 = arith.maximumf %765, %608 : vector<16x32xf32>
    %767 = arith.maximumf %766, %634 : vector<16x32xf32>
    %768 = arith.maximumf %767, %660 : vector<16x32xf32>
    %769 = arith.maximumf %768, %686 : vector<16x32xf32>
    %770 = arith.maximumf %769, %712 : vector<16x32xf32>
    %771 = arith.maximumf %770, %738 : vector<16x32xf32>
    %772 = arith.maximumf %771, %764 : vector<16x32xf32>
    %773 = tpu.concatenate %772, %772, %772, %772 in 1 : vector<16x32xf32>, vector<16x32xf32>, vector<16x32xf32>, vector<16x32xf32> -> vector<16x128xf32>
    %c0_236 = arith.constant 0 : index
    %c0_237 = arith.constant 0 : index
    %774 = vector.load %arg16[%c0_236, %c0_237] : memref<16x128xf32, #tpu.memory_space<vmem>>, vector<16x128xf32>
    tpu.vector_store %arg16[%c0_236, %c0_237], %773 {strides = array<i32>} : memref<16x128xf32, #tpu.memory_space<vmem>>, vector<16x128xf32>,
    return
  }
  func.func @transform_0(%arg0: i32) -> (i32, i32, i32) {
    %c0_i32 = arith.constant 0 : i32
    %c0_i32_0 = arith.constant 0 : i32
    %c0_i32_1 = arith.constant 0 : i32
    return %c0_i32, %arg0, %c0_i32_0 : i32, i32, i32
  }
  func.func @transform_1(%arg0: i32) -> (i32, i32) {
    %c0_i32 = arith.constant 0 : i32
    %c0_i32_0 = arith.constant 0 : i32
    %c0_i32_1 = arith.constant 0 : i32
    return %c0_i32, %c0_i32_0 : i32, i32
  }
  func.func @transform_2(%arg0: i32) -> (i32, i32) {
    %c0_i32 = arith.constant 0 : i32
    %c0_i32_0 = arith.constant 0 : i32
    %c0_i32_1 = arith.constant 0 : i32
    return %c0_i32, %c0_i32_0 : i32, i32
  }
  func.func @transform_3(%arg0: i32) -> (i32, i32) {
    %c0_i32 = arith.constant 0 : i32
    %c0_i32_0 = arith.constant 0 : i32
    %c0_i32_1 = arith.constant 0 : i32
    return %c0_i32, %c0_i32_0 : i32, i32
  }
  func.func @transform_4(%arg0: i32) -> (i32, i32) {
    %c0_i32 = arith.constant 0 : i32
    %c0_i32_0 = arith.constant 0 : i32
    %c0_i32_1 = arith.constant 0 : i32
    return %c0_i32, %c0_i32_0 : i32, i32
  }
  func.func @transform_5(%arg0: i32) -> (i32, i32) {
    %c0_i32 = arith.constant 0 : i32
    %c0_i32_0 = arith.constant 0 : i32
    %c0_i32_1 = arith.constant 0 : i32
    return %c0_i32, %c0_i32_0 : i32, i32
  }
  func.func @transform_6(%arg0: i32) -> (i32, i32) {
    %c0_i32 = arith.constant 0 : i32
    %c0_i32_0 = arith.constant 0 : i32
    %c0_i32_1 = arith.constant 0 : i32
    return %c0_i32, %c0_i32_0 : i32, i32
  }
  func.func @transform_7(%arg0: i32) -> (i32, i32) {
    %c0_i32 = arith.constant 0 : i32
    %c0_i32_0 = arith.constant 0 : i32
    %c0_i32_1 = arith.constant 0 : i32
    return %c0_i32, %c0_i32_0 : i32, i32
  }
  func.func @transform_8(%arg0: i32) -> (i32, i32) {
    %c0_i32 = arith.constant 0 : i32
    %c0_i32_0 = arith.constant 0 : i32
    %c0_i32_1 = arith.constant 0 : i32
    return %c0_i32, %c0_i32_0 : i32, i32
  }
  func.func @transform_9(%arg0: i32) -> (i32, i32) {
    %c0_i32 = arith.constant 0 : i32
    %c0_i32_0 = arith.constant 0 : i32
    %c0_i32_1 = arith.constant 0 : i32
    return %c0_i32, %c0_i32_0 : i32, i32
  }
  func.func @transform_10(%arg0: i32) -> (i32, i32) {
    %c0_i32 = arith.constant 0 : i32
    %c0_i32_0 = arith.constant 0 : i32
    %c0_i32_1 = arith.constant 0 : i32
    return %c0_i32, %c0_i32_0 : i32, i32
  }
  func.func @transform_11(%arg0: i32) -> (i32, i32) {
    %c0_i32 = arith.constant 0 : i32
    %c0_i32_0 = arith.constant 0 : i32
    %c0_i32_1 = arith.constant 0 : i32
    return %c0_i32, %c0_i32_0 : i32, i32
  }
  func.func @transform_12(%arg0: i32) -> (i32, i32) {
    %c0_i32 = arith.constant 0 : i32
    %c0_i32_0 = arith.constant 0 : i32
    %c0_i32_1 = arith.constant 0 : i32
    return %c0_i32, %c0_i32_0 : i32, i32
  }
  func.func @transform_13(%arg0: i32) -> (i32, i32) {
    %c0_i32 = arith.constant 0 : i32
    %c0_i32_0 = arith.constant 0 : i32
    %c0_i32_1 = arith.constant 0 : i32
    return %c0_i32, %c0_i32_0 : i32, i32
  }
  func.func @transform_14(%arg0: i32) -> (i32, i32) {
    %c0_i32 = arith.constant 0 : i32
    %c0_i32_0 = arith.constant 0 : i32
    %c0_i32_1 = arith.constant 0 : i32
    return %c0_i32, %c0_i32_0 : i32, i32
  }
  func.func @transform_15(%arg0: i32) -> (i32, i32) {
    %c0_i32 = arith.constant 0 : i32
    %c0_i32_0 = arith.constant 0 : i32
    return %arg0, %c0_i32 : i32, i32
  }
}

</mosaic_0001>

<bundles_post_ra>
// kernel: tpu_custom_call.1
= control target key start
LH: loop header
LB: loop body
LE: loop exit
PB: predicated region body
PF: predicated region fallthrough
CT: control target
= control target key end

     0   :  { %vm70_vm0 = vcmask 1046528   ;;  %vm63_vm1 = vcmask 56320   ;;  %s5498_s0 = inlined_call_operand.vmem [shape: f32[9,16,7], index: 0, kind: input, shape index: {}]   ;;  %s5499_s1 = inlined_call_operand.vmem [shape: f32[7,32], index: 1, kind: input, shape index: {}]   ;;  %s5500_s2 = inlined_call_operand.vmem [shape: f32[1,32], index: 2, kind: input, shape index: {}]   ;;  %s5501_s3 = inlined_call_operand.vmem [shape: f32[1,32], index: 3, kind: input, shape index: {}]   ;;  %s5502_s4 = inlined_call_operand.vmem [shape: f32[1,32], index: 4, kind: input, shape index: {}]   ;;  %s5503_s5 = inlined_call_operand.vmem [shape: f32[32,32], index: 5, kind: input, shape index: {}]   ;;  %s5504_s6 = inlined_call_operand.vmem [shape: f32[32,32], index: 6, kind: input, shape index: {}]   ;;  %s5505_s7 = inlined_call_operand.vmem [shape: f32[1,32], index: 7, kind: input, shape index: {}]   ;;  %s5506_s8 = inlined_call_operand.vmem [shape: f32[1,32], index: 8, kind: input, shape index: {}]   ;;  %s5507_s9 = inlined_call_operand.vmem [shape: f32[1,32], index: 9, kind: input, shape index: {}]   ;;  %s5508_s10 = inlined_call_operand.vmem [shape: f32[32,32], index: 10, kind: input, shape index: {}]   ;;  %s5509_s11 = inlined_call_operand.vmem [shape: f32[32,32], index: 11, kind: input, shape index: {}]   ;;  %s5510_s12 = inlined_call_operand.vmem [shape: f32[1,32], index: 12, kind: input, shape index: {}]   ;;  %s5511_s13 = inlined_call_operand.vmem [shape: f32[1,32], index: 13, kind: input, shape index: {}]   ;;  %s5512_s14 = inlined_call_operand.vmem [shape: f32[1,32], index: 14, kind: input, shape index: {}]   ;;  %s5513_s15 = inlined_call_operand.hbm [shape: f32[16,128], index: 15, kind: output, shape index: {}]  }
   0x1   :  { %v51_v0 = vld [vmem:[%s5499_s1] sm:$0x7f]  ;;  %v56_v2 = vld [vmem:[%s5498_s0 + $0x8] sm:$0xff]  ;;  %v3477_v3 = vld [vmem:[%s5498_s0 + $0x10] sm:$0xff] }
   0x2   :  { %v55_v1 = vld [vmem:[%s5498_s0] sm:$0xff]  ;;  %3710 = vmatprep.subr.msk.mxu0 %vm70_vm0, %v51_v0  ;;  %3715 = vmatprep.subr.msk.mxu1 %vm70_vm0, %v51_v0  ;;  %v3478_v4 = vld [vmem:[%s5498_s0 + $0x18] sm:$0xff]  ;;  %v3483_v6 = vld [vmem:[%s5498_s0 + $0x28] sm:$0xff] }
   0x3   :  { %3712 = vmatprep.mubr.msk.f32.mxu0 %vm63_vm1, %v55_v1  ;;  %3711 = vmatpush3.msk.msra.mxu0 %vm70_vm0, %v51_v0  ;;  %v3482_v5 = vld [vmem:[%s5498_s0 + $0x20] sm:$0xff]  ;;  %v3487_v7 = vld [vmem:[%s5498_s0 + $0x30] sm:$0xff]  ;;  %v3488_v8 = vld [vmem:[%s5498_s0 + $0x38] sm:$0xff] }
   0x4   :  { %3713 = vmatmul.mubr.msk.f32.vlgmr.msra.gmra.mrb[0].mxu0 %vm63_vm1, %v56_v2  ;;  %3716 = vmatpush3.msk.msra.mxu1 %vm70_vm0, %v51_v0 }
   0x5   :  { %3717 = vmatprep.mubr.msk.f32.mxu1 %vm63_vm1, %v3477_v3  ;;  %3720 = vmatprep.subr.msk.mxu0 %vm70_vm0, %v51_v0 }
   0x6   :  { %3718 = vmatmul.mubr.msk.f32.vlgmr.msra.gmra.mrb[0].mxu1 %vm63_vm1, %v3478_v4  ;;  %3721 = vmatpush3.msk.msra.mxu0 %vm70_vm0, %v51_v0 }
   0x7   :  { %3722 = vmatprep.mubr.msk.f32.mxu0 %vm63_vm1, %v3482_v5  ;;  %3725 = vmatprep.subr.msk.mxu1 %vm70_vm0, %v51_v0 }
   0x8   :  { %20 = vsyncpa [#allocation3], 0  ;;  %3723 = vmatmul.mubr.msk.f32.vlgmr.msra.gmra.mrb[2].mxu0 %vm63_vm1, %v3483_v6  ;;  %3726 = vmatpush3.msk.msra.mxu1 %vm70_vm0, %v51_v0  ;;  %v3492_v9 = vld [vmem:[%s5498_s0 + $0x40] sm:$0xff]  ;;  %v3493_v10 = vld [vmem:[%s5498_s0 + $0x48] sm:$0xff]  ;;  %vm149_vm2 = vcmask 261120   ;;  %s4274_s25 = smov 64  }
   0x9   :  { %3727 = vmatprep.mubr.msk.f32.mxu1 %vm63_vm1, %v3487_v7  ;;  %3730 = vmatprep.subr.msk.mxu0 %vm70_vm0, %v51_v0  ;;  %v3497_v11 = vld [vmem:[%s5498_s0 + $0x50] sm:$0xff]  ;;  %v3498_v12 = vld [vmem:[%s5498_s0 + $0x58] sm:$0xff]  ;;  %v3502_v13 = vld [vmem:[%s5498_s0 + $0x60] sm:$0xff]  ;;  %vm3450_vm3 = vcmask 785408   ;;  %vm3447_vm4 = vcmask 523264  }
   0xa   :  { %3728 = vmatmul.mubr.msk.f32.vlgmr.msra.gmra.mrb[2].mxu1 %vm63_vm1, %v3488_v8  ;;  %3731 = vmatpush3.msk.msra.mxu0 %vm70_vm0, %v51_v0  ;;  %v3503_v14 = vld [vmem:[%s5498_s0 + $0x68] sm:$0xff]  ;;  %v3507_v15 = vld [vmem:[%s5498_s0 + $0x70] sm:$0xff]  ;;  %v3508_v16 = vld [vmem:[%s5498_s0 + $0x78] sm:$0xff] }
   0xb   :  { %3732 = vmatprep.mubr.msk.f32.mxu0 %vm63_vm1, %v3492_v9  ;;  %3735 = vmatprep.subr.msk.mxu1 %vm70_vm0, %v51_v0  ;;  %v3512_v17 = vld [vmem:[%s5498_s0 + $0x80] sm:$0xff]  ;;  %v3513_v18 = vld [vmem:[%s5498_s0 + $0x88] sm:$0xff] }
   0xc   :  { %3733 = vmatmul.mubr.msk.f32.vlgmr.msra.gmra.mrb[4].mxu0 %vm63_vm1, %v3493_v10  ;;  %3736 = vmatpush3.msk.msra.mxu1 %vm70_vm0, %v51_v0  ;;  %v4455_v19 = vld [vmem:[%s5500_s2] ss:$0 sm:$0xff] }
   0xd   :  { %3737 = vmatprep.mubr.msk.f32.mxu1 %vm63_vm1, %v3497_v11  ;;  %3740 = vmatprep.subr.msk.mxu0 %vm70_vm0, %v51_v0 }
   0xe   :  { %3738 = vmatmul.mubr.msk.f32.vlgmr.msra.gmra.mrb[4].mxu1 %vm63_vm1, %v3498_v12  ;;  %3741 = vmatpush3.msk.msra.mxu0 %vm70_vm0, %v51_v0 }
   0xf   :  { %3742 = vmatprep.mubr.msk.f32.mxu0 %vm63_vm1, %v3502_v13  ;;  %3745 = vmatprep.subr.msk.mxu1 %vm70_vm0, %v51_v0 }
  0x10   :  { %3743 = vmatmul.mubr.msk.f32.vlgmr.msra.gmra.mrb[6].mxu0 %vm63_vm1, %v3503_v14  ;;  %3746 = vmatpush3.msk.msra.mxu1 %vm70_vm0, %v51_v0 }
  0x11   :  { %3747 = vmatprep.mubr.msk.f32.mxu1 %vm63_vm1, %v3507_v15  ;;  %3750 = vmatprep.subr.msk.mxu0 %vm70_vm0, %v51_v0 }
  0x12   :  { %3748 = vmatmul.mubr.msk.f32.vlgmr.msra.gmra.mrb[6].mxu1 %vm63_vm1, %v3508_v16  ;;  %3751 = vmatpush3.msk.msra.mxu0 %vm70_vm0, %v51_v0 }
  0x13   :  { %3752 = vmatprep.mubr.msk.f32.mxu0 %vm63_vm1, %v3512_v17 }
  0x14   :  { %3753 = vmatmul.mubr.msk.f32.vlgmr.msra.gmra.mrb[8].mxu0 %vm63_vm1, %v3513_v18 }
  0xd7   :  { %v3714_v20 = vpop.f32.mrb[0].mxu0 }
  0xd8   :  { %v4458_v21 = vadd.f32 %v3714_v20, %v4455_v19  ;;  %v140_v22 = vpop.f32.mrb[1].mxu0 }
  0xd9   :  { %v4461_v23 = vadd.f32 %v4455_v19, %v140_v22  ;;  %v3719_v24 = vpop.f32.mrb[0].mxu1 }
  0xda   :  { %v4464_v25 = vadd.f32 %v3719_v24, %v4455_v19  ;;  %v270_v26 = vpop.f32.mrb[1].mxu1  ;;  %v153_v27 = vsel %vm149_vm2, %v4458_v21, 0.0 }
  0xdb   :  { %v4469_v28 = vadd.f32 %v4455_v19, %v270_v26  ;;  %154 = vadd.xlane.f32.xlu1 %v153_v27  ;;  %v150_v29 = vsel %vm149_vm2, %v4461_v23, 0.0  ;;  %v3724_v30 = vpop.f32.mrb[2].mxu0 }
  0xdc   :  { %151 = vadd.xlane.f32.xlu0 %v150_v29  ;;  %v282_v31 = vsel %vm149_vm2, %v4464_v25, 0.0  ;;  %v4476_v32 = vadd.f32 %v3724_v30, %v4455_v19  ;;  %v386_v33 = vpop.f32.mrb[3].mxu0 }
  0xdd   :  { %v4479_v34 = vadd.f32 %v4455_v19, %v386_v33  ;;  %v279_v35 = vsel %vm149_vm2, %v4469_v28, 0.0  ;;  %v3729_v36 = vpop.f32.mrb[2].mxu1 }
  0xde   :  { %v502_v37 = vpop.f32.mrb[3].mxu1  ;;  %v4484_v39 = vadd.f32 %v3729_v36, %v4455_v19  ;;  %v398_v40 = vsel %vm149_vm2, %v4476_v32, 0.0 }
  0xdf   :  { %283 = vadd.xlane.f32.xlu1 %v282_v31  ;;  %v3734_v38 = vpop.f32.mrb[4].mxu0  ;;  %v4489_v42 = vadd.f32 %v4455_v19, %v502_v37  ;;  %v395_v43 = vsel %vm149_vm2, %v4479_v34, 0.0 }
  0xe0   :  { %280 = vadd.xlane.f32.xlu0 %v279_v35  ;;  %v618_v41 = vpop.f32.mrb[5].mxu0  ;;  %v514_v47 = vsel %vm149_vm2, %v4484_v39, 0.0  ;;  %v4496_v48 = vadd.f32 %v3734_v38, %v4455_v19 }
  0xe1   :  { %v3739_v44 = vpop.f32.mrb[4].mxu1  ;;  %v4499_v50 = vadd.f32 %v4455_v19, %v618_v41  ;;  %v511_v51 = vsel %vm149_vm2, %v4489_v42, 0.0 }
  0xe2   :  { %v734_v45 = vpop.f32.mrb[5].mxu1  ;;  %v4504_v55 = vadd.f32 %v3739_v44, %v4455_v19  ;;  %v630_v56 = vsel %vm149_vm2, %v4496_v48, 0.0 }
  0xe3   :  { %399 = vadd.xlane.f32.xlu1 %v398_v40  ;;  %v3744_v46 = vpop.f32.mrb[6].mxu0  ;;  %v4509_v58 = vadd.f32 %v4455_v19, %v734_v45  ;;  %v627_v59 = vsel %vm149_vm2, %v4499_v50, 0.0 }
  0xe4   :  { %396 = vadd.xlane.f32.xlu0 %v395_v43  ;;  %v850_v49 = vpop.f32.mrb[7].mxu0  ;;  %v746_v60 = vsel %vm149_vm2, %v4504_v55, 0.0  ;;  %v4516_v61 = vadd.f32 %v3744_v46, %v4455_v19 }
  0xe5   :  { %v3749_v52 = vpop.f32.mrb[6].mxu1  ;;  %v4519_v62 = vadd.f32 %v4455_v19, %v850_v49  ;;  %v743_v63 = vsel %vm149_vm2, %v4509_v58, 0.0 }
  0xe6   :  { %v966_v53 = vpop.f32.mrb[7].mxu1  ;;  %v4524_v0 = vadd.f32 %v3749_v52, %v4455_v19  ;;  %v862_v1 = vsel %vm149_vm2, %v4516_v61, 0.0 }
  0xe7   :  { %515 = vadd.xlane.f32.xlu1 %v514_v47  ;;  %v3754_v54 = vpop.f32.mrb[8].mxu0  ;;  %v4529_v2 = vadd.f32 %v4455_v19, %v966_v53  ;;  %v859_v3 = vsel %vm149_vm2, %v4519_v62, 0.0 }
  0xe8   :  { %512 = vadd.xlane.f32.xlu0 %v511_v51  ;;  %v1082_v57 = vpop.f32.mrb[9].mxu0  ;;  %v978_v4 = vsel %vm149_vm2, %v4524_v0, 0.0  ;;  %v4536_v5 = vadd.f32 %v3754_v54, %v4455_v19 }
  0xe9   :  { %v4539_v6 = vadd.f32 %v4455_v19, %v1082_v57  ;;  %v975_v7 = vsel %vm149_vm2, %v4529_v2, 0.0 }
  0xea   :  { %v1094_v8 = vsel %vm149_vm2, %v4536_v5, 0.0 }
  0xeb   :  { %631 = vadd.xlane.f32.xlu1 %v630_v56  ;;  %v1091_v9 = vsel %vm149_vm2, %v4539_v6, 0.0 }
  0xec   :  { %628 = vadd.xlane.f32.xlu0 %v627_v59 }
  0xef   :  { %747 = vadd.xlane.f32.xlu1 %v746_v60 }
  0xf0   :  { %744 = vadd.xlane.f32.xlu0 %v743_v63 }
  0xf3   :  { %863 = vadd.xlane.f32.xlu1 %v862_v1 }
  0xf4   :  { %860 = vadd.xlane.f32.xlu0 %v859_v3 }
  0xf7   :  { %979 = vadd.xlane.f32.xlu1 %v978_v4 }
  0xf8   :  { %976 = vadd.xlane.f32.xlu0 %v975_v7 }
  0xfb   :  { %1095 = vadd.xlane.f32.xlu1 %v1094_v8 }
  0xfc   :  { %1092 = vadd.xlane.f32.xlu0 %v1091_v9 }
 0x168   :  { %v155_v10 = vpop.xlane.xlu1 %154 }
 0x169   :  { %v158_v11 = vmul.f32 0.03125, %v155_v10  ;;  %v152_v12 = vpop.xlane.xlu0 %151 }
 0x16a   :  { %v157_v13 = vmul.f32 0.03125, %v152_v12 }
 0x16b   :  { %v4548_v14 = vsub.f32 %v4458_v21, %v158_v11 }
 0x16c   :  { %v4551_v15 = vsub.f32 %v4461_v23, %v157_v13  ;;  %v284_v16 = vpop.xlane.xlu1 %283 }
 0x16d   :  { %v286_v17 = vmul.f32 0.03125, %v284_v16  ;;  %v281_v18 = vpop.xlane.xlu0 %280  ;;  %v162_v19 = vmul.f32 %v4548_v14, %v4548_v14 }
 0x16e   :  { %v285_v20 = vmul.f32 0.03125, %v281_v18  ;;  %v161_v26 = vmul.f32 %v4551_v15, %v4551_v15 }
 0x16f   :  { %v4556_v22 = vsub.f32 %v4464_v25, %v286_v17  ;;  %v166_v24 = vsel %vm149_vm2, %v162_v19, 0.0 }
 0x170   :  { %v4562_v21 = vsub.f32 %v4469_v28, %v285_v20  ;;  %v400_v23 = vpop.xlane.xlu1 %399  ;;  %167 = vadd.xlane.f32.xlu0 %v166_v24  ;;  %v163_v35 = vsel %vm149_vm2, %v161_v26, 0.0 }
 0x171   :  { %v402_v27 = vmul.f32 0.03125, %v400_v23  ;;  %v397_v29 = vpop.xlane.xlu0 %396  ;;  %v290_v30 = vmul.f32 %v4556_v22, %v4556_v22 }
 0x172   :  { %v401_v31 = vmul.f32 0.03125, %v397_v29  ;;  %v289_v36 = vmul.f32 %v4562_v21, %v4562_v21 }
 0x173   :  { %v4567_v33 = vsub.f32 %v4476_v32, %v402_v27  ;;  %v294_v25 = vsel %vm149_vm2, %v290_v30, 0.0 }
 0x174   :  { %v4574_v28 = vsub.f32 %v4479_v34, %v401_v31  ;;  %v516_v37 = vpop.xlane.xlu1 %515  ;;  %295 = vadd.xlane.f32.xlu1 %v294_v25  ;;  %164 = vadd.xlane.f32.xlu0 %v163_v35  ;;  %v291_v44 = vsel %vm149_vm2, %v289_v36, 0.0 }
 0x175   :  { %v518_v38 = vmul.f32 0.03125, %v516_v37  ;;  %v513_v40 = vpop.xlane.xlu0 %512  ;;  %v406_v45 = vmul.f32 %v4567_v33, %v4567_v33 }
 0x176   :  { %v517_v41 = vmul.f32 0.03125, %v513_v40  ;;  %v405_v32 = vmul.f32 %v4574_v28, %v4574_v28 }
 0x177   :  { %v4579_v43 = vsub.f32 %v4484_v39, %v518_v38  ;;  %v410_v54 = vsel %vm149_vm2, %v406_v45, 0.0  ;;  %v1139_v45 = vld [vmem:[%s5503_s5] sm:$0xff] }
 0x178   :  { %v4585_v34 = vsub.f32 %v4489_v42, %v517_v41  ;;  %v632_v46 = vpop.xlane.xlu1 %631  ;;  %292 = vadd.xlane.f32.xlu1 %v291_v44  ;;  %v407_v47 = vsel %vm149_vm2, %v405_v32, 0.0 }
 0x179   :  { %v634_v49 = vmul.f32 0.03125, %v632_v46  ;;  %408 = vadd.xlane.f32.xlu0 %v407_v47  ;;  %v629_v51 = vpop.xlane.xlu0 %628  ;;  %v522_v42 = vmul.f32 %v4579_v43, %v4579_v43 }
 0x17a   :  { %v633_v52 = vmul.f32 0.03125, %v629_v51  ;;  %v521_v39 = vmul.f32 %v4585_v34, %v4585_v34  ;;  %v1141_v51 = vld [vmem:[%s5503_s5 + $0x10] sm:$0xff] }
 0x17b   :  { %v4591_v53 = vsub.f32 %v4496_v48, %v634_v49  ;;  %v526_v4 = vsel %vm149_vm2, %v522_v42, 0.0  ;;  %v1144_v42 = vld [vmem:[%s5504_s6 + $0x8] sm:$0xff] }
 0x17c   :  { %v4597_v56 = vsub.f32 %v4499_v50, %v633_v52  ;;  %v748_v57 = vpop.xlane.xlu1 %747  ;;  %411 = vadd.xlane.f32.xlu1 %v410_v54  ;;  %v523_v59 = vsel %vm149_vm2, %v521_v39, 0.0  ;;  %v1142_v52 = vld [vmem:[%s5503_s5 + $0x18] sm:$0xff]  ;;  %v1143_v54 = vld [vmem:[%s5504_s6] sm:$0xff] }
 0x17d   :  { %v750_v60 = vmul.f32 0.03125, %v748_v57  ;;  %524 = vadd.xlane.f32.xlu0 %v523_v59  ;;  %v745_v63 = vpop.xlane.xlu0 %744  ;;  %v638_v50 = vmul.f32 %v4591_v53, %v4591_v53  ;;  %v4671_v39 = vpack.c.bf16 %v1142_v52, %v1141_v51  ;;  %v3975_v57 = vpack.c.bf16 %v1144_v42, %v1143_v54  ;;  %v1145_v59 = vld [vmem:[%s5504_s6 + $0x10] sm:$0xff] }
 0x17e   :  { %v749_v1 = vmul.f32 0.03125, %v745_v63  ;;  %v637_v48 = vmul.f32 %v4597_v56, %v4597_v56 }
 0x17f   :  { %v4603_v3 = vsub.f32 %v4504_v55, %v750_v60  ;;  %v642_v16 = vsel %vm149_vm2, %v638_v50, 0.0  ;;  %3976 = vmatprep.subr.bf16.mxu1 %v3975_v57  ;;  %v1146_v60 = vld [vmem:[%s5504_s6 + $0x18] sm:$0xff] }
 0x180   :  { %v4609_v7 = vsub.f32 %v4509_v58, %v749_v1  ;;  %v864_v8 = vpop.xlane.xlu1 %863  ;;  %527 = vadd.xlane.f32.xlu1 %v526_v4  ;;  %v639_v9 = vsel %vm149_vm2, %v637_v48, 0.0  ;;  %3978 = vmatpush3.bf16.msra.mxu1 %v3975_v57  ;;  %v3979_v63 = vpack.c.bf16 %v1146_v60, %v1145_v59 }
 0x181   :  { %v866_v10 = vmul.f32 0.03125, %v864_v8  ;;  %640 = vadd.xlane.f32.xlu0 %v639_v9  ;;  %v861_v11 = vpop.xlane.xlu0 %860  ;;  %v754_v58 = vmul.f32 %v4603_v3, %v4603_v3 }
 0x182   :  { %v865_v12 = vmul.f32 0.03125, %v861_v11  ;;  %v753_v55 = vmul.f32 %v4609_v7, %v4609_v7  ;;  %3980 = vmatprep.subr.bf16.mxu1 %v3979_v63 }
 0x183   :  { %v4615_v13 = vsub.f32 %v4516_v61, %v866_v10  ;;  %v758_v27 = vsel %vm149_vm2, %v754_v58, 0.0 }
 0x184   :  { %v4621_v17 = vsub.f32 %v4519_v62, %v865_v12  ;;  %v980_v18 = vpop.xlane.xlu1 %979  ;;  %643 = vadd.xlane.f32.xlu1 %v642_v16  ;;  %v755_v19 = vsel %vm149_vm2, %v753_v55, 0.0  ;;  %3982 = vmatpush3.bf16.msra.mxu1 %v3979_v63 }
 0x185   :  { %v982_v20 = vmul.f32 0.03125, %v980_v18  ;;  %756 = vadd.xlane.f32.xlu0 %v755_v19  ;;  %v977_v24 = vpop.xlane.xlu0 %976  ;;  %v870_v62 = vmul.f32 %v4615_v13, %v4615_v13 }
 0x186   :  { %v981_v26 = vmul.f32 0.03125, %v977_v24  ;;  %v869_v61 = vmul.f32 %v4621_v17, %v4621_v17 }
 0x187   :  { %v4627_v23 = vsub.f32 %v4524_v0, %v982_v20  ;;  %v874_v38 = vsel %vm149_vm2, %v870_v62, 0.0 }
 0x188   :  { %v4633_v29 = vsub.f32 %v4529_v2, %v981_v26  ;;  %v1096_v30 = vpop.xlane.xlu1 %1095  ;;  %759 = vadd.xlane.f32.xlu1 %v758_v27  ;;  %v871_v31 = vsel %vm149_vm2, %v869_v61, 0.0 }
 0x189   :  { %v1098_v25 = vmul.f32 0.03125, %v1096_v30  ;;  %872 = vadd.xlane.f32.xlu0 %v871_v31  ;;  %v1093_v35 = vpop.xlane.xlu0 %1092  ;;  %v986_v2 = vmul.f32 %v4627_v23, %v4627_v23 }
 0x18a   :  { %v1097_v36 = vmul.f32 0.03125, %v1093_v35  ;;  %v985_v0 = vmul.f32 %v4633_v29, %v4633_v29 }
 0x18b   :  { %v4639_v37 = vsub.f32 %v4536_v5, %v1098_v25  ;;  %v990_v44 = vsel %vm149_vm2, %v986_v2, 0.0 }
 0x18c   :  { %v4645_v40 = vsub.f32 %v4539_v6, %v1097_v36  ;;  %875 = vadd.xlane.f32.xlu1 %v874_v38  ;;  %v987_v41 = vsel %vm149_vm2, %v985_v0, 0.0  ;;  %v1140_v6 = vld [vmem:[%s5503_s5 + $0x8] sm:$0xff]  ;;  %v4693_v36 = vld [vmem:[%s5501_s3] ss:$0 sm:$0xff]  ;;  %s4275_s3 = smov 96  }
 0x18d   :  { %988 = vadd.xlane.f32.xlu0 %v987_v41  ;;  %v1102_v5 = vmul.f32 %v4639_v37, %v4639_v37  ;;  %v4660_v47 = vpack.c.bf16 %v1140_v6, %v1139_v45 }
 0x18e   :  { %v1101_v32 = vmul.f32 %v4645_v40, %v4645_v40 }
 0x18f   :  { %3984 = vmatprep.subr.bf16.mxu0 %v4660_v47  ;;  %v1106_v49 = vsel %vm149_vm2, %v1102_v5, 0.0  ;;  %3992 = vmatprep.subr.bf16.mxu1 %v4660_v47 }
 0x190   :  { %991 = vadd.xlane.f32.xlu1 %v990_v44  ;;  %v1103_v46 = vsel %vm149_vm2, %v1101_v32, 0.0  ;;  %3986 = vmatpush3.bf16.msra.mxu0 %v4660_v47 }
 0x191   :  { %1104 = vadd.xlane.f32.xlu0 %v1103_v46  ;;  %3988 = vmatprep.subr.bf16.mxu0 %v4671_v39 }
 0x194   :  { %1107 = vadd.xlane.f32.xlu1 %v1106_v49  ;;  %3990 = vmatpush3.bf16.msra.mxu0 %v4671_v39 }
 0x195   :  { %4000 = vmatprep.subr.bf16.mxu0 %v4660_v47 }
 0x1fd   :  { %v168_v1 = vpop.xlane.xlu0 %167 }
 0x1fe   :  { %v170_v48 = vmul.f32 0.03125, %v168_v1 }
 0x200   :  { %v172_v4 = vadd.f32 1e-05, %v170_v48 }
 0x201   :  { %v296_v50 = vpop.xlane.xlu1 %295  ;;  %v165_v8 = vpop.xlane.xlu0 %164 }
 0x202   :  { %4141 = vrsqrt.f32 %v172_v4  ;;  %v169_v9 = vmul.f32 0.03125, %v165_v8  ;;  %v298_v11 = vmul.f32 0.03125, %v296_v50 }
 0x204   :  { %v171_v10 = vadd.f32 1e-05, %v169_v9  ;;  %v300_v19 = vadd.f32 1e-05, %v298_v11 }
 0x205   :  { %v293_v12 = vpop.xlane.xlu1 %292 }
 0x206   :  { %v297_v55 = vmul.f32 0.03125, %v293_v12  ;;  %v409_v16 = vpop.xlane.xlu0 %408  ;;  %4143 = vrsqrt.f32 %v171_v10 }
 0x207   :  { %v413_v58 = vmul.f32 0.03125, %v409_v16 }
 0x208   :  { %v299_v18 = vadd.f32 1e-05, %v297_v55 }
 0x209   :  { %v415_v20 = vadd.f32 1e-05, %v413_v58  ;;  %v412_v24 = vpop.xlane.xlu1 %411 }
 0x20a   :  { %4145 = vrsqrt.f32 %v299_v18  ;;  %v414_v26 = vmul.f32 0.03125, %v412_v24  ;;  %v525_v61 = vpop.xlane.xlu0 %524 }
 0x20b   :  { %4147 = vrsqrt.f32 %v415_v20  ;;  %v529_v27 = vmul.f32 0.03125, %v525_v61 }
 0x20c   :  { %v4142_v62 = vpop.eup %4141  ;;  %v416_v30 = vadd.f32 1e-05, %v414_v26  ;;  %4149 = vrsqrt.f32 %v300_v19 }
 0x20d   :  { %v176_v31 = vmul.f32 %v4142_v62, %v4548_v14  ;;  %v531_v25 = vadd.f32 1e-05, %v529_v27  ;;  %v528_v35 = vpop.xlane.xlu1 %527  ;;  %v4699_v14 = vld [vmem:[%s5502_s4] ss:$0 sm:$0xff]  ;;  %s4276_s4 = smov [#allocation2]  }
 0x20e   :  { %4151 = vrsqrt.f32 %v416_v30  ;;  %v530_v0 = vmul.f32 0.03125, %v528_v35  ;;  %v641_v38 = vpop.xlane.xlu0 %640 }
 0x20f   :  { %4153 = vrsqrt.f32 %v531_v25  ;;  %v645_v2 = vmul.f32 0.03125, %v641_v38  ;;  %v184_v45 = vmul.f32 %v4693_v36, %v176_v31 }
 0x210   :  { %v532_v41 = vadd.f32 1e-05, %v530_v0  ;;  %v4144_v32 = vpop.eup %4143 }
 0x211   :  { %v647_v44 = vadd.f32 1e-05, %v645_v2  ;;  %v644_v5 = vpop.xlane.xlu1 %643  ;;  %v175_v49 = vmul.f32 %v4144_v32, %v4551_v15  ;;  %v4705_v1 = vadd.f32 %v4699_v14, %v184_v45 }
 0x212   :  { %4155 = vrsqrt.f32 %v532_v41  ;;  %v646_v6 = vmul.f32 0.03125, %v644_v5  ;;  %v757_v46 = vpop.xlane.xlu0 %756 }
 0x213   :  { %4157 = vrsqrt.f32 %v647_v44  ;;  %v761_v51 = vmul.f32 0.03125, %v757_v46  ;;  %v183_v42 = vmul.f32 %v4693_v36, %v175_v49  ;;  %v194_v20 = vmax.f32 %v4705_v1, 0.0 }
 0x214   :  { %v4146_v52 = vpop.eup %4145  ;;  %v648_v54 = vadd.f32 1e-05, %v646_v6 }
 0x215   :  { %v4148_v57 = vpop.eup %4147  ;;  %v303_v59 = vmul.f32 %v4146_v52, %v4562_v21  ;;  %v763_v60 = vadd.f32 1e-05, %v761_v51  ;;  %v760_v63 = vpop.xlane.xlu1 %759  ;;  %v4708_v50 = vadd.f32 %v4699_v14, %v183_v42 }
 0x216   :  { %4159 = vrsqrt.f32 %v648_v54  ;;  %v762_v48 = vmul.f32 0.03125, %v760_v63  ;;  %v873_v4 = vpop.xlane.xlu0 %872  ;;  %v419_v15 = vmul.f32 %v4148_v57, %v4574_v28  ;;  %v4150_v8 = vpop.eup %4149 }
 0x217   :  { %4161 = vrsqrt.f32 %v763_v60  ;;  %v877_v9 = vmul.f32 0.03125, %v873_v4  ;;  %v305_v10 = vmul.f32 %v4693_v36, %v303_v59  ;;  %v193_v12 = vmax.f32 %v4708_v50, 0.0 }
 0x218   :  { %v4152_v11 = vpop.eup %4151  ;;  %v764_v21 = vadd.f32 1e-05, %v762_v48  ;;  %v421_v55 = vmul.f32 %v4693_v36, %v419_v15  ;;  %v304_v28 = vmul.f32 %v4150_v8, %v4556_v22 }
 0x219   :  { %v4154_v16 = vpop.eup %4153  ;;  %v420_v58 = vmul.f32 %v4152_v11, %v4567_v33  ;;  %v879_v18 = vadd.f32 1e-05, %v877_v9  ;;  %v876_v19 = vpop.xlane.xlu1 %875  ;;  %3774 = vmatprep.mubr.msk.f32.mxu0 %vm149_vm2, %v193_v12  ;;  %v4722_v27 = vadd.f32 %v4699_v14, %v305_v10 }
 0x21a   :  { %4163 = vrsqrt.f32 %v764_v21  ;;  %v878_v24 = vmul.f32 0.03125, %v876_v19  ;;  %v989_v26 = vpop.xlane.xlu0 %988  ;;  %v4719_v61 = vadd.f32 %v4699_v14, %v421_v55  ;;  %3775 = vmatmul.mubr.msk.f32.vlgmr.msra.gmra.mrb[10].mxu0 %vm149_vm2, %v194_v20  ;;  %v535_v30 = vmul.f32 %v4154_v16, %v4585_v34 }
 0x21b   :  { %4165 = vrsqrt.f32 %v879_v18  ;;  %v993_v33 = vmul.f32 0.03125, %v989_v26  ;;  %v422_v62 = vmul.f32 %v4693_v36, %v420_v58  ;;  %4002 = vmatpush3.bf16.msra.mxu0 %v4660_v47  ;;  %v306_v41 = vmul.f32 %v4693_v36, %v304_v28 }
 0x21c   :  { %v4156_v22 = vpop.eup %4155  ;;  %v880_v31 = vadd.f32 1e-05, %v878_v24  ;;  %v425_v25 = vmax.f32 %v4719_v61, 0.0  ;;  %4004 = vmatprep.subr.bf16.mxu0 %v4671_v39  ;;  %v309_v45 = vmax.f32 %v4722_v27, 0.0  ;;  %v537_v49 = vmul.f32 %v4693_v36, %v535_v30 }
 0x21d   :  { %v4158_v35 = vpop.eup %4157  ;;  %v995_v0 = vadd.f32 1e-05, %v993_v33  ;;  %v992_v38 = vpop.xlane.xlu1 %991  ;;  %v4733_v2 = vadd.f32 %v4699_v14, %v422_v62  ;;  %v536_v5 = vmul.f32 %v4156_v22, %v4579_v43  ;;  %v4748_v60 = vadd.f32 %v4699_v14, %v306_v41 }
 0x21e   :  { %4167 = vrsqrt.f32 %v880_v31  ;;  %v994_v32 = vmul.f32 0.03125, %v992_v38  ;;  %3796 = vmatprep.mubr.msk.f32.mxu0 %vm149_vm2, %v425_v25  ;;  %v1105_v34 = vpop.xlane.xlu0 %1104  ;;  %v651_v44 = vmul.f32 %v4158_v35, %v4597_v56  ;;  %v1123_v4 = vmax.f32 %v193_v12, %v309_v45 }
 0x21f   :  { %4169 = vrsqrt.f32 %v995_v0  ;;  %v1109_v6 = vmul.f32 0.03125, %v1105_v34  ;;  %4006 = vmatpush3.bf16.msra.mxu0 %v4671_v39  ;;  %v426_v52 = vmax.f32 %v4733_v2, 0.0  ;;  %v538_v48 = vmul.f32 %v4693_v36, %v536_v5 }
 0x220   :  { %v4160_v46 = vpop.eup %4159  ;;  %v996_v51 = vadd.f32 1e-05, %v994_v32  ;;  %v653_v54 = vmul.f32 %v4693_v36, %v651_v44  ;;  %4016 = vmatprep.subr.bf16.mxu0 %v4660_v47  ;;  %v310_v18 = vmax.f32 %v4748_v60, 0.0  ;;  %v1125_v19 = vmax.f32 %v1123_v4, %v425_v25 }
 0x221   :  { %v4162_v42 = vpop.eup %4161  ;;  %v652_v57 = vmul.f32 %v4160_v46, %v4591_v53  ;;  %v1111_v56 = vadd.f32 1e-05, %v1109_v6  ;;  %v1108_v59 = vpop.xlane.xlu1 %1107  ;;  %v4766_v16 = vadd.f32 %v4699_v14, %v538_v48 }
 0x222   :  { %v767_v43 = vmul.f32 %v4162_v42, %v4609_v7  ;;  %4171 = vrsqrt.f32 %v996_v51  ;;  %v1110_v63 = vmul.f32 0.03125, %v1108_v59  ;;  %3797 = vmatmul.mubr.msk.f32.vlgmr.msra.gmra.mrb[12].mxu0 %vm149_vm2, %v426_v52  ;;  %v655_v53 = vadd.f32 %v4699_v14, %v653_v54 }
 0x223   :  { %4173 = vrsqrt.f32 %v1111_v56  ;;  %4018 = vmatpush3.bf16.msra.mxu0 %v4660_v47  ;;  %v4758_v7 = vadd.f32 %v4699_v14, %v537_v49  ;;  %v654_v9 = vmul.f32 %v4693_v36, %v652_v57  ;;  %v542_v30 = vmax.f32 %v4766_v16, 0.0 }
 0x224   :  { %v4164_v50 = vpop.eup %4163  ;;  %v769_v15 = vmul.f32 %v4693_v36, %v767_v43  ;;  %v1112_v8 = vadd.f32 1e-05, %v1110_v63  ;;  %4020 = vmatprep.subr.bf16.mxu0 %v4671_v39  ;;  %v657_v21 = vmax.f32 %v655_v53, 0.0  ;;  %v1124_v25 = vmax.f32 %v194_v20, %v310_v18 }
 0x225   :  { %v4166_v10 = vpop.eup %4165  ;;  %v768_v11 = vmul.f32 %v4164_v50, %v4603_v3  ;;  %v656_v12 = vadd.f32 %v4699_v14, %v654_v9  ;;  %v541_v3 = vmax.f32 %v4758_v7, 0.0 }
 0x226   :  { %4175 = vrsqrt.f32 %v1112_v8  ;;  %v883_v55 = vmul.f32 %v4166_v10, %v4621_v17  ;;  %3818 = vmatprep.mubr.msk.f32.mxu0 %vm149_vm2, %v657_v21  ;;  %v4774_v26 = vadd.f32 %v4699_v14, %v769_v15  ;;  %v1126_v1 = vmax.f32 %v1124_v25, %v426_v52 }
 0x227   :  { %v770_v58 = vmul.f32 %v4693_v36, %v768_v11  ;;  %4022 = vmatpush3.bf16.msra.mxu0 %v4671_v39  ;;  %v658_v24 = vmax.f32 %v656_v12, 0.0 }
 0x228   :  { %v4168_v28 = vpop.eup %4167  ;;  %v885_v17 = vmul.f32 %v4693_v36, %v883_v55  ;;  %4032 = vmatprep.subr.bf16.mxu0 %v4660_v47  ;;  %v773_v0 = vmax.f32 %v4774_v26, 0.0  ;;  %v1128_v49 = vmax.f32 %v1126_v1, %v542_v30 }
 0x229   :  { %v4170_v61 = vpop.eup %4169  ;;  %v884_v33 = vmul.f32 %v4168_v28, %v4615_v13  ;;  %v4783_v31 = vadd.f32 %v4699_v14, %v770_v58 }
 0x22a   :  { %v999_v62 = vmul.f32 %v4170_v61, %v4633_v29  ;;  %v887_v22 = vadd.f32 %v4699_v14, %v885_v17  ;;  %3819 = vmatmul.mubr.msk.f32.vlgmr.msra.gmra.mrb[14].mxu0 %vm149_vm2, %v658_v24  ;;  %v1127_v29 = vmax.f32 %v1125_v19, %v541_v3 }
 0x22b   :  { %v886_v13 = vmul.f32 %v4693_v36, %v884_v33  ;;  %4034 = vmatpush3.bf16.msra.mxu0 %v4660_v47  ;;  %v774_v6 = vmax.f32 %v4783_v31, 0.0 }
 0x22c   :  { %v4172_v35 = vpop.eup %4171  ;;  %v889_v38 = vmax.f32 %v887_v22, 0.0  ;;  %v1001_v2 = vmul.f32 %v4693_v36, %v999_v62  ;;  %4036 = vmatprep.subr.bf16.mxu0 %v4671_v39  ;;  %v1129_v34 = vmax.f32 %v1127_v29, %v657_v21 }
 0x22d   :  { %v4174_v41 = vpop.eup %4173  ;;  %v1000_v32 = vmul.f32 %v4172_v35, %v4627_v23  ;;  %v888_v20 = vadd.f32 %v4699_v14, %v886_v13 }
 0x22e   :  { %3840 = vmatprep.mubr.msk.f32.mxu0 %vm149_vm2, %v889_v38  ;;  %v1115_v44 = vmul.f32 %v4174_v41, %v4645_v40  ;;  %v1003_v5 = vadd.f32 %v4699_v14, %v1001_v2  ;;  %v1131_v52 = vmax.f32 %v1129_v34, %v773_v0  ;;  %v1130_v40 = vmax.f32 %v1128_v49, %v658_v24 }
 0x22f   :  { %v1002_v46 = vmul.f32 %v4693_v36, %v1000_v32  ;;  %v890_v23 = vmax.f32 %v888_v20, 0.0  ;;  %4038 = vmatpush3.bf16.msra.mxu0 %v4671_v39 }
 0x230   :  { %v4176_v51 = vpop.eup %4175  ;;  %v1117_v54 = vmul.f32 %v4693_v36, %v1115_v44  ;;  %v1005_v42 = vmax.f32 %v1003_v5, 0.0  ;;  %4048 = vmatprep.subr.bf16.mxu0 %v4660_v47  ;;  %v1133_v59 = vmax.f32 %v1131_v52, %v889_v38  ;;  %v1132_v63 = vmax.f32 %v1130_v40, %v774_v6 }
 0x231   :  { %v1116_v57 = vmul.f32 %v4176_v51, %v4639_v37  ;;  %v1004_v56 = vadd.f32 %v4699_v14, %v1002_v46 }
 0x232   :  { %v1119_v43 = vadd.f32 %v4699_v14, %v1117_v54  ;;  %3841 = vmatmul.mubr.msk.f32.vlgmr.msra.gmra.mrb[16].mxu0 %vm149_vm2, %v890_v23  ;;  %v1135_v50 = vmax.f32 %v1133_v59, %v1005_v42  ;;  %v1134_v15 = vmax.f32 %v1132_v63, %v890_v23 }
 0x233   :  { %v1118_v48 = vmul.f32 %v4693_v36, %v1116_v57  ;;  %v1006_v4 = vmax.f32 %v1004_v56, 0.0  ;;  %4050 = vmatpush3.bf16.msra.mxu0 %v4660_v47 }
 0x234   :  { %v1121_v53 = vmax.f32 %v1119_v43, 0.0  ;;  %4052 = vmatprep.subr.bf16.mxu0 %v4671_v39 }
 0x235   :  { %v1120_v37 = vadd.f32 %v4699_v14, %v1118_v48  ;;  %v1136_v10 = vmax.f32 %v1134_v15, %v1006_v4 }
 0x236   :  { %3862 = vmatprep.mubr.msk.f32.mxu0 %vm149_vm2, %v1121_v53  ;;  %v1137_v8 = vmax.f32 %v1135_v50, %v1121_v53 }
 0x237   :  { %v1122_v9 = vmax.f32 %v1120_v37, 0.0  ;;  %4054 = vmatpush3.bf16.msra.mxu0 %v4671_v39 }
 0x238   :  { %3763 = vmatprep.mubr.msk.f32.mxu1 %vm149_vm2, %v1137_v8 }
 0x239   :  { %v1138_v36 = vmax.f32 %v1136_v10, %v1122_v9 }
 0x23a   :  { %3863 = vmatmul.mubr.msk.f32.vlgmr.msra.gmra.mrb[18].mxu0 %vm149_vm2, %v1122_v9 }
 0x23b   :  { %3764 = vmatmul.mubr.msk.f32.vlgmr.msra.gmra.mrb[8].mxu1 %vm149_vm2, %v1138_v36 }
 0x23c   :  { %3994 = vmatpush3.bf16.msra.mxu1 %v4660_v47  ;;  %3785 = vmatprep.mubr.msk.f32.mxu1 %vm149_vm2, %v309_v45 }
 0x23d   :  { %3996 = vmatprep.subr.bf16.mxu1 %v4671_v39 }
 0x240   :  { %3998 = vmatpush3.bf16.msra.mxu1 %v4671_v39 }
 0x241   :  { %4008 = vmatprep.subr.bf16.mxu1 %v4660_v47 }
 0x243   :  { %3786 = vmatmul.mubr.msk.f32.vlgmr.msra.gmra.mrb[10].mxu1 %vm149_vm2, %v310_v18 }
 0x244   :  { %4010 = vmatpush3.bf16.msra.mxu1 %v4660_v47  ;;  %3807 = vmatprep.mubr.msk.f32.mxu1 %vm149_vm2, %v541_v3 }
 0x245   :  { %4012 = vmatprep.subr.bf16.mxu1 %v4671_v39 }
 0x248   :  { %4014 = vmatpush3.bf16.msra.mxu1 %v4671_v39 }
 0x249   :  { %4024 = vmatprep.subr.bf16.mxu1 %v4660_v47 }
 0x24b   :  { %3808 = vmatmul.mubr.msk.f32.vlgmr.msra.gmra.mrb[12].mxu1 %vm149_vm2, %v542_v30 }
 0x24c   :  { %4026 = vmatpush3.bf16.msra.mxu1 %v4660_v47  ;;  %3829 = vmatprep.mubr.msk.f32.mxu1 %vm149_vm2, %v773_v0 }
 0x24d   :  { %4028 = vmatprep.subr.bf16.mxu1 %v4671_v39 }
 0x250   :  { %4030 = vmatpush3.bf16.msra.mxu1 %v4671_v39 }
 0x251   :  { %4040 = vmatprep.subr.bf16.mxu1 %v4660_v47 }
 0x253   :  { %3830 = vmatmul.mubr.msk.f32.vlgmr.msra.gmra.mrb[14].mxu1 %vm149_vm2, %v774_v6 }
 0x254   :  { %4042 = vmatpush3.bf16.msra.mxu1 %v4660_v47  ;;  %3851 = vmatprep.mubr.msk.f32.mxu1 %vm149_vm2, %v1005_v42  ;;  %v3517_v47 = vld [vmem:[%s5505_s7] ss:$0 sm:$0xff]  ;;  %s3460_s7 = sshll.u32 %s4276_s4, 4  ;;  %s3461_s7 = int_to_ptr.vmem [resolvable:$true] %s3460_s7 }
 0x255   :  { %4044 = vmatprep.subr.bf16.mxu1 %v4671_v39  ;;  %s4249_s0 = scalar_lea.vmem %s3461_s7, 256  ;;  %p4254_p1 = scmp.lt.s32.totalorder %s3461_s7, %s3461_s7 }
 0x256   :  { %p4250_p0 = scmp.ne.s32.totalorder %s3461_s7, %s4249_s0  ;;  %p4255_p2 = scmp.lt.s32.totalorder %s4249_s0, %s4249_s0 }
 0x258   :  { %4046 = vmatpush3.bf16.msra.mxu1 %v4671_v39  ;;  %p4256_p3 = por %p4255_p2, %p4254_p1 }
 0x25a   :  { %p4257_p4 = pnand %p4256_p3, %p4250_p0 }
 0x25b   :  { %3852 = vmatmul.mubr.msk.f32.vlgmr.msra.gmra.mrb[16].mxu1 %vm149_vm2, %v1006_v4 }
 0x2ed   :  { %v3776_v14 = vpop.f32.mrb[10].mxu0 }
 0x2ee   :  { %v1309_v27 = vpop.f32.mrb[11].mxu0 }
 0x2f5   :  { %v3798_v45 = vpop.f32.mrb[12].mxu0 }
 0x2f6   :  { %v1547_v60 = vpop.f32.mrb[13].mxu0 }
 0x2fd   :  { %v3820_v7 = vpop.f32.mrb[14].mxu0 }
 0x2fe   :  { %v1773_v11 = vpop.f32.mrb[15].mxu0 }
 0x305   :  { %v3842_v21 = vpop.f32.mrb[16].mxu0 }
 0x306   :  { %v1999_v12 = vpop.f32.mrb[17].mxu0 }
 0x30d   :  { %v3864_v55 = vpop.f32.mrb[18].mxu0 }
 0x30e   :  { %v3765_v16 = vpop.f32.mrb[8].mxu1  ;;  %v2225_v58 = vpop.f32.mrb[19].mxu0 }
 0x30f   :  { %v1234_v18 = vadd.f32 %v3765_v16, %v3517_v47  ;;  %v1228_v19 = vpop.f32.mrb[9].mxu1 }
 0x310   :  { %v1229_v39 = vadd.f32 %v3517_v47, %v1228_v19 }
 0x311   :  { %v4856_v28 = vadd.f32 %v3798_v45, %v1234_v18  ;;  %v4858_v3 = vadd.f32 %v3776_v14, %v1234_v18  ;;  %v4860_v24 = vadd.f32 %v3820_v7, %v1234_v18  ;;  %v4862_v26 = vadd.f32 %v3842_v21, %v1234_v18 }
 0x312   :  { %v4864_v17 = vadd.f32 %v1309_v27, %v1229_v39  ;;  %v4866_v61 = vadd.f32 %v1547_v60, %v1229_v39  ;;  %v4868_v33 = vadd.f32 %v1773_v11, %v1229_v39  ;;  %v4870_v62 = vadd.f32 %v1999_v12, %v1229_v39 }
 0x313   :  { %v1559_v22 = vsel %vm149_vm2, %v4856_v28, 0.0  ;;  %v1321_v30 = vsel %vm149_vm2, %v4858_v3, 0.0  ;;  %v4876_v31 = vadd.f32 %v3864_v55, %v1234_v18  ;;  %v4878_v25 = vadd.f32 %v2225_v58, %v1229_v39 }
 0x314   :  { %1560 = vadd.xlane.f32.xlu1 %v1559_v22  ;;  %1322 = vadd.xlane.f32.xlu0 %v1321_v30  ;;  %v1785_v0 = vsel %vm149_vm2, %v4860_v24, 0.0  ;;  %v1318_v38 = vsel %vm149_vm2, %v4864_v17, 0.0  ;;  %v2011_v41 = vsel %vm149_vm2, %v4862_v26, 0.0  ;;  %v1556_v32 = vsel %vm149_vm2, %v4866_v61, 0.0 }
 0x315   :  { %v1782_v5 = vsel %vm149_vm2, %v4868_v33, 0.0  ;;  %v2008_v49 = vsel %vm149_vm2, %v4870_v62, 0.0  ;;  %v2237_v50 = vsel %vm149_vm2, %v4876_v31, 0.0  ;;  %v2234_v15 = vsel %vm149_vm2, %v4878_v25, 0.0 }
 0x316   :  { %v3787_v13 = vpop.f32.mrb[10].mxu1 }
 0x317   :  { %v4880_v35 = vadd.f32 %v3787_v13, %v1234_v18  ;;  %v1434_v29 = vpop.f32.mrb[11].mxu1 }
 0x318   :  { %v4886_v2 = vadd.f32 %v1434_v29, %v1229_v39  ;;  %1786 = vadd.xlane.f32.xlu1 %v1785_v0  ;;  %1319 = vadd.xlane.f32.xlu0 %v1318_v38 }
 0x319   :  { %v1446_v44 = vsel %vm149_vm2, %v4880_v35, 0.0 }
 0x31a   :  { %v1443_v46 = vsel %vm149_vm2, %v4886_v2, 0.0 }
 0x31c   :  { %2012 = vadd.xlane.f32.xlu1 %v2011_v41  ;;  %1557 = vadd.xlane.f32.xlu0 %v1556_v32 }
 0x31e   :  { %v3809_v1 = vpop.f32.mrb[12].mxu1 }
 0x31f   :  { %v4892_v20 = vadd.f32 %v3809_v1, %v1234_v18  ;;  %v1660_v34 = vpop.f32.mrb[13].mxu1 }
 0x320   :  { %v4898_v6 = vadd.f32 %v1660_v34, %v1229_v39  ;;  %1447 = vadd.xlane.f32.xlu1 %v1446_v44  ;;  %1783 = vadd.xlane.f32.xlu0 %v1782_v5 }
 0x321   :  { %v1672_v54 = vsel %vm149_vm2, %v4892_v20, 0.0 }
 0x322   :  { %v1669_v42 = vsel %vm149_vm2, %v4898_v6, 0.0 }
 0x324   :  { %1444 = vadd.xlane.f32.xlu1 %v1443_v46  ;;  %2009 = vadd.xlane.f32.xlu0 %v2008_v49 }
 0x326   :  { %v3831_v23 = vpop.f32.mrb[14].mxu1 }
 0x327   :  { %v4904_v51 = vadd.f32 %v3831_v23, %v1234_v18  ;;  %v1886_v52 = vpop.f32.mrb[15].mxu1 }
 0x328   :  { %v4910_v57 = vadd.f32 %v1886_v52, %v1229_v39  ;;  %1673 = vadd.xlane.f32.xlu1 %v1672_v54  ;;  %1670 = vadd.xlane.f32.xlu0 %v1669_v42 }
 0x329   :  { %v1898_v40 = vsel %vm149_vm2, %v4904_v51, 0.0 }
 0x32a   :  { %v1895_v56 = vsel %vm149_vm2, %v4910_v57, 0.0 }
 0x32c   :  { %1899 = vadd.xlane.f32.xlu1 %v1898_v40  ;;  %1896 = vadd.xlane.f32.xlu0 %v1895_v56 }
 0x32e   :  { %v3853_v59 = vpop.f32.mrb[16].mxu1 }
 0x32f   :  { %v4916_v43 = vadd.f32 %v3853_v59, %v1234_v18  ;;  %v2112_v63 = vpop.f32.mrb[17].mxu1 }
 0x330   :  { %v4918_v48 = vadd.f32 %v2112_v63, %v1229_v39 }
 0x331   :  { %v2124_v4 = vsel %vm149_vm2, %v4916_v43, 0.0 }
 0x332   :  { %2125 = vadd.xlane.f32.xlu1 %v2124_v4  ;;  %v2121_v53 = vsel %vm149_vm2, %v4918_v48, 0.0 }
 0x333   :  { %2122 = vadd.xlane.f32.xlu0 %v2121_v53 }
 0x336   :  { %2238 = vadd.xlane.f32.xlu1 %v2237_v50 }
 0x337   :  { %2235 = vadd.xlane.f32.xlu0 %v2234_v15 }
 0x3a1   :  { %v1561_v37 = vpop.xlane.xlu1 %1560  ;;  %v1323_v8 = vpop.xlane.xlu0 %1322 }
 0x3a2   :  { %v1563_v9 = vmul.f32 0.03125, %v1561_v37  ;;  %v1325_v10 = vmul.f32 0.03125, %v1323_v8 }
 0x3a4   :  { %v4929_v36 = vsub.f32 %v4856_v28, %v1563_v9  ;;  %v4932_v14 = vsub.f32 %v4858_v3, %v1325_v10 }
 0x3a5   :  { %v1787_v27 = vpop.xlane.xlu1 %1786  ;;  %v1320_v45 = vpop.xlane.xlu0 %1319 }
 0x3a6   :  { %v1789_v60 = vmul.f32 0.03125, %v1787_v27  ;;  %v1324_v7 = vmul.f32 0.03125, %v1320_v45  ;;  %v1567_v11 = vmul.f32 %v4929_v36, %v4929_v36  ;;  %v1329_v21 = vmul.f32 %v4932_v14, %v4932_v14 }
 0x3a8   :  { %v4939_v12 = vsub.f32 %v4860_v24, %v1789_v60  ;;  %v4942_v47 = vsub.f32 %v4864_v17, %v1324_v7  ;;  %v1571_v55 = vsel %vm149_vm2, %v1567_v11, 0.0  ;;  %v1333_v16 = vsel %vm149_vm2, %v1329_v21, 0.0 }
 0x3a9   :  { %v2013_v58 = vpop.xlane.xlu1 %2012  ;;  %1572 = vadd.xlane.f32.xlu1 %v1571_v55  ;;  %1334 = vadd.xlane.f32.xlu0 %v1333_v16  ;;  %v1558_v18 = vpop.xlane.xlu0 %1557 }
 0x3aa   :  { %v2015_v19 = vmul.f32 0.03125, %v2013_v58  ;;  %v1562_v39 = vmul.f32 0.03125, %v1558_v18  ;;  %v1793_v28 = vmul.f32 %v4939_v12, %v4939_v12  ;;  %v1328_v3 = vmul.f32 %v4942_v47, %v4942_v47 }
 0x3ac   :  { %v4951_v24 = vsub.f32 %v4862_v26, %v2015_v19  ;;  %v4954_v17 = vsub.f32 %v4866_v61, %v1562_v39  ;;  %v1797_v22 = vsel %vm149_vm2, %v1793_v28, 0.0  ;;  %v1330_v30 = vsel %vm149_vm2, %v1328_v3, 0.0 }
 0x3ad   :  { %v1448_v13 = vpop.xlane.xlu1 %1447  ;;  %1798 = vadd.xlane.f32.xlu1 %v1797_v22  ;;  %1331 = vadd.xlane.f32.xlu0 %v1330_v30  ;;  %v1784_v29 = vpop.xlane.xlu0 %1783 }
 0x3ae   :  { %v1450_v0 = vmul.f32 0.03125, %v1448_v13  ;;  %v1788_v38 = vmul.f32 0.03125, %v1784_v29  ;;  %v2019_v41 = vmul.f32 %v4951_v24, %v4951_v24  ;;  %v1566_v26 = vmul.f32 %v4954_v17, %v4954_v17 }
 0x3b0   :  { %v4963_v32 = vsub.f32 %v4880_v35, %v1450_v0  ;;  %v4966_v61 = vsub.f32 %v4868_v33, %v1788_v38  ;;  %v2023_v1 = vsel %vm149_vm2, %v2019_v41, 0.0  ;;  %v1568_v34 = vsel %vm149_vm2, %v1566_v26, 0.0 }
 0x3b1   :  { %2024 = vadd.xlane.f32.xlu1 %v2023_v1  ;;  %v1445_v44 = vpop.xlane.xlu1 %1444  ;;  %1569 = vadd.xlane.f32.xlu0 %v1568_v34  ;;  %v2010_v5 = vpop.xlane.xlu0 %2009  ;;  %v2283_v34 = vld [vmem:[%s5508_s10 + $0x8] sm:$0xff] }
 0x3b2   :  { %v1449_v46 = vmul.f32 0.03125, %v1445_v44  ;;  %v2014_v49 = vmul.f32 0.03125, %v2010_v5  ;;  %v1454_v23 = vmul.f32 %v4963_v32, %v4963_v32  ;;  %v1792_v35 = vmul.f32 %v4966_v61, %v4966_v61  ;;  %v2284_v5 = vld [vmem:[%s5508_s10 + $0x10] sm:$0xff] }
 0x3b4   :  { %v4975_v52 = vsub.f32 %v4886_v2, %v1449_v46  ;;  %v4978_v33 = vsub.f32 %v4870_v62, %v2014_v49  ;;  %v1458_v54 = vsel %vm149_vm2, %v1454_v23, 0.0  ;;  %v1794_v42 = vsel %vm149_vm2, %v1792_v35, 0.0  ;;  %v2285_v46 = vld [vmem:[%s5508_s10 + $0x18] sm:$0xff]  ;;  %v2286_v23 = vld [vmem:[%s5509_s11] sm:$0xff]  ;;  %v2287_v35 = vld [vmem:[%s5509_s11 + $0x8] sm:$0xff] }
 0x3b5   :  { %1459 = vadd.xlane.f32.xlu1 %v1458_v54  ;;  %v1674_v40 = vpop.xlane.xlu1 %1673  ;;  %1795 = vadd.xlane.f32.xlu0 %v1794_v42  ;;  %v1671_v56 = vpop.xlane.xlu0 %1670  ;;  %v5052_v49 = vpack.c.bf16 %v2285_v46, %v2284_v5  ;;  %v4055_v54 = vpack.c.bf16 %v2287_v35, %v2286_v23  ;;  %v2288_v42 = vld [vmem:[%s5509_s11 + $0x10] sm:$0xff] }
 0x3b6   :  { %v1676_v59 = vmul.f32 0.03125, %v1674_v40  ;;  %v1675_v63 = vmul.f32 0.03125, %v1671_v56  ;;  %v1453_v4 = vmul.f32 %v4975_v52, %v4975_v52  ;;  %v2018_v2 = vmul.f32 %v4978_v33, %v4978_v33  ;;  %v2289_v40 = vld [vmem:[%s5509_s11 + $0x18] sm:$0xff] }
 0x3b7   :  { %4056 = vmatprep.subr.bf16.mxu1 %v4055_v54  ;;  %v4059_v56 = vpack.c.bf16 %v2289_v40, %v2288_v42 }
 0x3b8   :  { %v4987_v53 = vsub.f32 %v4892_v20, %v1676_v59  ;;  %v4990_v62 = vsub.f32 %v4898_v6, %v1675_v63  ;;  %v1455_v50 = vsel %vm149_vm2, %v1453_v4, 0.0  ;;  %v2020_v15 = vsel %vm149_vm2, %v2018_v2, 0.0  ;;  %4058 = vmatpush3.bf16.msra.mxu1 %v4055_v54 }
 0x3b9   :  { %1456 = vadd.xlane.f32.xlu1 %v1455_v50  ;;  %v1900_v37 = vpop.xlane.xlu1 %1899  ;;  %2021 = vadd.xlane.f32.xlu0 %v2020_v15  ;;  %v1897_v8 = vpop.xlane.xlu0 %1896 }
 0x3ba   :  { %v1902_v9 = vmul.f32 0.03125, %v1900_v37  ;;  %v1901_v10 = vmul.f32 0.03125, %v1897_v8  ;;  %v1680_v27 = vmul.f32 %v4987_v53, %v4987_v53  ;;  %v1679_v20 = vmul.f32 %v4990_v62, %v4990_v62  ;;  %4060 = vmatprep.subr.bf16.mxu1 %v4059_v56 }
 0x3bc   :  { %v4999_v45 = vsub.f32 %v4904_v51, %v1902_v9  ;;  %v5002_v6 = vsub.f32 %v4910_v57, %v1901_v10  ;;  %v1684_v60 = vsel %vm149_vm2, %v1680_v27, 0.0  ;;  %v1681_v7 = vsel %vm149_vm2, %v1679_v20, 0.0  ;;  %4062 = vmatpush3.bf16.msra.mxu1 %v4059_v56 }
 0x3bd   :  { %1685 = vadd.xlane.f32.xlu1 %v1684_v60  ;;  %1682 = vadd.xlane.f32.xlu0 %v1681_v7 }
 0x3be   :  { %v1906_v11 = vmul.f32 %v4999_v45, %v4999_v45  ;;  %v1905_v21 = vmul.f32 %v5002_v6, %v5002_v6 }
 0x3bf   :  { %v2126_v55 = vpop.xlane.xlu1 %2125 }
 0x3c0   :  { %v2128_v16 = vmul.f32 0.03125, %v2126_v55  ;;  %v2123_v58 = vpop.xlane.xlu0 %2122  ;;  %v1910_v51 = vsel %vm149_vm2, %v1906_v11, 0.0  ;;  %v1907_v57 = vsel %vm149_vm2, %v1905_v21, 0.0 }
 0x3c1   :  { %v2127_v18 = vmul.f32 0.03125, %v2123_v58  ;;  %1911 = vadd.xlane.f32.xlu1 %v1910_v51  ;;  %1908 = vadd.xlane.f32.xlu0 %v1907_v57 }
 0x3c2   :  { %v5013_v19 = vsub.f32 %v4916_v43, %v2128_v16 }
 0x3c3   :  { %v5016_v39 = vsub.f32 %v4918_v48, %v2127_v18  ;;  %v2239_v28 = vpop.xlane.xlu1 %2238 }
 0x3c4   :  { %v2241_v3 = vmul.f32 0.03125, %v2239_v28  ;;  %v2236_v22 = vpop.xlane.xlu0 %2235  ;;  %v2132_v30 = vmul.f32 %v5013_v19, %v5013_v19 }
 0x3c5   :  { %v2240_v13 = vmul.f32 0.03125, %v2236_v22  ;;  %v2131_v29 = vmul.f32 %v5016_v39, %v5016_v39 }
 0x3c6   :  { %v5023_v0 = vsub.f32 %v4876_v31, %v2241_v3  ;;  %v2136_v38 = vsel %vm149_vm2, %v2132_v30, 0.0 }
 0x3c7   :  { %v5027_v43 = vsub.f32 %v4878_v25, %v2240_v13  ;;  %2137 = vadd.xlane.f32.xlu1 %v2136_v38  ;;  %v2133_v48 = vsel %vm149_vm2, %v2131_v29, 0.0  ;;  %v2282_v25 = vld [vmem:[%s5508_s10] sm:$0xff] }
 0x3c8   :  { %2134 = vadd.xlane.f32.xlu0 %v2133_v48  ;;  %v2245_v41 = vmul.f32 %v5023_v0, %v5023_v0  ;;  %v5042_v44 = vpack.c.bf16 %v2283_v34, %v2282_v25  ;;  %v5074_v29 = vld [vmem:[%s5506_s8] ss:$0 sm:$0xff] }
 0x3c9   :  { %v2244_v26 = vmul.f32 %v5027_v43, %v5027_v43 }
 0x3ca   :  { %v2249_v1 = vsel %vm149_vm2, %v2245_v41, 0.0  ;;  %4064 = vmatprep.subr.bf16.mxu0 %v5042_v44  ;;  %4072 = vmatprep.subr.bf16.mxu1 %v5042_v44 }
 0x3cb   :  { %2250 = vadd.xlane.f32.xlu1 %v2249_v1  ;;  %v2246_v31 = vsel %vm149_vm2, %v2244_v26, 0.0  ;;  %4066 = vmatpush3.bf16.msra.mxu0 %v5042_v44 }
 0x3cc   :  { %2247 = vadd.xlane.f32.xlu0 %v2246_v31  ;;  %4068 = vmatprep.subr.bf16.mxu0 %v5052_v49 }
 0x3cf   :  { %4070 = vmatpush3.bf16.msra.mxu0 %v5052_v49 }
 0x3d0   :  { %4080 = vmatprep.subr.bf16.mxu0 %v5042_v44 }
 0x436   :  { %v1573_v59 = vpop.xlane.xlu1 %1572  ;;  %v1335_v63 = vpop.xlane.xlu0 %1334 }
 0x437   :  { %v1575_v4 = vmul.f32 0.03125, %v1573_v59  ;;  %v1337_v2 = vmul.f32 0.03125, %v1335_v63 }
 0x439   :  { %v1339_v50 = vadd.f32 1e-05, %v1337_v2  ;;  %v1577_v8 = vadd.f32 1e-05, %v1575_v4 }
 0x43a   :  { %v1799_v15 = vpop.xlane.xlu1 %1798  ;;  %v1332_v37 = vpop.xlane.xlu0 %1331 }
 0x43b   :  { %v1336_v9 = vmul.f32 0.03125, %v1332_v37  ;;  %4177 = vrsqrt.f32 %v1339_v50  ;;  %v1801_v27 = vmul.f32 0.03125, %v1799_v15 }
 0x43c   :  { %4179 = vrsqrt.f32 %v1577_v8 }
 0x43d   :  { %v1338_v10 = vadd.f32 1e-05, %v1336_v9  ;;  %v1803_v21 = vadd.f32 1e-05, %v1801_v27 }
 0x43e   :  { %v2025_v20 = vpop.xlane.xlu1 %2024  ;;  %v1570_v60 = vpop.xlane.xlu0 %1569 }
 0x43f   :  { %v1574_v7 = vmul.f32 0.03125, %v1570_v60  ;;  %4181 = vrsqrt.f32 %v1338_v10  ;;  %v2027_v3 = vmul.f32 0.03125, %v2025_v20 }
 0x441   :  { %v1576_v11 = vadd.f32 1e-05, %v1574_v7  ;;  %v2029_v25 = vadd.f32 1e-05, %v2027_v3 }
 0x442   :  { %v1460_v55 = vpop.xlane.xlu1 %1459  ;;  %v1796_v16 = vpop.xlane.xlu0 %1795 }
 0x443   :  { %v1462_v58 = vmul.f32 0.03125, %v1460_v55  ;;  %v1800_v51 = vmul.f32 0.03125, %v1796_v16  ;;  %4183 = vrsqrt.f32 %v1576_v11 }
 0x444   :  { %4185 = vrsqrt.f32 %v1803_v21 }
 0x445   :  { %v1464_v57 = vadd.f32 1e-05, %v1462_v58  ;;  %v1802_v18 = vadd.f32 1e-05, %v1800_v51  ;;  %v4178_v28 = vpop.eup %4177 }
 0x446   :  { %v1457_v22 = vpop.xlane.xlu1 %1456  ;;  %v2022_v30 = vpop.xlane.xlu0 %2021  ;;  %v1343_v13 = vmul.f32 %v4178_v28, %v4932_v14  ;;  %v5080_v14 = vld [vmem:[%s5507_s9] ss:$0 sm:$0xff] }
 0x447   :  { %4187 = vrsqrt.f32 %v1464_v57  ;;  %v1461_v38 = vmul.f32 0.03125, %v1457_v22  ;;  %v2026_v48 = vmul.f32 0.03125, %v2022_v30  ;;  %v4180_v41 = vpop.eup %4179 }
 0x448   :  { %4189 = vrsqrt.f32 %v1802_v18  ;;  %v1351_v46 = vmul.f32 %v5074_v29, %v1343_v13  ;;  %v1581_v42 = vmul.f32 %v4180_v41, %v4929_v36 }
 0x449   :  { %v1463_v26 = vadd.f32 1e-05, %v1461_v38  ;;  %v2028_v1 = vadd.f32 1e-05, %v2026_v48  ;;  %v4182_v31 = vpop.eup %4181 }
 0x44a   :  { %v1686_v34 = vpop.xlane.xlu1 %1685  ;;  %v1683_v5 = vpop.xlane.xlu0 %1682  ;;  %v1342_v54 = vmul.f32 %v4182_v31, %v4942_v47  ;;  %v5086_v50 = vadd.f32 %v5080_v14, %v1351_v46  ;;  %v1583_v60 = vmul.f32 %v5074_v29, %v1581_v42 }
 0x44b   :  { %4191 = vrsqrt.f32 %v1463_v26  ;;  %v1688_v23 = vmul.f32 0.03125, %v1686_v34  ;;  %v1687_v35 = vmul.f32 0.03125, %v1683_v5 }
 0x44c   :  { %4193 = vrsqrt.f32 %v2028_v1  ;;  %v1350_v59 = vmul.f32 %v5074_v29, %v1342_v54  ;;  %v1361_v21 = vmax.f32 %v5086_v50, 0.0  ;;  %v1585_v3 = vadd.f32 %v5080_v14, %v1583_v60 }
 0x44d   :  { %v1690_v40 = vadd.f32 1e-05, %v1688_v23  ;;  %v1689_v56 = vadd.f32 1e-05, %v1687_v35  ;;  %v4184_v63 = vpop.eup %4183  ;;  %4195 = vrsqrt.f32 %v2029_v25 }
 0x44e   :  { %v1912_v4 = vpop.xlane.xlu1 %1911  ;;  %v1909_v2 = vpop.xlane.xlu0 %1908  ;;  %v5089_v8 = vadd.f32 %v5080_v14, %v1350_v59  ;;  %v1580_v36 = vmul.f32 %v4184_v63, %v4954_v17  ;;  %v1587_v35 = vmax.f32 %v1585_v3, 0.0 }
 0x44f   :  { %4197 = vrsqrt.f32 %v1690_v40  ;;  %v1914_v15 = vmul.f32 0.03125, %v1912_v4  ;;  %v1913_v37 = vmul.f32 0.03125, %v1909_v2  ;;  %v4186_v47 = vpop.eup %4185 }
 0x450   :  { %4199 = vrsqrt.f32 %v1689_v56  ;;  %v1360_v20 = vmax.f32 %v5089_v8, 0.0  ;;  %v1582_v55 = vmul.f32 %v5074_v29, %v1580_v36  ;;  %v1807_v57 = vmul.f32 %v4186_v47, %v4939_v12 }
 0x451   :  { %v4188_v9 = vpop.eup %4187  ;;  %v1916_v10 = vadd.f32 1e-05, %v1914_v15  ;;  %v1915_v27 = vadd.f32 1e-05, %v1913_v37 }
 0x452   :  { %v4190_v7 = vpop.eup %4189  ;;  %v1468_v11 = vmul.f32 %v4188_v9, %v4963_v32  ;;  %3884 = vmatprep.mubr.msk.f32.mxu0 %vm149_vm2, %v1360_v20  ;;  %v5104_v51 = vadd.f32 %v5080_v14, %v1582_v55  ;;  %v1809_v56 = vmul.f32 %v5074_v29, %v1807_v57 }
 0x453   :  { %4201 = vrsqrt.f32 %v1916_v10  ;;  %v1806_v17 = vmul.f32 %v4190_v7, %v4966_v61  ;;  %3885 = vmatmul.mubr.msk.f32.vlgmr.msra.gmra.mrb[20].mxu0 %vm149_vm2, %v1361_v21 }
 0x454   :  { %v1470_v16 = vmul.f32 %v5074_v29, %v1468_v11  ;;  %4203 = vrsqrt.f32 %v1915_v27  ;;  %v2138_v58 = vpop.xlane.xlu1 %2137  ;;  %4082 = vmatpush3.bf16.msra.mxu0 %v5042_v44  ;;  %v1586_v48 = vmax.f32 %v5104_v51, 0.0 }
 0x455   :  { %v4192_v32 = vpop.eup %4191  ;;  %v2140_v18 = vmul.f32 0.03125, %v2138_v58  ;;  %v2135_v28 = vpop.xlane.xlu0 %2134  ;;  %v1808_v61 = vmul.f32 %v5074_v29, %v1806_v17  ;;  %4084 = vmatprep.subr.bf16.mxu0 %v5052_v49 }
 0x456   :  { %v4194_v22 = vpop.eup %4193  ;;  %v1467_v30 = vmul.f32 %v4192_v32, %v4975_v52  ;;  %v5112_v13 = vadd.f32 %v5080_v14, %v1470_v16  ;;  %v2139_v38 = vmul.f32 0.03125, %v2135_v28  ;;  %3906 = vmatprep.mubr.msk.f32.mxu0 %vm149_vm2, %v1586_v48 }
 0x457   :  { %v2142_v12 = vadd.f32 1e-05, %v2140_v18  ;;  %v5117_v41 = vadd.f32 %v5080_v14, %v1808_v61  ;;  %v2032_v26 = vmul.f32 %v4194_v22, %v4978_v33  ;;  %v4196_v1 = vpop.eup %4195 }
 0x458   :  { %v1469_v31 = vmul.f32 %v5074_v29, %v1467_v30  ;;  %v1474_v25 = vmax.f32 %v5112_v13, 0.0  ;;  %v2141_v52 = vadd.f32 1e-05, %v2139_v38  ;;  %v2251_v34 = vpop.xlane.xlu1 %2250  ;;  %4086 = vmatpush3.bf16.msra.mxu0 %v5052_v49  ;;  %v2033_v47 = vmul.f32 %v4196_v1, %v4951_v24 }
 0x459   :  { %v4198_v5 = vpop.eup %4197  ;;  %4205 = vrsqrt.f32 %v2142_v12  ;;  %v2253_v46 = vmul.f32 0.03125, %v2251_v34  ;;  %v2248_v23 = vpop.xlane.xlu0 %2247  ;;  %v1812_v54 = vmax.f32 %v5117_v41, 0.0  ;;  %4096 = vmatprep.subr.bf16.mxu0 %v5042_v44  ;;  %v2034_v2 = vmul.f32 %v5074_v29, %v2032_v26 }
 0x45a   :  { %v4200_v42 = vpop.eup %4199  ;;  %v1694_v33 = vmul.f32 %v4198_v5, %v4987_v53  ;;  %v5127_v40 = vadd.f32 %v5080_v14, %v1469_v31  ;;  %4207 = vrsqrt.f32 %v2141_v52  ;;  %v2252_v4 = vmul.f32 0.03125, %v2248_v23 }
 0x45b   :  { %v1693_v59 = vmul.f32 %v4200_v42, %v4990_v62  ;;  %v2255_v63 = vadd.f32 1e-05, %v2253_v46  ;;  %v2267_v53 = vmax.f32 %v1361_v21, %v1474_v25  ;;  %3907 = vmatmul.mubr.msk.f32.vlgmr.msra.gmra.mrb[22].mxu0 %vm149_vm2, %v1587_v35  ;;  %v1811_v24 = vadd.f32 %v5080_v14, %v1809_v56 }
 0x45c   :  { %v1696_v50 = vmul.f32 %v5074_v29, %v1694_v33  ;;  %v1473_v15 = vmax.f32 %v5127_v40, 0.0  ;;  %v2254_v62 = vadd.f32 1e-05, %v2252_v4  ;;  %4098 = vmatpush3.bf16.msra.mxu0 %v5042_v44  ;;  %3928 = vmatprep.mubr.msk.f32.mxu0 %vm149_vm2, %v1812_v54  ;;  %v2036_v21 = vadd.f32 %v5080_v14, %v2034_v2 }
 0x45d   :  { %v4202_v37 = vpop.eup %4201  ;;  %v1695_v36 = vmul.f32 %v5074_v29, %v1693_v59  ;;  %4209 = vrsqrt.f32 %v2255_v63  ;;  %4100 = vmatprep.subr.bf16.mxu0 %v5052_v49  ;;  %v2269_v16 = vmax.f32 %v2267_v53, %v1587_v35  ;;  %v1813_v58 = vmax.f32 %v1811_v24, 0.0 }
 0x45e   :  { %v4204_v9 = vpop.eup %4203  ;;  %v5143_v10 = vadd.f32 %v5080_v14, %v1696_v50  ;;  %v1920_v27 = vmul.f32 %v4202_v37, %v4999_v45  ;;  %v2266_v60 = vmax.f32 %v1360_v20, %v1473_v15  ;;  %4211 = vrsqrt.f32 %v2254_v62 }
 0x45f   :  { %v1919_v7 = vmul.f32 %v4204_v9, %v5002_v6  ;;  %v5154_v11 = vadd.f32 %v5080_v14, %v1695_v36  ;;  %v2035_v32 = vmul.f32 %v5074_v29, %v2033_v47  ;;  %v2038_v3 = vmax.f32 %v2036_v21, 0.0 }
 0x460   :  { %v1700_v55 = vmax.f32 %v5143_v10, 0.0  ;;  %v1922_v45 = vmul.f32 %v5074_v29, %v1920_v27  ;;  %v2268_v17 = vmax.f32 %v2266_v60, %v1586_v48  ;;  %4102 = vmatpush3.bf16.msra.mxu0 %v5052_v49 }
 0x461   :  { %v1921_v8 = vmul.f32 %v5074_v29, %v1919_v7  ;;  %v1699_v20 = vmax.f32 %v5154_v11, 0.0  ;;  %4112 = vmatprep.subr.bf16.mxu0 %v5042_v44 }
 0x462   :  { %v5163_v6 = vadd.f32 %v5080_v14, %v1922_v45  ;;  %v2271_v51 = vmax.f32 %v2269_v16, %v1700_v55 }
 0x463   :  { %v4206_v57 = vpop.eup %4205  ;;  %v2270_v18 = vmax.f32 %v2268_v17, %v1699_v20  ;;  %v5172_v28 = vadd.f32 %v5080_v14, %v1921_v8  ;;  %3929 = vmatmul.mubr.msk.f32.vlgmr.msra.gmra.mrb[24].mxu0 %vm149_vm2, %v1813_v58 }
 0x464   :  { %v4208_v61 = vpop.eup %4207  ;;  %v2146_v22 = vmul.f32 %v4206_v57, %v5013_v19  ;;  %v1926_v30 = vmax.f32 %v5163_v6, 0.0  ;;  %v2273_v48 = vmax.f32 %v2271_v51, %v1813_v58  ;;  %4114 = vmatpush3.bf16.msra.mxu0 %v5042_v44  ;;  %3950 = vmatprep.mubr.msk.f32.mxu0 %vm149_vm2, %v2038_v3  ;;  %v2037_v19 = vadd.f32 %v5080_v14, %v2035_v32 }
 0x465   :  { %v2145_v38 = vmul.f32 %v4208_v61, %v5016_v39  ;;  %v2272_v41 = vmax.f32 %v2270_v18, %v1812_v54  ;;  %v1925_v26 = vmax.f32 %v5172_v28, 0.0  ;;  %4116 = vmatprep.subr.bf16.mxu0 %v5052_v49 }
 0x466   :  { %v2148_v12 = vmul.f32 %v5074_v29, %v2146_v22  ;;  %v2275_v34 = vmax.f32 %v2273_v48, %v1926_v30  ;;  %v2039_v35 = vmax.f32 %v2037_v19, 0.0 }
 0x467   :  { %v4210_v1 = vpop.eup %4209  ;;  %v2147_v31 = vmul.f32 %v5074_v29, %v2145_v38  ;;  %v2274_v23 = vmax.f32 %v2272_v41, %v1925_v26 }
 0x468   :  { %v2259_v52 = vmul.f32 %v4210_v1, %v5023_v0  ;;  %v4212_v39 = vpop.eup %4211  ;;  %4118 = vmatpush3.bf16.msra.mxu0 %v5052_v49  ;;  %v2150_v46 = vadd.f32 %v5080_v14, %v2148_v12  ;;  %v2277_v59 = vmax.f32 %v2275_v34, %v2039_v35 }
 0x469   :  { %v2149_v5 = vadd.f32 %v5080_v14, %v2147_v31  ;;  %4128 = vmatprep.subr.bf16.mxu0 %v5042_v44  ;;  %v2258_v54 = vmul.f32 %v4212_v39, %v5027_v43  ;;  %v2276_v4 = vmax.f32 %v2274_v23, %v2038_v3 }
 0x46a   :  { %v2261_v42 = vmul.f32 %v5074_v29, %v2259_v52  ;;  %v2152_v63 = vmax.f32 %v2150_v46, 0.0 }
 0x46b   :  { %3951 = vmatmul.mubr.msk.f32.vlgmr.msra.gmra.mrb[26].mxu0 %vm149_vm2, %v2039_v35  ;;  %v2260_v0 = vmul.f32 %v5074_v29, %v2258_v54  ;;  %v2151_v33 = vmax.f32 %v2149_v5, 0.0 }
 0x46c   :  { %v2263_v56 = vadd.f32 %v5080_v14, %v2261_v42  ;;  %4130 = vmatpush3.bf16.msra.mxu0 %v5042_v44  ;;  %v2279_v37 = vmax.f32 %v2277_v59, %v2152_v63 }
 0x46d   :  { %4132 = vmatprep.subr.bf16.mxu0 %v5052_v49  ;;  %v2262_v2 = vadd.f32 %v5080_v14, %v2260_v0  ;;  %v2278_v53 = vmax.f32 %v2276_v4, %v2151_v33 }
 0x46e   :  { %v2265_v50 = vmax.f32 %v2263_v56, 0.0 }
 0x46f   :  { %v2264_v43 = vmax.f32 %v2262_v2, 0.0 }
 0x470   :  { %4134 = vmatpush3.bf16.msra.mxu0 %v5052_v49  ;;  %v2281_v47 = vmax.f32 %v2279_v37, %v2265_v50 }
 0x471   :  { %3972 = vmatprep.mubr.msk.f32.mxu0 %vm149_vm2, %v2264_v43  ;;  %v2280_v29 = vmax.f32 %v2278_v53, %v2264_v43 }
 0x473   :  { %3873 = vmatprep.mubr.msk.f32.mxu1 %vm149_vm2, %v2280_v29  ;;  %3973 = vmatmul.mubr.msk.f32.vlgmr.msra.gmra.mrb[28].mxu0 %vm149_vm2, %v2265_v50 }
 0x474   :  { %3874 = vmatmul.mubr.msk.f32.vlgmr.msra.gmra.mrb[18].mxu1 %vm149_vm2, %v2281_v47 }
 0x475   :  { %4074 = vmatpush3.bf16.msra.mxu1 %v5042_v44  ;;  %3895 = vmatprep.mubr.msk.f32.mxu1 %vm149_vm2, %v1473_v15 }
 0x476   :  { %4076 = vmatprep.subr.bf16.mxu1 %v5052_v49 }
 0x479   :  { %4078 = vmatpush3.bf16.msra.mxu1 %v5052_v49 }
 0x47a   :  { %4088 = vmatprep.subr.bf16.mxu1 %v5042_v44 }
 0x47c   :  { %3896 = vmatmul.mubr.msk.f32.vlgmr.msra.gmra.mrb[20].mxu1 %vm149_vm2, %v1474_v25 }
 0x47d   :  { %4090 = vmatpush3.bf16.msra.mxu1 %v5042_v44  ;;  %3917 = vmatprep.mubr.msk.f32.mxu1 %vm149_vm2, %v1699_v20 }
 0x47e   :  { %4092 = vmatprep.subr.bf16.mxu1 %v5052_v49 }
 0x481   :  { %4094 = vmatpush3.bf16.msra.mxu1 %v5052_v49 }
 0x482   :  { %4104 = vmatprep.subr.bf16.mxu1 %v5042_v44 }
 0x484   :  { %3918 = vmatmul.mubr.msk.f32.vlgmr.msra.gmra.mrb[22].mxu1 %vm149_vm2, %v1700_v55 }
 0x485   :  { %4106 = vmatpush3.bf16.msra.mxu1 %v5042_v44  ;;  %3939 = vmatprep.mubr.msk.f32.mxu1 %vm149_vm2, %v1925_v26 }
 0x486   :  { %4108 = vmatprep.subr.bf16.mxu1 %v5052_v49 }
 0x489   :  { %4110 = vmatpush3.bf16.msra.mxu1 %v5052_v49 }
 0x48a   :  { %4120 = vmatprep.subr.bf16.mxu1 %v5042_v44 }
 0x48c   :  { %3940 = vmatmul.mubr.msk.f32.vlgmr.msra.gmra.mrb[24].mxu1 %vm149_vm2, %v1926_v30 }
 0x48d   :  { %4122 = vmatpush3.bf16.msra.mxu1 %v5042_v44  ;;  %3961 = vmatprep.mubr.msk.f32.mxu1 %vm149_vm2, %v2151_v33  ;;  %v3540_v44 = vld [vmem:[%s5510_s12] ss:$0 sm:$0xff] }
 0x48e   :  { %4124 = vmatprep.subr.bf16.mxu1 %v5052_v49 }
 0x491   :  { %4126 = vmatpush3.bf16.msra.mxu1 %v5052_v49 }
 0x494   :  { %3962 = vmatmul.mubr.msk.f32.vlgmr.msra.gmra.mrb[26].mxu1 %vm149_vm2, %v2152_v63 }
 0x526   :  { %v3886_v14 = vpop.f32.mrb[20].mxu0 }
 0x527   :  { %v2452_v13 = vpop.f32.mrb[21].mxu0 }
 0x52e   :  { %v3908_v25 = vpop.f32.mrb[22].mxu0 }
 0x52f   :  { %v2690_v40 = vpop.f32.mrb[23].mxu0 }
 0x536   :  { %v3930_v15 = vpop.f32.mrb[24].mxu0 }
 0x537   :  { %v2916_v36 = vpop.f32.mrb[25].mxu0 }
 0x53e   :  { %v3952_v62 = vpop.f32.mrb[26].mxu0 }
 0x53f   :  { %v3142_v9 = vpop.f32.mrb[27].mxu0 }
 0x546   :  { %v3974_v10 = vpop.f32.mrb[28].mxu0 }
 0x547   :  { %v3875_v27 = vpop.f32.mrb[18].mxu1  ;;  %v3368_v60 = vpop.f32.mrb[29].mxu0 }
 0x548   :  { %v2377_v24 = vadd.f32 %v3875_v27, %v3540_v44  ;;  %v2371_v7 = vpop.f32.mrb[19].mxu1 }
 0x549   :  { %v2372_v49 = vadd.f32 %v3540_v44, %v2371_v7 }
 0x54a   :  { %v5237_v11 = vadd.f32 %v3886_v14, %v2377_v24  ;;  %v5239_v21 = vadd.f32 %v3908_v25, %v2377_v24  ;;  %v5241_v55 = vadd.f32 %v3930_v15, %v2377_v24  ;;  %v5243_v45 = vadd.f32 %v3952_v62, %v2377_v24 }
 0x54b   :  { %v5245_v17 = vadd.f32 %v2452_v13, %v2372_v49  ;;  %v5247_v16 = vadd.f32 %v2690_v40, %v2372_v49  ;;  %v5249_v8 = vadd.f32 %v2916_v36, %v2372_v49  ;;  %v5251_v20 = vadd.f32 %v3142_v9, %v2372_v49 }
 0x54c   :  { %v2464_v6 = vsel %vm149_vm2, %v5237_v11, 0.0  ;;  %v5257_v51 = vadd.f32 %v3974_v10, %v2377_v24  ;;  %v5259_v32 = vadd.f32 %v3368_v60, %v2372_v49  ;;  %v2702_v3 = vsel %vm149_vm2, %v5239_v21, 0.0 }
 0x54d   :  { %2465 = vadd.xlane.f32.xlu1 %v2464_v6  ;;  %v2461_v58 = vsel %vm149_vm2, %v5245_v17, 0.0  ;;  %v2699_v22 = vsel %vm149_vm2, %v5247_v16, 0.0  ;;  %v2928_v30 = vsel %vm149_vm2, %v5241_v55, 0.0  ;;  %v2925_v38 = vsel %vm149_vm2, %v5249_v8, 0.0 }
 0x54e   :  { %2462 = vadd.xlane.f32.xlu0 %v2461_v58  ;;  %v3154_v26 = vsel %vm149_vm2, %v5243_v45, 0.0  ;;  %v3151_v1 = vsel %vm149_vm2, %v5251_v20, 0.0  ;;  %v3380_v2 = vsel %vm149_vm2, %v5257_v51, 0.0  ;;  %v3377_v50 = vsel %vm149_vm2, %v5259_v32, 0.0 }
 0x54f   :  { %v3897_v57 = vpop.f32.mrb[20].mxu1 }
 0x550   :  { %v5261_v18 = vadd.f32 %v3897_v57, %v2377_v24  ;;  %v2577_v28 = vpop.f32.mrb[21].mxu1 }
 0x551   :  { %v5265_v61 = vadd.f32 %v2577_v28, %v2372_v49  ;;  %2703 = vadd.xlane.f32.xlu1 %v2702_v3 }
 0x552   :  { %2700 = vadd.xlane.f32.xlu0 %v2699_v22  ;;  %v2589_v31 = vsel %vm149_vm2, %v5261_v18, 0.0 }
 0x553   :  { %v2586_v52 = vsel %vm149_vm2, %v5265_v61, 0.0 }
 0x555   :  { %2929 = vadd.xlane.f32.xlu1 %v2928_v30 }
 0x556   :  { %2926 = vadd.xlane.f32.xlu0 %v2925_v38 }
 0x557   :  { %v3919_v48 = vpop.f32.mrb[22].mxu1 }
 0x558   :  { %v5273_v12 = vadd.f32 %v3919_v48, %v2377_v24  ;;  %v2803_v41 = vpop.f32.mrb[23].mxu1 }
 0x559   :  { %v5277_v19 = vadd.f32 %v2803_v41, %v2372_v49  ;;  %3155 = vadd.xlane.f32.xlu1 %v3154_v26 }
 0x55a   :  { %3152 = vadd.xlane.f32.xlu0 %v3151_v1  ;;  %v2815_v46 = vsel %vm149_vm2, %v5273_v12, 0.0 }
 0x55b   :  { %v2812_v35 = vsel %vm149_vm2, %v5277_v19, 0.0 }
 0x55d   :  { %2590 = vadd.xlane.f32.xlu1 %v2589_v31 }
 0x55e   :  { %2587 = vadd.xlane.f32.xlu0 %v2586_v52 }
 0x55f   :  { %v3941_v39 = vpop.f32.mrb[24].mxu1 }
 0x560   :  { %v5285_v34 = vadd.f32 %v3941_v39, %v2377_v24  ;;  %v3029_v5 = vpop.f32.mrb[25].mxu1 }
 0x561   :  { %v5289_v23 = vadd.f32 %v3029_v5, %v2372_v49  ;;  %2816 = vadd.xlane.f32.xlu1 %v2815_v46 }
 0x562   :  { %2813 = vadd.xlane.f32.xlu0 %v2812_v35  ;;  %v3041_v54 = vsel %vm149_vm2, %v5285_v34, 0.0 }
 0x563   :  { %v3038_v42 = vsel %vm149_vm2, %v5289_v23, 0.0 }
 0x565   :  { %3042 = vadd.xlane.f32.xlu1 %v3041_v54 }
 0x566   :  { %3039 = vadd.xlane.f32.xlu0 %v3038_v42 }
 0x567   :  { %v3963_v0 = vpop.f32.mrb[26].mxu1 }
 0x568   :  { %v5297_v33 = vadd.f32 %v3963_v0, %v2377_v24  ;;  %v3255_v56 = vpop.f32.mrb[27].mxu1 }
 0x569   :  { %v5299_v59 = vadd.f32 %v3255_v56, %v2372_v49 }
 0x56a   :  { %v3267_v63 = vsel %vm149_vm2, %v5297_v33, 0.0 }
 0x56b   :  { %3268 = vadd.xlane.f32.xlu1 %v3267_v63  ;;  %v3264_v4 = vsel %vm149_vm2, %v5299_v59, 0.0 }
 0x56c   :  { %3265 = vadd.xlane.f32.xlu0 %v3264_v4 }
 0x56f   :  { %3381 = vadd.xlane.f32.xlu1 %v3380_v2 }
 0x570   :  { %3378 = vadd.xlane.f32.xlu0 %v3377_v50 }
 0x5da   :  { %v2466_v43 = vpop.xlane.xlu1 %2465 }
 0x5db   :  { %v2468_v53 = vmul.f32 0.03125, %v2466_v43  ;;  %v2463_v37 = vpop.xlane.xlu0 %2462 }
 0x5dc   :  { %v2467_v29 = vmul.f32 0.03125, %v2463_v37 }
 0x5dd   :  { %v5310_v47 = vsub.f32 %v5237_v11, %v2468_v53 }
 0x5de   :  { %v5313_v14 = vsub.f32 %v5245_v17, %v2467_v29  ;;  %v2704_v13 = vpop.xlane.xlu1 %2703 }
 0x5df   :  { %v2706_v25 = vmul.f32 0.03125, %v2704_v13  ;;  %v2701_v40 = vpop.xlane.xlu0 %2700  ;;  %v2472_v15 = vmul.f32 %v5310_v47, %v5310_v47 }
 0x5e0   :  { %v2705_v36 = vmul.f32 0.03125, %v2701_v40  ;;  %v2471_v62 = vmul.f32 %v5313_v14, %v5313_v14 }
 0x5e1   :  { %v5320_v9 = vsub.f32 %v5239_v21, %v2706_v25  ;;  %v2476_v44 = vsel %vm149_vm2, %v2472_v15, 0.0 }
 0x5e2   :  { %v5324_v10 = vsub.f32 %v5247_v16, %v2705_v36  ;;  %v2930_v27 = vpop.xlane.xlu1 %2929  ;;  %2477 = vadd.xlane.f32.xlu1 %v2476_v44  ;;  %v2473_v60 = vsel %vm149_vm2, %v2471_v62, 0.0 }
 0x5e3   :  { %v2932_v24 = vmul.f32 0.03125, %v2930_v27  ;;  %2474 = vadd.xlane.f32.xlu0 %v2473_v60  ;;  %v2927_v7 = vpop.xlane.xlu0 %2926  ;;  %v2710_v49 = vmul.f32 %v5320_v9, %v5320_v9 }
 0x5e4   :  { %v2931_v11 = vmul.f32 0.03125, %v2927_v7  ;;  %v2709_v21 = vmul.f32 %v5324_v10, %v5324_v10 }
 0x5e5   :  { %v5332_v17 = vsub.f32 %v5241_v55, %v2932_v24  ;;  %v2714_v16 = vsel %vm149_vm2, %v2710_v49, 0.0 }
 0x5e6   :  { %v5336_v6 = vsub.f32 %v5249_v8, %v2931_v11  ;;  %v3156_v58 = vpop.xlane.xlu1 %3155  ;;  %2715 = vadd.xlane.f32.xlu1 %v2714_v16  ;;  %v2711_v57 = vsel %vm149_vm2, %v2709_v21, 0.0 }
 0x5e7   :  { %v3158_v28 = vmul.f32 0.03125, %v3156_v58  ;;  %2712 = vadd.xlane.f32.xlu0 %v2711_v57  ;;  %v3153_v3 = vpop.xlane.xlu0 %3152  ;;  %v2936_v22 = vmul.f32 %v5332_v17, %v5332_v17 }
 0x5e8   :  { %v3157_v30 = vmul.f32 0.03125, %v3153_v3  ;;  %v2935_v55 = vmul.f32 %v5336_v6, %v5336_v6 }
 0x5e9   :  { %v5344_v38 = vsub.f32 %v5243_v45, %v3158_v28  ;;  %v2940_v8 = vsel %vm149_vm2, %v2936_v22, 0.0 }
 0x5ea   :  { %v5348_v48 = vsub.f32 %v5251_v20, %v3157_v30  ;;  %v2591_v41 = vpop.xlane.xlu1 %2590  ;;  %2941 = vadd.xlane.f32.xlu1 %v2940_v8  ;;  %v2937_v26 = vsel %vm149_vm2, %v2935_v55, 0.0 }
 0x5eb   :  { %v2593_v1 = vmul.f32 0.03125, %v2591_v41  ;;  %2938 = vadd.xlane.f32.xlu0 %v2937_v26  ;;  %v2588_v31 = vpop.xlane.xlu0 %2587  ;;  %v3162_v52 = vmul.f32 %v5344_v38, %v5344_v38 }
 0x5ec   :  { %v2592_v39 = vmul.f32 0.03125, %v2588_v31  ;;  %v3161_v45 = vmul.f32 %v5348_v48, %v5348_v48 }
 0x5ed   :  { %v5356_v5 = vsub.f32 %v5261_v18, %v2593_v1  ;;  %v3166_v20 = vsel %vm149_vm2, %v3162_v52, 0.0 }
 0x5ee   :  { %v5360_v46 = vsub.f32 %v5265_v61, %v2592_v39  ;;  %v2817_v35 = vpop.xlane.xlu1 %2816  ;;  %3167 = vadd.xlane.f32.xlu1 %v3166_v20  ;;  %v3163_v54 = vsel %vm149_vm2, %v3161_v45, 0.0 }
 0x5ef   :  { %v2819_v42 = vmul.f32 0.03125, %v2817_v35  ;;  %3164 = vadd.xlane.f32.xlu0 %v3163_v54  ;;  %v2814_v0 = vpop.xlane.xlu0 %2813  ;;  %v2597_v56 = vmul.f32 %v5356_v5, %v5356_v5 }
 0x5f0   :  { %v2818_v63 = vmul.f32 0.03125, %v2814_v0  ;;  %v2596_v18 = vmul.f32 %v5360_v46, %v5360_v46 }
 0x5f1   :  { %v5368_v4 = vsub.f32 %v5273_v12, %v2819_v42  ;;  %v2601_v61 = vsel %vm149_vm2, %v2597_v56, 0.0 }
 0x5f2   :  { %v5372_v2 = vsub.f32 %v5277_v19, %v2818_v63  ;;  %v3043_v50 = vpop.xlane.xlu1 %3042  ;;  %2602 = vadd.xlane.f32.xlu1 %v2601_v61  ;;  %v2598_v43 = vsel %vm149_vm2, %v2596_v18, 0.0 }
 0x5f3   :  { %v3045_v53 = vmul.f32 0.03125, %v3043_v50  ;;  %2599 = vadd.xlane.f32.xlu0 %v2598_v43  ;;  %v3040_v37 = vpop.xlane.xlu0 %3039  ;;  %v2823_v29 = vmul.f32 %v5368_v4, %v5368_v4 }
 0x5f4   :  { %v3044_v13 = vmul.f32 0.03125, %v3040_v37  ;;  %v2822_v12 = vmul.f32 %v5372_v2, %v5372_v2 }
 0x5f5   :  { %v5380_v25 = vsub.f32 %v5285_v34, %v3045_v53  ;;  %v2827_v19 = vsel %vm149_vm2, %v2823_v29, 0.0 }
 0x5f6   :  { %v5384_v40 = vsub.f32 %v5289_v23, %v3044_v13  ;;  %2828 = vadd.xlane.f32.xlu1 %v2827_v19  ;;  %v2824_v15 = vsel %vm149_vm2, %v2822_v12, 0.0 }
 0x5f7   :  { %2825 = vadd.xlane.f32.xlu0 %v2824_v15  ;;  %v3049_v36 = vmul.f32 %v5380_v25, %v5380_v25 }
 0x5f8   :  { %v3269_v62 = vpop.xlane.xlu1 %3268  ;;  %v3048_v44 = vmul.f32 %v5384_v40, %v5384_v40 }
 0x5f9   :  { %v3271_v27 = vmul.f32 0.03125, %v3269_v62  ;;  %v3266_v60 = vpop.xlane.xlu0 %3265  ;;  %v3053_v34 = vsel %vm149_vm2, %v3049_v36, 0.0 }
 0x5fa   :  { %v3270_v24 = vmul.f32 0.03125, %v3266_v60  ;;  %3054 = vadd.xlane.f32.xlu1 %v3053_v34  ;;  %v3050_v23 = vsel %vm149_vm2, %v3048_v44, 0.0 }
 0x5fb   :  { %v5394_v7 = vsub.f32 %v5297_v33, %v3271_v27  ;;  %3051 = vadd.xlane.f32.xlu0 %v3050_v23 }
 0x5fc   :  { %v5397_v49 = vsub.f32 %v5299_v59, %v3270_v24  ;;  %v3382_v11 = vpop.xlane.xlu1 %3381 }
 0x5fd   :  { %v3384_v21 = vmul.f32 0.03125, %v3382_v11  ;;  %v3379_v16 = vpop.xlane.xlu0 %3378  ;;  %v3275_v58 = vmul.f32 %v5394_v7, %v5394_v7 }
 0x5fe   :  { %v3383_v57 = vmul.f32 0.03125, %v3379_v16  ;;  %v3274_v28 = vmul.f32 %v5397_v49, %v5397_v49  ;;  %v5421_v16 = vld [vmem:[%s5511_s13] ss:$0 sm:$0xff] }
 0x5ff   :  { %v5404_v3 = vsub.f32 %v5257_v51, %v3384_v21  ;;  %v3279_v33 = vsel %vm149_vm2, %v3275_v58, 0.0 }
 0x600   :  { %v5408_v22 = vsub.f32 %v5259_v32, %v3383_v57  ;;  %3280 = vadd.xlane.f32.xlu1 %v3279_v33  ;;  %v3276_v59 = vsel %vm149_vm2, %v3274_v28, 0.0 }
 0x601   :  { %3277 = vadd.xlane.f32.xlu0 %v3276_v59  ;;  %v3388_v30 = vmul.f32 %v5404_v3, %v5404_v3 }
 0x602   :  { %v3387_v55 = vmul.f32 %v5408_v22, %v5408_v22 }
 0x603   :  { %v3392_v8 = vsel %vm149_vm2, %v3388_v30, 0.0 }
 0x604   :  { %3393 = vadd.xlane.f32.xlu1 %v3392_v8  ;;  %v3389_v51 = vsel %vm149_vm2, %v3387_v55, 0.0 }
 0x605   :  { %3390 = vadd.xlane.f32.xlu0 %v3389_v51 }
 0x66f   :  { %v2478_v41 = vpop.xlane.xlu1 %2477 }
 0x670   :  { %v2480_v26 = vmul.f32 0.03125, %v2478_v41  ;;  %v2475_v32 = vpop.xlane.xlu0 %2474 }
 0x671   :  { %v2479_v1 = vmul.f32 0.03125, %v2475_v32 }
 0x672   :  { %v2482_v31 = vadd.f32 1e-05, %v2480_v26 }
 0x673   :  { %v2481_v52 = vadd.f32 1e-05, %v2479_v1  ;;  %v2716_v39 = vpop.xlane.xlu1 %2715 }
 0x674   :  { %v2718_v45 = vmul.f32 0.03125, %v2716_v39  ;;  %v2713_v20 = vpop.xlane.xlu0 %2712  ;;  %4213 = vrsqrt.f32 %v2482_v31 }
 0x675   :  { %v2717_v35 = vmul.f32 0.03125, %v2713_v20  ;;  %4215 = vrsqrt.f32 %v2481_v52 }
 0x676   :  { %v2720_v54 = vadd.f32 1e-05, %v2718_v45 }
 0x677   :  { %v2719_v42 = vadd.f32 1e-05, %v2717_v35  ;;  %v2942_v0 = vpop.xlane.xlu1 %2941 }
 0x678   :  { %4217 = vrsqrt.f32 %v2720_v54  ;;  %v2944_v56 = vmul.f32 0.03125, %v2942_v0  ;;  %v2939_v63 = vpop.xlane.xlu0 %2938 }
 0x679   :  { %4219 = vrsqrt.f32 %v2719_v42  ;;  %v2943_v18 = vmul.f32 0.03125, %v2939_v63 }
 0x67a   :  { %v2946_v61 = vadd.f32 1e-05, %v2944_v56 }
 0x67b   :  { %v3168_v50 = vpop.xlane.xlu1 %3167  ;;  %v2945_v53 = vadd.f32 1e-05, %v2943_v18 }
 0x67c   :  { %v3165_v43 = vpop.xlane.xlu0 %3164  ;;  %v3170_v37 = vmul.f32 0.03125, %v3168_v50  ;;  %4221 = vrsqrt.f32 %v2946_v61 }
 0x67d   :  { %v3169_v29 = vmul.f32 0.03125, %v3165_v43  ;;  %4223 = vrsqrt.f32 %v2945_v53 }
 0x67e   :  { %v4214_v12 = vpop.eup %4213  ;;  %v3172_v27 = vadd.f32 1e-05, %v3170_v37 }
 0x67f   :  { %v2603_v13 = vpop.xlane.xlu1 %2602  ;;  %v4216_v36 = vpop.eup %4215  ;;  %v2486_v24 = vmul.f32 %v4214_v12, %v5310_v47  ;;  %v3171_v23 = vadd.f32 1e-05, %v3169_v29 }
 0x680   :  { %v2605_v19 = vmul.f32 0.03125, %v2603_v13  ;;  %v2600_v15 = vpop.xlane.xlu0 %2599  ;;  %v2485_v58 = vmul.f32 %v4216_v36, %v5313_v14  ;;  %v5430_v14 = vld [vmem:[%s5512_s14] ss:$0 sm:$0xff]  ;;  %s4273_s14 = smov 32  }
 0x681   :  { %v2604_v62 = vmul.f32 0.03125, %v2600_v15  ;;  %v2494_v55 = vmul.f32 %v5421_v16, %v2486_v24 }
 0x682   :  { %v4218_v44 = vpop.eup %4217  ;;  %v2607_v60 = vadd.f32 1e-05, %v2605_v19  ;;  %v2493_v41 = vmul.f32 %v5421_v16, %v2485_v58 }
 0x683   :  { %v4220_v34 = vpop.eup %4219  ;;  %v2606_v11 = vadd.f32 1e-05, %v2604_v62  ;;  %v2829_v21 = vpop.xlane.xlu1 %2828  ;;  %v2724_v33 = vmul.f32 %v4218_v44, %v5320_v9  ;;  %v2502_v45 = vadd.f32 %v5430_v14, %v2494_v55 }
 0x684   :  { %4225 = vrsqrt.f32 %v2607_v60  ;;  %v2831_v57 = vmul.f32 0.03125, %v2829_v21  ;;  %v2826_v28 = vpop.xlane.xlu0 %2825  ;;  %v2723_v59 = vmul.f32 %v4220_v34, %v5324_v10  ;;  %v2501_v35 = vadd.f32 %v5430_v14, %v2493_v41 }
 0x685   :  { %4227 = vrsqrt.f32 %v2606_v11  ;;  %v2830_v30 = vmul.f32 0.03125, %v2826_v28  ;;  %v2726_v32 = vmul.f32 %v5421_v16, %v2724_v33  ;;  %v2504_v53 = vmax.f32 %v2502_v45, 0.0 }
 0x686   :  { %4229 = vrsqrt.f32 %v3172_v27  ;;  %v2833_v47 = vadd.f32 1e-05, %v2831_v57  ;;  %v4222_v10 = vpop.eup %4221  ;;  %v2725_v1 = vmul.f32 %v5421_v16, %v2723_v59 }
 0x687   :  { %4231 = vrsqrt.f32 %v3171_v23  ;;  %v2832_v8 = vadd.f32 1e-05, %v2830_v30  ;;  %v3055_v51 = vpop.xlane.xlu1 %3054  ;;  %v4224_v39 = vpop.eup %4223  ;;  %v2950_v54 = vmul.f32 %v4222_v10, %v5332_v17  ;;  %v2728_v42 = vadd.f32 %v5430_v14, %v2726_v32 }
 0x688   :  { %4233 = vrsqrt.f32 %v2833_v47  ;;  %v3057_v9 = vmul.f32 0.03125, %v3055_v51  ;;  %v3052_v26 = vpop.xlane.xlu0 %3051  ;;  %v5440_v0 = vadd.f32 %v5430_v14, %v2725_v1  ;;  %v2949_v18 = vmul.f32 %v4224_v39, %v5336_v6 }
 0x689   :  { %4235 = vrsqrt.f32 %v2832_v8  ;;  %v3056_v31 = vmul.f32 0.03125, %v3052_v26  ;;  %v2503_v17 = vmax.f32 %v2501_v35, 0.0  ;;  %v2952_v12 = vmul.f32 %v5421_v16, %v2950_v54 }
 0x68a   :  { %v3059_v52 = vadd.f32 1e-05, %v3057_v9  ;;  %v2730_v62 = vmax.f32 %v2728_v42, 0.0  ;;  %v2729_v44 = vmax.f32 %v5440_v0, 0.0  ;;  %v2951_v24 = vmul.f32 %v5421_v16, %v2949_v18 }
 0x68b   :  { %v3058_v20 = vadd.f32 1e-05, %v3056_v31  ;;  %v2954_v28 = vadd.f32 %v5430_v14, %v2952_v12 }
 0x68c   :  { %4237 = vrsqrt.f32 %v3059_v52 }
 0x68d   :  { %4239 = vrsqrt.f32 %v3058_v20  ;;  %v3281_v56 = vpop.xlane.xlu1 %3280 }
 0x68e   :  { %v4226_v63 = vpop.eup %4225  ;;  %v3283_v61 = vmul.f32 0.03125, %v3281_v56  ;;  %v3278_v50 = vpop.xlane.xlu0 %3277  ;;  %v2956_v56 = vmax.f32 %v2954_v28, 0.0 }
 0x68f   :  { %v4228_v43 = vpop.eup %4227  ;;  %v2611_v37 = vmul.f32 %v4226_v63, %v5356_v5  ;;  %v3282_v29 = vmul.f32 0.03125, %v3278_v50 }
 0x690   :  { %v4230_v13 = vpop.eup %4229  ;;  %v2610_v19 = vmul.f32 %v4228_v43, %v5360_v46  ;;  %v3285_v15 = vadd.f32 1e-05, %v3283_v61 }
 0x691   :  { %v4232_v36 = vpop.eup %4231  ;;  %v2613_v6 = vmul.f32 %v5421_v16, %v2611_v37  ;;  %v3284_v27 = vadd.f32 1e-05, %v3282_v29  ;;  %v3394_v60 = vpop.xlane.xlu1 %3393  ;;  %v3176_v47 = vmul.f32 %v4230_v13, %v5344_v38  ;;  %v2953_v38 = vadd.f32 %v5430_v14, %v2951_v24 }
 0x692   :  { %v4234_v34 = vpop.eup %4233  ;;  %v2612_v5 = vmul.f32 %v5421_v16, %v2610_v19  ;;  %4241 = vrsqrt.f32 %v3285_v15  ;;  %v3396_v23 = vmul.f32 0.03125, %v3394_v60  ;;  %v3391_v11 = vpop.xlane.xlu0 %3390  ;;  %v3175_v9 = vmul.f32 %v4232_v36, %v5348_v48 }
 0x693   :  { %v4236_v21 = vpop.eup %4235  ;;  %v2615_v46 = vadd.f32 %v5430_v14, %v2613_v6  ;;  %v2837_v58 = vmul.f32 %v4234_v34, %v5368_v4  ;;  %4243 = vrsqrt.f32 %v3284_v27  ;;  %v3395_v57 = vmul.f32 0.03125, %v3391_v11 }
 0x694   :  { %v2614_v33 = vadd.f32 %v5430_v14, %v2612_v5  ;;  %v2836_v59 = vmul.f32 %v4236_v21, %v5372_v2  ;;  %v3398_v30 = vadd.f32 1e-05, %v3396_v23  ;;  %v3178_v48 = vmul.f32 %v5421_v16, %v3176_v47 }
 0x695   :  { %v2617_v55 = vmax.f32 %v2615_v46, 0.0  ;;  %v2839_v8 = vmul.f32 %v5421_v16, %v2837_v58  ;;  %v3397_v51 = vadd.f32 1e-05, %v3395_v57  ;;  %v3177_v54 = vmul.f32 %v5421_v16, %v3175_v9 }
 0x696   :  { %v4238_v41 = vpop.eup %4237  ;;  %v2616_v26 = vmax.f32 %v2614_v33, 0.0  ;;  %v2838_v4 = vmul.f32 %v5421_v16, %v2836_v59  ;;  %4245 = vrsqrt.f32 %v3398_v30  ;;  %v2955_v50 = vmax.f32 %v2953_v38, 0.0 }
 0x697   :  { %v4240_v10 = vpop.eup %4239  ;;  %v3410_v32 = vmax.f32 %v2504_v53, %v2617_v55  ;;  %v2841_v1 = vadd.f32 %v5430_v14, %v2839_v8  ;;  %v3063_v2 = vmul.f32 %v4238_v41, %v5380_v25  ;;  %4247 = vrsqrt.f32 %v3397_v51 }
 0x698   :  { %v3409_v31 = vmax.f32 %v2503_v17, %v2616_v26  ;;  %v2840_v52 = vadd.f32 %v5430_v14, %v2838_v4  ;;  %v3062_v39 = vmul.f32 %v4240_v10, %v5384_v40  ;;  %v3180_v13 = vadd.f32 %v5430_v14, %v3178_v48 }
 0x699   :  { %v2843_v45 = vmax.f32 %v2841_v1, 0.0  ;;  %v3065_v20 = vmul.f32 %v5421_v16, %v3063_v2  ;;  %v3412_v35 = vmax.f32 %v3410_v32, %v2730_v62  ;;  %v3179_v15 = vadd.f32 %v5430_v14, %v3177_v54 }
 0x69a   :  { %v2842_v42 = vmax.f32 %v2840_v52, 0.0  ;;  %v3064_v0 = vmul.f32 %v5421_v16, %v3062_v39  ;;  %v3411_v25 = vmax.f32 %v3409_v31, %v2729_v44  ;;  %v3182_v24 = vmax.f32 %v3180_v13, 0.0 }
 0x69b   :  { %v3067_v63 = vadd.f32 %v5430_v14, %v3065_v20  ;;  %v3414_v18 = vmax.f32 %v3412_v35, %v2843_v45 }
 0x69c   :  { %v4242_v61 = vpop.eup %4241  ;;  %v3066_v40 = vadd.f32 %v5430_v14, %v3064_v0  ;;  %v3413_v43 = vmax.f32 %v3411_v25, %v2842_v42 }
 0x69d   :  { %v4244_v53 = vpop.eup %4243  ;;  %v3289_v37 = vmul.f32 %v4242_v61, %v5394_v7  ;;  %v3069_v29 = vmax.f32 %v3067_v63, 0.0  ;;  %v3416_v17 = vmax.f32 %v3414_v18, %v2956_v56 }
 0x69e   :  { %v3288_v12 = vmul.f32 %v4244_v53, %v5397_v49  ;;  %v3068_v19 = vmax.f32 %v3066_v40, 0.0  ;;  %v3415_v36 = vmax.f32 %v3413_v43, %v2955_v50  ;;  %v3181_v49 = vmax.f32 %v3179_v15, 0.0 }
 0x69f   :  { %v3291_v62 = vmul.f32 %v5421_v16, %v3289_v37  ;;  %v3418_v44 = vmax.f32 %v3416_v17, %v3069_v29 }
 0x6a0   :  { %v4246_v6 = vpop.eup %4245  ;;  %v3290_v27 = vmul.f32 %v5421_v16, %v3288_v12  ;;  %v3417_v60 = vmax.f32 %v3415_v36, %v3068_v19 }
 0x6a1   :  { %v4248_v34 = vpop.eup %4247  ;;  %v3402_v7 = vmul.f32 %v4246_v6, %v5404_v3  ;;  %v3293_v5 = vadd.f32 %v5430_v14, %v3291_v62  ;;  %v3420_v58 = vmax.f32 %v3418_v44, %v3182_v24 }
 0x6a2   :  { %v3401_v23 = vmul.f32 %v4248_v34, %v5408_v22  ;;  %v3292_v11 = vadd.f32 %v5430_v14, %v3290_v27  ;;  %v3419_v33 = vmax.f32 %v3417_v60, %v3181_v49 }
 0x6a3   :  { %v3295_v21 = vmax.f32 %v3293_v5, 0.0  ;;  %v3404_v46 = vmul.f32 %v5421_v16, %v3402_v7 }
 0x6a4   :  { %v3294_v57 = vmax.f32 %v3292_v11, 0.0  ;;  %v3403_v28 = vmul.f32 %v5421_v16, %v3401_v23 }
 0x6a5   :  { %v3406_v59 = vadd.f32 %v5430_v14, %v3404_v46  ;;  %v3422_v47 = vmax.f32 %v3420_v58, %v3295_v21 }
 0x6a6   :  { %v3405_v3 = vadd.f32 %v5430_v14, %v3403_v28  ;;  %v3421_v8 = vmax.f32 %v3419_v33, %v3294_v57 }
 0x6a7   :  { %v3408_v30 = vmax.f32 %v3406_v59, 0.0 }
 0x6a8   :  { %v3407_v55 = vmax.f32 %v3405_v3, 0.0 }
 0x6a9   :  { %v3424_v22 = vmax.f32 %v3422_v47, %v3408_v30 }
 0x6aa   :  { %v3423_v51 = vmax.f32 %v3421_v8, %v3407_v55 }
 0x6ab   :  { %3429 = vrot.lane.b32.xlu1 %v3424_v22, %s4273_s14 }
 0x6ac   :  { %3427 = vrot.lane.b32.xlu0 %v3423_v51, %s4273_s14 }
 0x6af   :  { %3435 = vrot.lane.b32.xlu1 %v3424_v22, %s4274_s25 }
 0x6b0   :  { %3439 = vrot.lane.b32.xlu0 %v3423_v51, %s4275_s3 }
 0x6b3   :  { %3433 = vrot.lane.b32.xlu1 %v3423_v51, %s4274_s25 }
 0x6b7   :  { %3441 = vrot.lane.b32.xlu1 %v3424_v22, %s4275_s3 }
 0x71d   :  { %v3430_v16 = vpop.permute.xlu1 %3429 }
 0x71e   :  { %v3428_v41 = vpop.permute.xlu0 %3427  ;;  %v3446_v1 = vsel %vm149_vm2, %v3424_v22, %v3430_v16 }
 0x71f   :  { %v3445_v14 = vsel %vm149_vm2, %v3423_v51, %v3428_v41 }
 0x721   :  { %v3436_v9 = vpop.permute.xlu1 %3435 }
 0x722   :  { %v3440_v4 = vpop.permute.xlu0 %3439  ;;  %v3449_v2 = vsel %vm3447_vm4, %v3446_v1, %v3436_v9 }
 0x725   :  { %v3434_v26 = vpop.permute.xlu1 %3433 }
 0x726   :  { %v3448_v10 = vsel %vm3447_vm4, %v3445_v14, %v3434_v26 }
 0x727   :  { %v3451_v32 = vsel %vm3450_vm3, %v3448_v10, %v3440_v4 }
 0x728   :  { %3453 = vst [vmem:[#allocation2] sm:$0xff] %v3451_v32 }
 0x729   :  { %v3442_v38 = vpop.permute.xlu1 %3441 }
 0x72a   :  { %v3452_v31 = vsel %vm3450_vm3, %v3449_v2, %v3442_v38 }
 0x72b   :  { %3454 = vst [vmem:[#allocation2 + $0x8] sm:$0xff] %v3452_v31 }
 0x72c   :  { %4260 = shalt.err (!%p4257_p4)
}
 0x72d   :  { %s4261_s26 = scalar_lea.hbm %s5513_s15, 256 }
 0x72e   :  { %p4262_p5 = scmp.ne.s32.totalorder %s5513_s15, %s4261_s26  ;;  %p4265_p6 = scmp.lt.u32.totalorder %s4261_s26, %s5513_s15 }
 0x730   :  { %p4267_p7 = pnand %p4265_p6, %p4262_p5 }
 0x732   :  { %4270 = shalt.err (!%p4267_p7)
}
 0x733   :  { %s4277_s16 = smov 128   ;;  %s4278_s17 = smov 8  }
 0x734   :  { %3466 = dma.vmem_to_hbm [thread:$0]  %s3461_s7, 256, %s5513_s15, [#allocation3], %s4277_s16, %s4277_s16, %s4278_s17  }
 0x735   :  { %4271 = dma.done.wait [#allocation3], 256  }
 0x736   :  { %4272 = vsyncadd [#allocation3], 4294967040 }
 0x737   :  { %3470 = vsyncpa [#allocation3], 1 }

</bundles_post_ra>
